<compile_context>
chip_gen: v6e
topology: v6e:2x2x1
jax: 0.10.0
libtpu: 0.0.40
codegen_flags: <defaults>
</compile_context>

<pallas_src>
import jax
import jax.numpy as jnp
from jax.experimental import pallas as pl
from jax.experimental.pallas import tpu as pltpu

# ---- synthetic LED-like model dims (small stand-ins for the real 1024-ctx LED) ----
VOCAB = 64
D_MODEL = 32
N_HEADS = 4
HEAD_DIM = D_MODEL // N_HEADS
FFN = 64
ENC_LEN = 8          # stands in for max_length=1024
DEC_LEN = 8          # stands in for generate(max_length=1024)
BOS_ID = 1
EPS = 1e-5
SCALE = 1.0 / float(HEAD_DIM) ** 0.5
NEG = -1e30


# =======================  in-kernel math helpers (pure jnp)  =======================

def _ln(x, g, b):
    """f32 LayerNorm over the last axis."""
    mean = jnp.mean(x, axis=-1, keepdims=True)
    var = jnp.mean(jnp.square(x - mean), axis=-1, keepdims=True)
    return (x - mean) * jax.lax.rsqrt(var + EPS) * g + b


def _heads(h, w3, b3):
    """Head-split projection: [S, D] x [H, D, dh] -> [H, S, dh] (+ bias [H, 1, dh])."""
    h3 = jnp.broadcast_to(h[None], (w3.shape[0],) + h.shape)
    return jnp.einsum("hsd,hdf->hsf", h3, w3,
                      preferred_element_type=jnp.float32) + b3


def _attn_heads(q3, k3, v3, bias3, wo3, bo):
    """Head-batched attention + merged output projection.

    q3: [H, Sq, dh], k3/v3: [H, Sk, dh], bias3: broadcastable to [H, Sq, Sk],
    wo3: [H, dh, D], bo: [1, D].  Returns the [Sq, D] attention output.
    """
    s3 = jnp.einsum("hqf,hkf->hqk", q3, k3,
                    preferred_element_type=jnp.float32) * SCALE + bias3
    m3 = jnp.max(s3, axis=-1, keepdims=True)
    p3 = jnp.exp(s3 - m3)
    d3 = jnp.sum(p3, axis=-1, keepdims=True)
    p3 = p3 * pl.reciprocal(d3, approx=True)          # EUP reciprocal
    o3 = jnp.einsum("hqk,hkf->hqf", p3, v3, preferred_element_type=jnp.float32)
    y3 = jnp.einsum("hqf,hfd->hqd", o3, wo3, preferred_element_type=jnp.float32)
    return jnp.sum(y3, axis=0) + bo                   # merge heads


def _ffn(x, lng, lnb, w1, b1, w2, b2):
    """Pre-LN feed-forward delta: fc2(gelu(fc1(LN(x))))."""
    h = _ln(x, lng, lnb)
    y = jnp.dot(h, w1, preferred_element_type=jnp.float32) + b1
    y = jax.nn.gelu(y, approximate=True)
    return jnp.dot(y, w2, preferred_element_type=jnp.float32) + b2


# =======================  fused Pallas kernels  =======================

def _encoder_kernel(x_ref, kmask_ref,
                    sa_lng, sa_lnb, sa_wq3, sa_wk3, sa_wv3,
                    sa_bq3, sa_bk3, sa_bv3, sa_wo3, sa_bo,
                    f_lng, f_lnb, f_w1, f_b1, f_w2, f_b2,
                    fin_g, fin_b,
                    ca_wk3, ca_bk3, ca_wv3, ca_bv3,
                    kc_ref, vc_ref):
    """Fused encoder: self-attn + FFN + final LN + hoisted cross-attn K/V projection.

    Outputs only the cross-attention K/V tensors ([H, ENC_LEN, dh] each) that the
    decode kernel needs every step.
    """
    x = x_ref[...]                                    # [S, D] f32
    s = x.shape[0]
    # key-padding mask as an additive bias, built once
    kbias = jnp.where(kmask_ref[...] > 0.0, 0.0, NEG).astype(jnp.float32)   # [1, S]
    kbias3 = jnp.broadcast_to(kbias[None], (N_HEADS, s, s))

    # --- self-attention block (pre-LN, residual) ---
    h = _ln(x, sa_lng[...], sa_lnb[...])
    q3 = _heads(h, sa_wq3[...], sa_bq3[...])
    k3 = _heads(h, sa_wk3[...], sa_bk3[...])
    v3 = _heads(h, sa_wv3[...], sa_bv3[...])
    x = x + _attn_heads(q3, k3, v3, kbias3, sa_wo3[...], sa_bo[...])

    # --- FFN block ---
    x = x + _ffn(x, f_lng[...], f_lnb[...], f_w1[...], f_b1[...],
                 f_w2[...], f_b2[...])

    # --- final encoder LayerNorm ---
    enc = _ln(x, fin_g[...], fin_b[...])

    # --- hoisted cross-attention K/V (computed once, reused every decode step) ---
    kc_ref[...] = _heads(enc, ca_wk3[...], ca_bk3[...])
    vc_ref[...] = _heads(enc, ca_wv3[...], ca_bv3[...])


def _decode_kernel(kc_ref, vc_ref, enc_kmask_ref, x0_ref, emb_ref,
                   sa_lng, sa_lnb, sa_wq3, sa_wk3, sa_wv3,
                   sa_bq3, sa_bk3, sa_bv3, sa_wo3, sa_bo,
                   ca_lng, ca_lnb, ca_wq3, ca_bq3, ca_wo3, ca_bo,
                   f_lng, f_lnb, f_w1, f_b1, f_w2, f_b2,
                   fin_g, fin_b,
                   out_ids_ref):
    """Entire greedy decode loop fused into one kernel.

    All weights / encoder K,V stay VMEM-resident; the per-step state (token
    embeddings + generated ids) is carried in the fori_loop.
    """
    s, se = DEC_LEN, ENC_LEN

    # loop-invariant values: encoder K/V and all mask biases, built ONCE
    kc3 = kc_ref[...]                                  # [H, Se, dh]
    vc3 = vc_ref[...]
    rows = jax.lax.broadcasted_iota(jnp.int32, (s, s), 0)
    cols = jax.lax.broadcasted_iota(jnp.int32, (s, s), 1)
    causal_bias = jnp.where(rows >= cols, 0.0, NEG).astype(jnp.float32)      # [s, s]
    causal_b3 = jnp.broadcast_to(causal_bias[None], (N_HEADS, s, s))
    cross_bias = jnp.where(enc_kmask_ref[...] > 0.0, 0.0, NEG).astype(jnp.float32)
    cross_b3 = jnp.broadcast_to(cross_bias[None], (N_HEADS, s, se))

    lane_v = jax.lax.broadcasted_iota(jnp.int32, (1, VOCAB), 1)   # vocab lane ids
    lane_s = jax.lax.broadcasted_iota(jnp.int32, (1, s), 1)       # output lane ids
    row_s = jax.lax.broadcasted_iota(jnp.int32, (s, 1), 0)        # decoder row ids
    emb = emb_ref[...]                                            # [V, D] tied emb

    # ids[0] = BOS; x_emb row 0 already contains emb[BOS] + pos_dec[0] (x0)
    ids0 = jnp.where(lane_s == 0, BOS_ID, 0).astype(jnp.int32)    # [1, s]
    x0 = x0_ref[...]                                              # [s, D]

    def step(t, carry):
        x_emb, ids = carry

        # ---- one full decoder layer (pre-LN) over the whole sequence ----
        h = _ln(x_emb, sa_lng[...], sa_lnb[...])
        q3 = _heads(h, sa_wq3[...], sa_bq3[...])
        k3 = _heads(h, sa_wk3[...], sa_bk3[...])
        v3 = _heads(h, sa_wv3[...], sa_bv3[...])
        x = x_emb + _attn_heads(q3, k3, v3, causal_b3, sa_wo3[...], sa_bo[...])

        h = _ln(x, ca_lng[...], ca_lnb[...])
        q3 = _heads(h, ca_wq3[...], ca_bq3[...])
        x = x + _attn_heads(q3, kc3, vc3, cross_b3, ca_wo3[...], ca_bo[...])

        x = x + _ffn(x, f_lng[...], f_lnb[...], f_w1[...], f_b1[...],
                     f_w2[...], f_b2[...])

        # ---- final LN + tied LM head for row t-1 only, greedy argmax in-kernel ----
        sel = (row_s == (t - 1)).astype(jnp.float32)              # [s, 1]
        xr = jnp.sum(x * sel, axis=0, keepdims=True)              # [1, D]
        hr = _ln(xr, fin_g[...], fin_b[...])
        logits = jax.lax.dot_general(hr, emb, (((1,), (1,)), ((), ())),
                                     preferred_element_type=jnp.float32)  # [1, V]
        m = jnp.max(logits, axis=-1, keepdims=True)
        # argmax with first-occurrence tie-break, via basic VALU/XLU ops
        nxt = jnp.min(jnp.where(logits >= m, lane_v, VOCAB),
                      axis=-1, keepdims=True)                     # [1, 1] int32

        # write the new token id at output position t
        ids = jnp.where(lane_s == t, nxt, ids)

        # embed the new token (one-hot matmul, tied embedding) into x_emb row t
        onehot = (lane_v == nxt).astype(jnp.float32)              # [1, V]
        tok = jnp.dot(onehot, emb, preferred_element_type=jnp.float32)   # [1, D]
        x_emb = jnp.where(row_s == t, x_emb + tok, x_emb)
        return (x_emb, ids)

    _, ids = jax.lax.fori_loop(1, s, step, (x0, ids0))
    out_ids_ref[...] = ids


# =======================  pallas_call wrappers / model glue  =======================

def _vmem_specs(n):
    return [pl.BlockSpec(memory_space=pltpu.MemorySpace.VMEM) for _ in range(n)]


@jax.jit
def generate(pp, input_ids, attention_mask):
    """Greedy (num_beams=1) generation; two fused pallas_calls total."""
    enc_kmask = attention_mask.astype(jnp.float32).reshape(1, ENC_LEN)
    x_enc = pp["emb"][input_ids] + pp["pos_enc"]                  # [ENC_LEN, D]

    e = pp["enc"]["self_attn"]
    ef = pp["enc"]["ffn"]
    c = pp["dec"]["cross_attn"]
    d = pp["dec"]["self_attn"]
    df = pp["dec"]["ffn"]

    # ---- fused encoder (runs once): self-attn + FFN + final LN + cross K/V ----
    enc_args = (x_enc, enc_kmask,
                e["ln_g"], e["ln_b"], e["wq3"], e["wk3"], e["wv3"],
                e["bq3"], e["bk3"], e["bv3"], e["wo3"], e["bo"],
                ef["ln_g"], ef["ln_b"], ef["w1"], ef["b1"], ef["w2"], ef["b2"],
                pp["enc_final_g"], pp["enc_final_b"],
                c["wk3"], c["bk3"], c["wv3"], c["bv3"])
    kc3, vc3 = pl.pallas_call(
        _encoder_kernel,
        out_shape=(jax.ShapeDtypeStruct((N_HEADS, ENC_LEN, HEAD_DIM), jnp.float32),
                   jax.ShapeDtypeStruct((N_HEADS, ENC_LEN, HEAD_DIM), jnp.float32)),
        in_specs=_vmem_specs(len(enc_args)),
        out_specs=(pl.BlockSpec(memory_space=pltpu.MemorySpace.VMEM),
                   pl.BlockSpec(memory_space=pltpu.MemorySpace.VMEM)),
    )(*enc_args)

    # initial decoder token embeddings: pos_dec for every row, + emb[BOS] on row 0.
    # (rows beyond the current step never affect earlier rows due to causal masking)
    x0 = pp["pos_dec"].at[0].add(pp["emb"][BOS_ID])

    # ---- fused greedy decode loop (single kernel launch) ----
    dec_args = (kc3, vc3, enc_kmask, x0, pp["emb"],
                d["ln_g"], d["ln_b"], d["wq3"], d["wk3"], d["wv3"],
                d["bq3"], d["bk3"], d["bv3"], d["wo3"], d["bo"],
                c["ln_g"], c["ln_b"], c["wq3"], c["bq3"], c["wo3"], c["bo"],
                df["ln_g"], df["ln_b"], df["w1"], df["b1"], df["w2"], df["b2"],
                pp["dec_final_g"], pp["dec_final_b"])
    ids = pl.pallas_call(
        _decode_kernel,
        out_shape=jax.ShapeDtypeStruct((1, DEC_LEN), jnp.int32),
        in_specs=_vmem_specs(len(dec_args)),
        out_specs=pl.BlockSpec(memory_space=pltpu.MemorySpace.VMEM),
    )(*dec_args)
    return ids.reshape(DEC_LEN)


# =======================  deterministic param init  =======================

def init_params(key):
    keys = jax.random.split(key, 32)
    it = iter(keys)

    def w(shape, scale=0.02):
        return jax.random.normal(next(it), shape, jnp.float32) * scale

    def zeros_row(n):
        return jnp.zeros((1, n), jnp.float32)

    def ones_row(n):
        return jnp.ones((1, n), jnp.float32)

    def split_w(m):      # [D, D] -> [H, D, dh]   (head-split projection weight)
        return m.reshape(D_MODEL, N_HEADS, HEAD_DIM).transpose(1, 0, 2)

    def split_b(v):      # [1, D] -> [H, 1, dh]
        return v.reshape(1, N_HEADS, HEAD_DIM).transpose(1, 0, 2)

    def attn():
        return {
            "ln_g": ones_row(D_MODEL), "ln_b": zeros_row(D_MODEL),
            "wq3": split_w(w((D_MODEL, D_MODEL))), "bq3": split_b(zeros_row(D_MODEL)),
            "wk3": split_w(w((D_MODEL, D_MODEL))), "bk3": split_b(zeros_row(D_MODEL)),
            "wv3": split_w(w((D_MODEL, D_MODEL))), "bv3": split_b(zeros_row(D_MODEL)),
            # [H, dh, D]: row-block h of the concat-heads output projection
            "wo3": w((D_MODEL, D_MODEL)).reshape(N_HEADS, HEAD_DIM, D_MODEL),
            "bo": zeros_row(D_MODEL),
        }

    def ffn():
        return {
            "ln_g": ones_row(D_MODEL), "ln_b": zeros_row(D_MODEL),
            "w1": w((D_MODEL, FFN)), "b1": zeros_row(FFN),
            "w2": w((FFN, D_MODEL)), "b2": zeros_row(D_MODEL),
        }

    return {
        "emb": w((VOCAB, D_MODEL)),                    # tied input emb / LM head
        "pos_enc": w((ENC_LEN, D_MODEL)),
        "pos_dec": w((DEC_LEN, D_MODEL)),
        "enc": {"self_attn": attn(), "ffn": ffn()},
        "dec": {"self_attn": attn(), "cross_attn": attn(), "ffn": ffn()},
        "enc_final_g": ones_row(D_MODEL), "enc_final_b": zeros_row(D_MODEL),
        "dec_final_g": ones_row(D_MODEL), "dec_final_b": zeros_row(D_MODEL),
    }


# =======================  main  =======================

if __name__ == "__main__":
    key = jax.random.PRNGKey(0)
    pkey, ikey = jax.random.split(key)

    params = init_params(pkey)

    # stand-in for tokenizer output: token ids + attention mask (last 2 tokens padded)
    input_ids = jax.random.randint(ikey, (ENC_LEN,), 2, VOCAB, dtype=jnp.int32)
    attention_mask = jnp.ones((ENC_LEN,), jnp.float32).at[ENC_LEN - 2:].set(0.0)

    out_tokens = generate(params, input_ids, attention_mask)
    jax.block_until_ready(out_tokens)
    print("KERNEL_OK")
</pallas_src>

<mosaic_0001>
module attributes {stable_mosaic.version = 11 : i64} {
  func.func @_decode_kernel(%arg0: memref<4x8x8xf32, #tpu.memory_space<vmem>>, %arg1: memref<4x8x8xf32, #tpu.memory_space<vmem>>, %arg2: memref<1x8xf32, #tpu.memory_space<vmem>>, %arg3: memref<8x32xf32, #tpu.memory_space<vmem>>, %arg4: memref<64x32xf32, #tpu.memory_space<vmem>>, %arg5: memref<1x32xf32, #tpu.memory_space<vmem>>, %arg6: memref<1x32xf32, #tpu.memory_space<vmem>>, %arg7: memref<4x32x8xf32, #tpu.memory_space<vmem>>, %arg8: memref<4x32x8xf32, #tpu.memory_space<vmem>>, %arg9: memref<4x32x8xf32, #tpu.memory_space<vmem>>, %arg10: memref<4x1x8xf32, #tpu.memory_space<vmem>>, %arg11: memref<4x1x8xf32, #tpu.memory_space<vmem>>, %arg12: memref<4x1x8xf32, #tpu.memory_space<vmem>>, %arg13: memref<4x8x32xf32, #tpu.memory_space<vmem>>, %arg14: memref<1x32xf32, #tpu.memory_space<vmem>>, %arg15: memref<1x32xf32, #tpu.memory_space<vmem>>, %arg16: memref<1x32xf32, #tpu.memory_space<vmem>>, %arg17: memref<4x32x8xf32, #tpu.memory_space<vmem>>, %arg18: memref<4x1x8xf32, #tpu.memory_space<vmem>>, %arg19: memref<4x8x32xf32, #tpu.memory_space<vmem>>, %arg20: memref<1x32xf32, #tpu.memory_space<vmem>>, %arg21: memref<1x32xf32, #tpu.memory_space<vmem>>, %arg22: memref<1x32xf32, #tpu.memory_space<vmem>>, %arg23: memref<32x64xf32, #tpu.memory_space<vmem>>, %arg24: memref<1x64xf32, #tpu.memory_space<vmem>>, %arg25: memref<64x32xf32, #tpu.memory_space<vmem>>, %arg26: memref<1x32xf32, #tpu.memory_space<vmem>>, %arg27: memref<1x32xf32, #tpu.memory_space<vmem>>, %arg28: memref<1x32xf32, #tpu.memory_space<vmem>>, %arg29: memref<1x8xi32, #tpu.memory_space<vmem>>) attributes {dimension_semantics = [], scalar_prefetch = 0 : i64, scratch_operands = 0 : i64, tpu.core_type = #tpu.core_type<tc>} {
    %c0 = arith.constant 0 : index
    %c0_0 = arith.constant 0 : index
    %c0_1 = arith.constant 0 : index
    %0 = vector.load %arg0[%c0, %c0_0, %c0_1] : memref<4x8x8xf32, #tpu.memory_space<vmem>>, vector<4x8x8xf32>
    %c0_2 = arith.constant 0 : index
    %c0_3 = arith.constant 0 : index
    %c0_4 = arith.constant 0 : index
    %1 = vector.load %arg1[%c0_2, %c0_3, %c0_4] : memref<4x8x8xf32, #tpu.memory_space<vmem>>, vector<4x8x8xf32>
    %2 = tpu.iota {dimensions = array<i32: 0>} : vector<8x8xi32>
    %3 = tpu.iota {dimensions = array<i32: 1>} : vector<8x8xi32>
    %4 = arith.cmpi sge, %2, %3 : vector<8x8xi32>
    %cst = arith.constant 0.000000e+00 : f32
    %cst_5 = arith.constant -1.000000e+30 : f32
    %5 = vector.broadcast %cst : f32 to vector<8x8xf32>
    %6 = vector.broadcast %cst_5 : f32 to vector<8x8xf32>
    %7 = arith.select %4, %5, %6 : vector<8x8xi1>, vector<8x8xf32>
    %8 = vector.shape_cast %7 : vector<8x8xf32> to vector<1x8x8xf32>
    %9 = vector.shape_cast %8 : vector<1x8x8xf32> to vector<1x8x8xf32>
    %10 = vector.broadcast %9 : vector<1x8x8xf32> to vector<4x8x8xf32>
    %c0_6 = arith.constant 0 : index
    %c0_7 = arith.constant 0 : index
    %11 = vector.load %arg2[%c0_6, %c0_7] : memref<1x8xf32, #tpu.memory_space<vmem>>, vector<1x8xf32>
    %cst_8 = arith.constant 0.000000e+00 : f32
    %12 = vector.broadcast %cst_8 : f32 to vector<1x8xf32>
    %13 = arith.cmpf ogt, %11, %12 : vector<1x8xf32>
    %cst_9 = arith.constant 0.000000e+00 : f32
    %cst_10 = arith.constant -1.000000e+30 : f32
    %14 = vector.broadcast %cst_9 : f32 to vector<1x8xf32>
    %15 = vector.broadcast %cst_10 : f32 to vector<1x8xf32>
    %16 = arith.select %13, %14, %15 : vector<1x8xi1>, vector<1x8xf32>
    %17 = vector.shape_cast %16 : vector<1x8xf32> to vector<1x1x8xf32>
    %18 = vector.shape_cast %17 : vector<1x1x8xf32> to vector<1x1x8xf32>
    %19 = vector.broadcast %18 : vector<1x1x8xf32> to vector<4x8x8xf32>
    %20 = tpu.iota {dimensions = array<i32: 1>} : vector<1x64xi32>
    %21 = tpu.iota {dimensions = array<i32: 1>} : vector<1x8xi32>
    %22 = tpu.iota {dimensions = array<i32: 0>} : vector<8x1xi32>
    %c0_11 = arith.constant 0 : index
    %c0_12 = arith.constant 0 : index
    %23 = vector.load %arg4[%c0_11, %c0_12] : memref<64x32xf32, #tpu.memory_space<vmem>>, vector<64x32xf32>
    %c0_i32 = arith.constant 0 : i32
    %24 = vector.broadcast %c0_i32 : i32 to vector<1x8xi32>
    %25 = arith.cmpi eq, %21, %24 : vector<1x8xi32>
    %c1_i32 = arith.constant 1 : i32
    %c0_i32_13 = arith.constant 0 : i32
    %26 = vector.broadcast %c1_i32 : i32 to vector<1x8xi32>
    %27 = vector.broadcast %c0_i32_13 : i32 to vector<1x8xi32>
    %28 = arith.select %25, %26, %27 : vector<1x8xi1>, vector<1x8xi32>
    %c0_14 = arith.constant 0 : index
    %c0_15 = arith.constant 0 : index
    %29 = vector.load %arg3[%c0_14, %c0_15] : memref<8x32xf32, #tpu.memory_space<vmem>>, vector<8x32xf32>
    %c1_i32_16 = arith.constant 1 : i32
    %c7_i32 = arith.constant 7 : i32
    %30 = arith.addi %c1_i32_16, %c7_i32 : i32
    %c1_i32_17 = arith.constant 1 : i32
    %31:2 = scf.for %arg30 = %c1_i32_16 to %30 step %c1_i32_17 iter_args(%arg31 = %29, %arg32 = %28) -> (vector<8x32xf32>, vector<1x8xi32>)  : i32 {
      %c0_21 = arith.constant 0 : index
      %c0_22 = arith.constant 0 : index
      %33 = vector.load %arg5[%c0_21, %c0_22] : memref<1x32xf32, #tpu.memory_space<vmem>>, vector<1x32xf32>
      %c0_23 = arith.constant 0 : index
      %c0_24 = arith.constant 0 : index
      %34 = vector.load %arg6[%c0_23, %c0_24] : memref<1x32xf32, #tpu.memory_space<vmem>>, vector<1x32xf32>
      %cst_25 = arith.constant dense<0.000000e+00> : vector<8xf32>
      %35 = vector.multi_reduction <add>, %arg31, %cst_25 [1] : vector<8x32xf32> to vector<8xf32>
      %36 = vector.shape_cast %35 : vector<8xf32> to vector<8x1xf32>
      %cst_26 = arith.constant 3.200000e+01 : f32
      %37 = vector.broadcast %cst_26 : f32 to vector<8x1xf32>
      %38 = arith.divf %36, %37 : vector<8x1xf32>
      %39 = vector.broadcast %38 : vector<8x1xf32> to vector<8x32xf32>
      %40 = arith.subf %arg31, %39 : vector<8x32xf32>
      %41 = arith.mulf %40, %40 : vector<8x32xf32>
      %cst_27 = arith.constant dense<0.000000e+00> : vector<8xf32>
      %42 = vector.multi_reduction <add>, %41, %cst_27 [1] : vector<8x32xf32> to vector<8xf32>
      %43 = vector.shape_cast %42 : vector<8xf32> to vector<8x1xf32>
      %cst_28 = arith.constant 3.200000e+01 : f32
      %44 = vector.broadcast %cst_28 : f32 to vector<8x1xf32>
      %45 = arith.divf %43, %44 : vector<8x1xf32>
      %46 = vector.broadcast %38 : vector<8x1xf32> to vector<8x32xf32>
      %47 = arith.subf %arg31, %46 : vector<8x32xf32>
      %cst_29 = arith.constant 9.99999974E-6 : f32
      %48 = vector.broadcast %cst_29 : f32 to vector<8x1xf32>
      %49 = arith.addf %45, %48 : vector<8x1xf32>
      %50 = math.rsqrt %49 : vector<8x1xf32>
      %51 = vector.broadcast %50 : vector<8x1xf32> to vector<8x32xf32>
      %52 = arith.mulf %47, %51 : vector<8x32xf32>
      %53 = vector.broadcast %33 : vector<1x32xf32> to vector<8x32xf32>
      %54 = arith.mulf %52, %53 : vector<8x32xf32>
      %55 = vector.broadcast %34 : vector<1x32xf32> to vector<8x32xf32>
      %56 = arith.addf %54, %55 : vector<8x32xf32>
      %c0_30 = arith.constant 0 : index
      %c0_31 = arith.constant 0 : index
      %c0_32 = arith.constant 0 : index
      %57 = vector.load %arg7[%c0_30, %c0_31, %c0_32] : memref<4x32x8xf32, #tpu.memory_space<vmem>>, vector<4x32x8xf32>
      %c0_33 = arith.constant 0 : index
      %c0_34 = arith.constant 0 : index
      %c0_35 = arith.constant 0 : index
      %58 = vector.load %arg10[%c0_33, %c0_34, %c0_35] : memref<4x1x8xf32, #tpu.memory_space<vmem>>, vector<4x1x8xf32>
      %59 = vector.shape_cast %56 : vector<8x32xf32> to vector<1x8x32xf32>
      %60 = vector.shape_cast %59 : vector<1x8x32xf32> to vector<1x8x32xf32>
      %61 = vector.broadcast %60 : vector<1x8x32xf32> to vector<4x8x32xf32>
      "tpu.trace_start"() <{level = 10 : i32, message = "hsd,hdf->hsf"}> : () -> ()
      %cst_36 = arith.constant dense<0.000000e+00> : vector<4x8x8xf32>
      %62 = tpu.matmul %61, %57, %cst_36 {dimension_numbers = #tpu.dot_dimension_numbers<[2], [1], [1], [2], [0, 0, 0, 1, 1, 2], [0], [0]>} : vector<4x8x32xf32>, vector<4x32x8xf32>, vector<4x8x8xf32> -> vector<4x8x8xf32>
      "tpu.trace_stop"() : () -> ()
      %63 = vector.broadcast %58 : vector<4x1x8xf32> to vector<4x8x8xf32>
      %64 = arith.addf %62, %63 : vector<4x8x8xf32>
      %c0_37 = arith.constant 0 : index
      %c0_38 = arith.constant 0 : index
      %c0_39 = arith.constant 0 : index
      %65 = vector.load %arg8[%c0_37, %c0_38, %c0_39] : memref<4x32x8xf32, #tpu.memory_space<vmem>>, vector<4x32x8xf32>
      %c0_40 = arith.constant 0 : index
      %c0_41 = arith.constant 0 : index
      %c0_42 = arith.constant 0 : index
      %66 = vector.load %arg11[%c0_40, %c0_41, %c0_42] : memref<4x1x8xf32, #tpu.memory_space<vmem>>, vector<4x1x8xf32>
      %67 = vector.shape_cast %56 : vector<8x32xf32> to vector<1x8x32xf32>
      %68 = vector.shape_cast %67 : vector<1x8x32xf32> to vector<1x8x32xf32>
      %69 = vector.broadcast %68 : vector<1x8x32xf32> to vector<4x8x32xf32>
      "tpu.trace_start"() <{level = 10 : i32, message = "hsd,hdf->hsf"}> : () -> ()
      %cst_43 = arith.constant dense<0.000000e+00> : vector<4x8x8xf32>
      %70 = tpu.matmul %69, %65, %cst_43 {dimension_numbers = #tpu.dot_dimension_numbers<[2], [1], [1], [2], [0, 0, 0, 1, 1, 2], [0], [0]>} : vector<4x8x32xf32>, vector<4x32x8xf32>, vector<4x8x8xf32> -> vector<4x8x8xf32>
      "tpu.trace_stop"() : () -> ()
      %71 = vector.broadcast %66 : vector<4x1x8xf32> to vector<4x8x8xf32>
      %72 = arith.addf %70, %71 : vector<4x8x8xf32>
      %c0_44 = arith.constant 0 : index
      %c0_45 = arith.constant 0 : index
      %c0_46 = arith.constant 0 : index
      %73 = vector.load %arg9[%c0_44, %c0_45, %c0_46] : memref<4x32x8xf32, #tpu.memory_space<vmem>>, vector<4x32x8xf32>
      %c0_47 = arith.constant 0 : index
      %c0_48 = arith.constant 0 : index
      %c0_49 = arith.constant 0 : index
      %74 = vector.load %arg12[%c0_47, %c0_48, %c0_49] : memref<4x1x8xf32, #tpu.memory_space<vmem>>, vector<4x1x8xf32>
      %75 = vector.shape_cast %56 : vector<8x32xf32> to vector<1x8x32xf32>
      %76 = vector.shape_cast %75 : vector<1x8x32xf32> to vector<1x8x32xf32>
      %77 = vector.broadcast %76 : vector<1x8x32xf32> to vector<4x8x32xf32>
      "tpu.trace_start"() <{level = 10 : i32, message = "hsd,hdf->hsf"}> : () -> ()
      %cst_50 = arith.constant dense<0.000000e+00> : vector<4x8x8xf32>
      %78 = tpu.matmul %77, %73, %cst_50 {dimension_numbers = #tpu.dot_dimension_numbers<[2], [1], [1], [2], [0, 0, 0, 1, 1, 2], [0], [0]>} : vector<4x8x32xf32>, vector<4x32x8xf32>, vector<4x8x8xf32> -> vector<4x8x8xf32>
      "tpu.trace_stop"() : () -> ()
      %79 = vector.broadcast %74 : vector<4x1x8xf32> to vector<4x8x8xf32>
      %80 = arith.addf %78, %79 : vector<4x8x8xf32>
      %c0_51 = arith.constant 0 : index
      %c0_52 = arith.constant 0 : index
      %c0_53 = arith.constant 0 : index
      %81 = vector.load %arg13[%c0_51, %c0_52, %c0_53] : memref<4x8x32xf32, #tpu.memory_space<vmem>>, vector<4x8x32xf32>
      %c0_54 = arith.constant 0 : index
      %c0_55 = arith.constant 0 : index
      %82 = vector.load %arg14[%c0_54, %c0_55] : memref<1x32xf32, #tpu.memory_space<vmem>>, vector<1x32xf32>
      "tpu.trace_start"() <{level = 10 : i32, message = "hqf,hkf->hqk"}> : () -> ()
      %cst_56 = arith.constant dense<0.000000e+00> : vector<4x8x8xf32>
      %83 = tpu.matmul %64, %72, %cst_56 {dimension_numbers = #tpu.dot_dimension_numbers<[2], [2], [1], [1], [0, 0, 0, 1, 1, 1], [0], [0]>} : vector<4x8x8xf32>, vector<4x8x8xf32>, vector<4x8x8xf32> -> vector<4x8x8xf32>
      "tpu.trace_stop"() : () -> ()
      %cst_57 = arith.constant 0.353553385 : f32
      %84 = vector.broadcast %cst_57 : f32 to vector<4x8x8xf32>
      %85 = arith.mulf %83, %84 : vector<4x8x8xf32>
      %86 = arith.addf %85, %10 : vector<4x8x8xf32>
      %cst_58 = arith.constant dense<0xFF800000> : vector<4x8xf32>
      %87 = vector.multi_reduction <maximumf>, %86, %cst_58 [2] : vector<4x8x8xf32> to vector<4x8xf32>
      %88 = vector.shape_cast %87 : vector<4x8xf32> to vector<4x8x1xf32>
      %89 = vector.broadcast %88 : vector<4x8x1xf32> to vector<4x8x8xf32>
      %90 = arith.subf %86, %89 : vector<4x8x8xf32>
      %91 = math.exp %90 : vector<4x8x8xf32>
      %cst_59 = arith.constant dense<0.000000e+00> : vector<4x8xf32>
      %92 = vector.multi_reduction <add>, %91, %cst_59 [2] : vector<4x8x8xf32> to vector<4x8xf32>
      %93 = vector.shape_cast %92 : vector<4x8xf32> to vector<4x8x1xf32>
      %94 = tpu.reciprocal %93 {approx = true} : vector<4x8x1xf32> -> vector<4x8x1xf32>
      %95 = vector.broadcast %94 : vector<4x8x1xf32> to vector<4x8x8xf32>
      %96 = arith.mulf %91, %95 : vector<4x8x8xf32>
      "tpu.trace_start"() <{level = 10 : i32, message = "hqk,hkf->hqf"}> : () -> ()
      %cst_60 = arith.constant dense<0.000000e+00> : vector<4x8x8xf32>
      %97 = tpu.matmul %96, %80, %cst_60 {dimension_numbers = #tpu.dot_dimension_numbers<[2], [1], [1], [2], [0, 0, 0, 1, 1, 2], [0], [0]>} : vector<4x8x8xf32>, vector<4x8x8xf32>, vector<4x8x8xf32> -> vector<4x8x8xf32>
      "tpu.trace_stop"() : () -> ()
      "tpu.trace_start"() <{level = 10 : i32, message = "hqf,hfd->hqd"}> : () -> ()
      %cst_61 = arith.constant dense<0.000000e+00> : vector<4x8x32xf32>
      %98 = tpu.matmul %97, %81, %cst_61 {dimension_numbers = #tpu.dot_dimension_numbers<[2], [1], [1], [2], [0, 0, 0, 1, 1, 2], [0], [0]>} : vector<4x8x8xf32>, vector<4x8x32xf32>, vector<4x8x32xf32> -> vector<4x8x32xf32>
      "tpu.trace_stop"() : () -> ()
      %cst_62 = arith.constant dense<0.000000e+00> : vector<8x32xf32>
      %99 = vector.multi_reduction <add>, %98, %cst_62 [0] : vector<4x8x32xf32> to vector<8x32xf32>
      %100 = vector.broadcast %82 : vector<1x32xf32> to vector<8x32xf32>
      %101 = arith.addf %99, %100 : vector<8x32xf32>
      %102 = arith.addf %arg31, %101 : vector<8x32xf32>
      %c0_63 = arith.constant 0 : index
      %c0_64 = arith.constant 0 : index
      %103 = vector.load %arg15[%c0_63, %c0_64] : memref<1x32xf32, #tpu.memory_space<vmem>>, vector<1x32xf32>
      %c0_65 = arith.constant 0 : index
      %c0_66 = arith.constant 0 : index
      %104 = vector.load %arg16[%c0_65, %c0_66] : memref<1x32xf32, #tpu.memory_space<vmem>>, vector<1x32xf32>
      %cst_67 = arith.constant dense<0.000000e+00> : vector<8xf32>
      %105 = vector.multi_reduction <add>, %102, %cst_67 [1] : vector<8x32xf32> to vector<8xf32>
      %106 = vector.shape_cast %105 : vector<8xf32> to vector<8x1xf32>
      %cst_68 = arith.constant 3.200000e+01 : f32
      %107 = vector.broadcast %cst_68 : f32 to vector<8x1xf32>
      %108 = arith.divf %106, %107 : vector<8x1xf32>
      %109 = vector.broadcast %108 : vector<8x1xf32> to vector<8x32xf32>
      %110 = arith.subf %102, %109 : vector<8x32xf32>
      %111 = arith.mulf %110, %110 : vector<8x32xf32>
      %cst_69 = arith.constant dense<0.000000e+00> : vector<8xf32>
      %112 = vector.multi_reduction <add>, %111, %cst_69 [1] : vector<8x32xf32> to vector<8xf32>
      %113 = vector.shape_cast %112 : vector<8xf32> to vector<8x1xf32>
      %cst_70 = arith.constant 3.200000e+01 : f32
      %114 = vector.broadcast %cst_70 : f32 to vector<8x1xf32>
      %115 = arith.divf %113, %114 : vector<8x1xf32>
      %116 = vector.broadcast %108 : vector<8x1xf32> to vector<8x32xf32>
      %117 = arith.subf %102, %116 : vector<8x32xf32>
      %cst_71 = arith.constant 9.99999974E-6 : f32
      %118 = vector.broadcast %cst_71 : f32 to vector<8x1xf32>
      %119 = arith.addf %115, %118 : vector<8x1xf32>
      %120 = math.rsqrt %119 : vector<8x1xf32>
      %121 = vector.broadcast %120 : vector<8x1xf32> to vector<8x32xf32>
      %122 = arith.mulf %117, %121 : vector<8x32xf32>
      %123 = vector.broadcast %103 : vector<1x32xf32> to vector<8x32xf32>
      %124 = arith.mulf %122, %123 : vector<8x32xf32>
      %125 = vector.broadcast %104 : vector<1x32xf32> to vector<8x32xf32>
      %126 = arith.addf %124, %125 : vector<8x32xf32>
      %c0_72 = arith.constant 0 : index
      %c0_73 = arith.constant 0 : index
      %c0_74 = arith.constant 0 : index
      %127 = vector.load %arg17[%c0_72, %c0_73, %c0_74] : memref<4x32x8xf32, #tpu.memory_space<vmem>>, vector<4x32x8xf32>
      %c0_75 = arith.constant 0 : index
      %c0_76 = arith.constant 0 : index
      %c0_77 = arith.constant 0 : index
      %128 = vector.load %arg18[%c0_75, %c0_76, %c0_77] : memref<4x1x8xf32, #tpu.memory_space<vmem>>, vector<4x1x8xf32>
      %129 = vector.shape_cast %126 : vector<8x32xf32> to vector<1x8x32xf32>
      %130 = vector.shape_cast %129 : vector<1x8x32xf32> to vector<1x8x32xf32>
      %131 = vector.broadcast %130 : vector<1x8x32xf32> to vector<4x8x32xf32>
      "tpu.trace_start"() <{level = 10 : i32, message = "hsd,hdf->hsf"}> : () -> ()
      %cst_78 = arith.constant dense<0.000000e+00> : vector<4x8x8xf32>
      %132 = tpu.matmul %131, %127, %cst_78 {dimension_numbers = #tpu.dot_dimension_numbers<[2], [1], [1], [2], [0, 0, 0, 1, 1, 2], [0], [0]>} : vector<4x8x32xf32>, vector<4x32x8xf32>, vector<4x8x8xf32> -> vector<4x8x8xf32>
      "tpu.trace_stop"() : () -> ()
      %133 = vector.broadcast %128 : vector<4x1x8xf32> to vector<4x8x8xf32>
      %134 = arith.addf %132, %133 : vector<4x8x8xf32>
      %c0_79 = arith.constant 0 : index
      %c0_80 = arith.constant 0 : index
      %c0_81 = arith.constant 0 : index
      %135 = vector.load %arg19[%c0_79, %c0_80, %c0_81] : memref<4x8x32xf32, #tpu.memory_space<vmem>>, vector<4x8x32xf32>
      %c0_82 = arith.constant 0 : index
      %c0_83 = arith.constant 0 : index
      %136 = vector.load %arg20[%c0_82, %c0_83] : memref<1x32xf32, #tpu.memory_space<vmem>>, vector<1x32xf32>
      "tpu.trace_start"() <{level = 10 : i32, message = "hqf,hkf->hqk"}> : () -> ()
      %cst_84 = arith.constant dense<0.000000e+00> : vector<4x8x8xf32>
      %137 = tpu.matmul %134, %0, %cst_84 {dimension_numbers = #tpu.dot_dimension_numbers<[2], [2], [1], [1], [0, 0, 0, 1, 1, 1], [0], [0]>} : vector<4x8x8xf32>, vector<4x8x8xf32>, vector<4x8x8xf32> -> vector<4x8x8xf32>
      "tpu.trace_stop"() : () -> ()
      %cst_85 = arith.constant 0.353553385 : f32
      %138 = vector.broadcast %cst_85 : f32 to vector<4x8x8xf32>
      %139 = arith.mulf %137, %138 : vector<4x8x8xf32>
      %140 = arith.addf %139, %19 : vector<4x8x8xf32>
      %cst_86 = arith.constant dense<0xFF800000> : vector<4x8xf32>
      %141 = vector.multi_reduction <maximumf>, %140, %cst_86 [2] : vector<4x8x8xf32> to vector<4x8xf32>
      %142 = vector.shape_cast %141 : vector<4x8xf32> to vector<4x8x1xf32>
      %143 = vector.broadcast %142 : vector<4x8x1xf32> to vector<4x8x8xf32>
      %144 = arith.subf %140, %143 : vector<4x8x8xf32>
      %145 = math.exp %144 : vector<4x8x8xf32>
      %cst_87 = arith.constant dense<0.000000e+00> : vector<4x8xf32>
      %146 = vector.multi_reduction <add>, %145, %cst_87 [2] : vector<4x8x8xf32> to vector<4x8xf32>
      %147 = vector.shape_cast %146 : vector<4x8xf32> to vector<4x8x1xf32>
      %148 = tpu.reciprocal %147 {approx = true} : vector<4x8x1xf32> -> vector<4x8x1xf32>
      %149 = vector.broadcast %148 : vector<4x8x1xf32> to vector<4x8x8xf32>
      %150 = arith.mulf %145, %149 : vector<4x8x8xf32>
      "tpu.trace_start"() <{level = 10 : i32, message = "hqk,hkf->hqf"}> : () -> ()
      %cst_88 = arith.constant dense<0.000000e+00> : vector<4x8x8xf32>
      %151 = tpu.matmul %150, %1, %cst_88 {dimension_numbers = #tpu.dot_dimension_numbers<[2], [1], [1], [2], [0, 0, 0, 1, 1, 2], [0], [0]>} : vector<4x8x8xf32>, vector<4x8x8xf32>, vector<4x8x8xf32> -> vector<4x8x8xf32>
      "tpu.trace_stop"() : () -> ()
      "tpu.trace_start"() <{level = 10 : i32, message = "hqf,hfd->hqd"}> : () -> ()
      %cst_89 = arith.constant dense<0.000000e+00> : vector<4x8x32xf32>
      %152 = tpu.matmul %151, %135, %cst_89 {dimension_numbers = #tpu.dot_dimension_numbers<[2], [1], [1], [2], [0, 0, 0, 1, 1, 2], [0], [0]>} : vector<4x8x8xf32>, vector<4x8x32xf32>, vector<4x8x32xf32> -> vector<4x8x32xf32>
      "tpu.trace_stop"() : () -> ()
      %cst_90 = arith.constant dense<0.000000e+00> : vector<8x32xf32>
      %153 = vector.multi_reduction <add>, %152, %cst_90 [0] : vector<4x8x32xf32> to vector<8x32xf32>
      %154 = vector.broadcast %136 : vector<1x32xf32> to vector<8x32xf32>
      %155 = arith.addf %153, %154 : vector<8x32xf32>
      %156 = arith.addf %102, %155 : vector<8x32xf32>
      %c0_91 = arith.constant 0 : index
      %c0_92 = arith.constant 0 : index
      %157 = vector.load %arg21[%c0_91, %c0_92] : memref<1x32xf32, #tpu.memory_space<vmem>>, vector<1x32xf32>
      %c0_93 = arith.constant 0 : index
      %c0_94 = arith.constant 0 : index
      %158 = vector.load %arg22[%c0_93, %c0_94] : memref<1x32xf32, #tpu.memory_space<vmem>>, vector<1x32xf32>
      %c0_95 = arith.constant 0 : index
      %c0_96 = arith.constant 0 : index
      %159 = vector.load %arg23[%c0_95, %c0_96] : memref<32x64xf32, #tpu.memory_space<vmem>>, vector<32x64xf32>
      %c0_97 = arith.constant 0 : index
      %c0_98 = arith.constant 0 : index
      %160 = vector.load %arg24[%c0_97, %c0_98] : memref<1x64xf32, #tpu.memory_space<vmem>>, vector<1x64xf32>
      %c0_99 = arith.constant 0 : index
      %c0_100 = arith.constant 0 : index
      %161 = vector.load %arg25[%c0_99, %c0_100] : memref<64x32xf32, #tpu.memory_space<vmem>>, vector<64x32xf32>
      %c0_101 = arith.constant 0 : index
      %c0_102 = arith.constant 0 : index
      %162 = vector.load %arg26[%c0_101, %c0_102] : memref<1x32xf32, #tpu.memory_space<vmem>>, vector<1x32xf32>
      %cst_103 = arith.constant dense<0.000000e+00> : vector<8xf32>
      %163 = vector.multi_reduction <add>, %156, %cst_103 [1] : vector<8x32xf32> to vector<8xf32>
      %164 = vector.shape_cast %163 : vector<8xf32> to vector<8x1xf32>
      %cst_104 = arith.constant 3.200000e+01 : f32
      %165 = vector.broadcast %cst_104 : f32 to vector<8x1xf32>
      %166 = arith.divf %164, %165 : vector<8x1xf32>
      %167 = vector.broadcast %166 : vector<8x1xf32> to vector<8x32xf32>
      %168 = arith.subf %156, %167 : vector<8x32xf32>
      %169 = arith.mulf %168, %168 : vector<8x32xf32>
      %cst_105 = arith.constant dense<0.000000e+00> : vector<8xf32>
      %170 = vector.multi_reduction <add>, %169, %cst_105 [1] : vector<8x32xf32> to vector<8xf32>
      %171 = vector.shape_cast %170 : vector<8xf32> to vector<8x1xf32>
      %cst_106 = arith.constant 3.200000e+01 : f32
      %172 = vector.broadcast %cst_106 : f32 to vector<8x1xf32>
      %173 = arith.divf %171, %172 : vector<8x1xf32>
      %174 = vector.broadcast %166 : vector<8x1xf32> to vector<8x32xf32>
      %175 = arith.subf %156, %174 : vector<8x32xf32>
      %cst_107 = arith.constant 9.99999974E-6 : f32
      %176 = vector.broadcast %cst_107 : f32 to vector<8x1xf32>
      %177 = arith.addf %173, %176 : vector<8x1xf32>
      %178 = math.rsqrt %177 : vector<8x1xf32>
      %179 = vector.broadcast %178 : vector<8x1xf32> to vector<8x32xf32>
      %180 = arith.mulf %175, %179 : vector<8x32xf32>
      %181 = vector.broadcast %157 : vector<1x32xf32> to vector<8x32xf32>
      %182 = arith.mulf %180, %181 : vector<8x32xf32>
      %183 = vector.broadcast %158 : vector<1x32xf32> to vector<8x32xf32>
      %184 = arith.addf %182, %183 : vector<8x32xf32>
      %cst_108 = arith.constant dense<0.000000e+00> : vector<8x64xf32>
      %185 = tpu.matmul %184, %159, %cst_108 {dimension_numbers = #tpu.dot_dimension_numbers<[1], [0], [0], [1], [0, 0, 1, 1], [], []>} : vector<8x32xf32>, vector<32x64xf32>, vector<8x64xf32> -> vector<8x64xf32>
      %186 = vector.broadcast %160 : vector<1x64xf32> to vector<8x64xf32>
      %187 = arith.addf %185, %186 : vector<8x64xf32>
      %188 = arith.mulf %187, %187 : vector<8x64xf32>
      %189 = arith.mulf %187, %188 : vector<8x64xf32>
      %cst_109 = arith.constant 4.471500e-02 : f32
      %190 = vector.broadcast %cst_109 : f32 to vector<8x64xf32>
      %191 = arith.mulf %190, %189 : vector<8x64xf32>
      %192 = arith.addf %187, %191 : vector<8x64xf32>
      %cst_110 = arith.constant 0.797884583 : f32
      %193 = vector.broadcast %cst_110 : f32 to vector<8x64xf32>
      %194 = arith.mulf %193, %192 : vector<8x64xf32>
      %195 = math.tanh %194 : vector<8x64xf32>
      %cst_111 = arith.constant 1.000000e+00 : f32
      %196 = vector.broadcast %cst_111 : f32 to vector<8x64xf32>
      %197 = arith.addf %196, %195 : vector<8x64xf32>
      %cst_112 = arith.constant 5.000000e-01 : f32
      %198 = vector.broadcast %cst_112 : f32 to vector<8x64xf32>
      %199 = arith.mulf %198, %197 : vector<8x64xf32>
      %200 = arith.mulf %187, %199 : vector<8x64xf32>
      %cst_113 = arith.constant dense<0.000000e+00> : vector<8x32xf32>
      %201 = tpu.matmul %200, %161, %cst_113 {dimension_numbers = #tpu.dot_dimension_numbers<[1], [0], [0], [1], [0, 0, 1, 1], [], []>} : vector<8x64xf32>, vector<64x32xf32>, vector<8x32xf32> -> vector<8x32xf32>
      %202 = vector.broadcast %162 : vector<1x32xf32> to vector<8x32xf32>
      %203 = arith.addf %201, %202 : vector<8x32xf32>
      %204 = arith.addf %156, %203 : vector<8x32xf32>
      %c1_i32_114 = arith.constant 1 : i32
      %205 = arith.subi %arg30, %c1_i32_114 : i32
      %206 = vector.broadcast %205 : i32 to vector<8x1xi32>
      %207 = arith.cmpi eq, %22, %206 : vector<8x1xi32>
      %208 = arith.extui %207 : vector<8x1xi1> to vector<8x1xi32>
      %209 = arith.sitofp %208 : vector<8x1xi32> to vector<8x1xf32>
      %210 = vector.broadcast %209 : vector<8x1xf32> to vector<8x32xf32>
      %211 = arith.mulf %204, %210 : vector<8x32xf32>
      %cst_115 = arith.constant dense<0.000000e+00> : vector<32xf32>
      %212 = vector.multi_reduction <add>, %211, %cst_115 [0] : vector<8x32xf32> to vector<32xf32>
      %213 = vector.shape_cast %212 : vector<32xf32> to vector<1x32xf32>
      %c0_116 = arith.constant 0 : index
      %c0_117 = arith.constant 0 : index
      %214 = vector.load %arg27[%c0_116, %c0_117] : memref<1x32xf32, #tpu.memory_space<vmem>>, vector<1x32xf32>
      %c0_118 = arith.constant 0 : index
      %c0_119 = arith.constant 0 : index
      %215 = vector.load %arg28[%c0_118, %c0_119] : memref<1x32xf32, #tpu.memory_space<vmem>>, vector<1x32xf32>
      %cst_120 = arith.constant dense<0.000000e+00> : vector<1xf32>
      %216 = vector.multi_reduction <add>, %213, %cst_120 [1] : vector<1x32xf32> to vector<1xf32>
      %217 = vector.shape_cast %216 : vector<1xf32> to vector<1x1xf32>
      %cst_121 = arith.constant 3.200000e+01 : f32
      %218 = vector.broadcast %cst_121 : f32 to vector<1x1xf32>
      %219 = arith.divf %217, %218 : vector<1x1xf32>
      %220 = vector.broadcast %219 : vector<1x1xf32> to vector<1x32xf32>
      %221 = arith.subf %213, %220 : vector<1x32xf32>
      %222 = arith.mulf %221, %221 : vector<1x32xf32>
      %cst_122 = arith.constant dense<0.000000e+00> : vector<1xf32>
      %223 = vector.multi_reduction <add>, %222, %cst_122 [1] : vector<1x32xf32> to vector<1xf32>
      %224 = vector.shape_cast %223 : vector<1xf32> to vector<1x1xf32>
      %cst_123 = arith.constant 3.200000e+01 : f32
      %225 = vector.broadcast %cst_123 : f32 to vector<1x1xf32>
      %226 = arith.divf %224, %225 : vector<1x1xf32>
      %227 = vector.broadcast %219 : vector<1x1xf32> to vector<1x32xf32>
      %228 = arith.subf %213, %227 : vector<1x32xf32>
      %cst_124 = arith.constant 9.99999974E-6 : f32
      %229 = vector.broadcast %cst_124 : f32 to vector<1x1xf32>
      %230 = arith.addf %226, %229 : vector<1x1xf32>
      %231 = math.rsqrt %230 : vector<1x1xf32>
      %232 = vector.broadcast %231 : vector<1x1xf32> to vector<1x32xf32>
      %233 = arith.mulf %228, %232 : vector<1x32xf32>
      %234 = arith.mulf %233, %214 : vector<1x32xf32>
      %235 = arith.addf %234, %215 : vector<1x32xf32>
      %cst_125 = arith.constant dense<0.000000e+00> : vector<1x64xf32>
      %236 = tpu.matmul %235, %23, %cst_125 {dimension_numbers = #tpu.dot_dimension_numbers<[1], [1], [0], [0], [0, 0, 1, 0], [], []>} : vector<1x32xf32>, vector<64x32xf32>, vector<1x64xf32> -> vector<1x64xf32>
      %cst_126 = arith.constant dense<0xFF800000> : vector<1xf32>
      %237 = vector.multi_reduction <maximumf>, %236, %cst_126 [1] : vector<1x64xf32> to vector<1xf32>
      %238 = vector.shape_cast %237 : vector<1xf32> to vector<1x1xf32>
      %239 = vector.broadcast %238 : vector<1x1xf32> to vector<1x64xf32>
      %240 = arith.cmpf oge, %236, %239 : vector<1x64xf32>
      %c64_i32 = arith.constant 64 : i32
      %241 = vector.broadcast %c64_i32 : i32 to vector<1x64xi32>
      %242 = arith.select %240, %20, %241 : vector<1x64xi1>, vector<1x64xi32>
      %cst_127 = arith.constant dense<2147483647> : vector<1xi32>
      %243 = vector.multi_reduction <minsi>, %242, %cst_127 [1] : vector<1x64xi32> to vector<1xi32>
      %244 = vector.shape_cast %243 : vector<1xi32> to vector<1x1xi32>
      %245 = vector.broadcast %arg30 : i32 to vector<1x8xi32>
      %246 = arith.cmpi eq, %21, %245 : vector<1x8xi32>
      %247 = vector.shape_cast %244 : vector<1x1xi32> to vector<1x1xi32>
      %248 = vector.broadcast %247 : vector<1x1xi32> to vector<1x8xi32>
      %249 = arith.select %246, %248, %arg32 : vector<1x8xi1>, vector<1x8xi32>
      %250 = vector.broadcast %244 : vector<1x1xi32> to vector<1x64xi32>
      %251 = arith.cmpi eq, %20, %250 : vector<1x64xi32>
      %252 = arith.extui %251 : vector<1x64xi1> to vector<1x64xi32>
      %253 = arith.sitofp %252 : vector<1x64xi32> to vector<1x64xf32>
      %cst_128 = arith.constant dense<0.000000e+00> : vector<1x32xf32>
      %254 = tpu.matmul %253, %23, %cst_128 {dimension_numbers = #tpu.dot_dimension_numbers<[1], [0], [0], [1], [0, 0, 1, 1], [], []>} : vector<1x64xf32>, vector<64x32xf32>, vector<1x32xf32> -> vector<1x32xf32>
      %255 = vector.broadcast %arg30 : i32 to vector<8x1xi32>
      %256 = arith.cmpi eq, %22, %255 : vector<8x1xi32>
      %257 = vector.broadcast %254 : vector<1x32xf32> to vector<8x32xf32>
      %258 = arith.addf %arg31, %257 : vector<8x32xf32>
      %259 = vector.shape_cast %256 : vector<8x1xi1> to vector<8x1xi1>
      %260 = vector.broadcast %259 : vector<8x1xi1> to vector<8x32xi1>
      %261 = arith.select %260, %258, %arg31 : vector<8x32xi1>, vector<8x32xf32>
      scf.yield %261, %249 : vector<8x32xf32>, vector<1x8xi32>
    }
    %c7_i32_18 = arith.constant 7 : i32
    %c0_19 = arith.constant 0 : index
    %c0_20 = arith.constant 0 : index
    %32 = vector.load %arg29[%c0_19, %c0_20] : memref<1x8xi32, #tpu.memory_space<vmem>>, vector<1x8xi32>
    tpu.vector_store %arg29[%c0_19, %c0_20], %31#1 {strides = array<i32>} : memref<1x8xi32, #tpu.memory_space<vmem>>, vector<1x8xi32>,
    return
  }
}

module attributes {stable_mosaic.version = 11 : i64} {
  func.func @_encoder_kernel(%arg0: memref<8x32xf32, #tpu.memory_space<vmem>>, %arg1: memref<1x8xf32, #tpu.memory_space<vmem>>, %arg2: memref<1x32xf32, #tpu.memory_space<vmem>>, %arg3: memref<1x32xf32, #tpu.memory_space<vmem>>, %arg4: memref<4x32x8xf32, #tpu.memory_space<vmem>>, %arg5: memref<4x32x8xf32, #tpu.memory_space<vmem>>, %arg6: memref<4x32x8xf32, #tpu.memory_space<vmem>>, %arg7: memref<4x1x8xf32, #tpu.memory_space<vmem>>, %arg8: memref<4x1x8xf32, #tpu.memory_space<vmem>>, %arg9: memref<4x1x8xf32, #tpu.memory_space<vmem>>, %arg10: memref<4x8x32xf32, #tpu.memory_space<vmem>>, %arg11: memref<1x32xf32, #tpu.memory_space<vmem>>, %arg12: memref<1x32xf32, #tpu.memory_space<vmem>>, %arg13: memref<1x32xf32, #tpu.memory_space<vmem>>, %arg14: memref<32x64xf32, #tpu.memory_space<vmem>>, %arg15: memref<1x64xf32, #tpu.memory_space<vmem>>, %arg16: memref<64x32xf32, #tpu.memory_space<vmem>>, %arg17: memref<1x32xf32, #tpu.memory_space<vmem>>, %arg18: memref<1x32xf32, #tpu.memory_space<vmem>>, %arg19: memref<1x32xf32, #tpu.memory_space<vmem>>, %arg20: memref<4x32x8xf32, #tpu.memory_space<vmem>>, %arg21: memref<4x1x8xf32, #tpu.memory_space<vmem>>, %arg22: memref<4x32x8xf32, #tpu.memory_space<vmem>>, %arg23: memref<4x1x8xf32, #tpu.memory_space<vmem>>, %arg24: memref<4x8x8xf32, #tpu.memory_space<vmem>>, %arg25: memref<4x8x8xf32, #tpu.memory_space<vmem>>) attributes {dimension_semantics = [], scalar_prefetch = 0 : i64, scratch_operands = 0 : i64, tpu.core_type = #tpu.core_type<tc>} {
    %c0 = arith.constant 0 : index
    %c0_0 = arith.constant 0 : index
    %0 = vector.load %arg0[%c0, %c0_0] : memref<8x32xf32, #tpu.memory_space<vmem>>, vector<8x32xf32>
    %c0_1 = arith.constant 0 : index
    %c0_2 = arith.constant 0 : index
    %1 = vector.load %arg1[%c0_1, %c0_2] : memref<1x8xf32, #tpu.memory_space<vmem>>, vector<1x8xf32>
    %cst = arith.constant 0.000000e+00 : f32
    %2 = vector.broadcast %cst : f32 to vector<1x8xf32>
    %3 = arith.cmpf ogt, %1, %2 : vector<1x8xf32>
    %cst_3 = arith.constant 0.000000e+00 : f32
    %cst_4 = arith.constant -1.000000e+30 : f32
    %4 = vector.broadcast %cst_3 : f32 to vector<1x8xf32>
    %5 = vector.broadcast %cst_4 : f32 to vector<1x8xf32>
    %6 = arith.select %3, %4, %5 : vector<1x8xi1>, vector<1x8xf32>
    %7 = vector.shape_cast %6 : vector<1x8xf32> to vector<1x1x8xf32>
    %8 = vector.shape_cast %7 : vector<1x1x8xf32> to vector<1x1x8xf32>
    %9 = vector.broadcast %8 : vector<1x1x8xf32> to vector<4x8x8xf32>
    %c0_5 = arith.constant 0 : index
    %c0_6 = arith.constant 0 : index
    %10 = vector.load %arg2[%c0_5, %c0_6] : memref<1x32xf32, #tpu.memory_space<vmem>>, vector<1x32xf32>
    %c0_7 = arith.constant 0 : index
    %c0_8 = arith.constant 0 : index
    %11 = vector.load %arg3[%c0_7, %c0_8] : memref<1x32xf32, #tpu.memory_space<vmem>>, vector<1x32xf32>
    %cst_9 = arith.constant dense<0.000000e+00> : vector<8xf32>
    %12 = vector.multi_reduction <add>, %0, %cst_9 [1] : vector<8x32xf32> to vector<8xf32>
    %13 = vector.shape_cast %12 : vector<8xf32> to vector<8x1xf32>
    %cst_10 = arith.constant 3.200000e+01 : f32
    %14 = vector.broadcast %cst_10 : f32 to vector<8x1xf32>
    %15 = arith.divf %13, %14 : vector<8x1xf32>
    %16 = vector.broadcast %15 : vector<8x1xf32> to vector<8x32xf32>
    %17 = arith.subf %0, %16 : vector<8x32xf32>
    %18 = arith.mulf %17, %17 : vector<8x32xf32>
    %cst_11 = arith.constant dense<0.000000e+00> : vector<8xf32>
    %19 = vector.multi_reduction <add>, %18, %cst_11 [1] : vector<8x32xf32> to vector<8xf32>
    %20 = vector.shape_cast %19 : vector<8xf32> to vector<8x1xf32>
    %cst_12 = arith.constant 3.200000e+01 : f32
    %21 = vector.broadcast %cst_12 : f32 to vector<8x1xf32>
    %22 = arith.divf %20, %21 : vector<8x1xf32>
    %23 = vector.broadcast %15 : vector<8x1xf32> to vector<8x32xf32>
    %24 = arith.subf %0, %23 : vector<8x32xf32>
    %cst_13 = arith.constant 9.99999974E-6 : f32
    %25 = vector.broadcast %cst_13 : f32 to vector<8x1xf32>
    %26 = arith.addf %22, %25 : vector<8x1xf32>
    %27 = math.rsqrt %26 : vector<8x1xf32>
    %28 = vector.broadcast %27 : vector<8x1xf32> to vector<8x32xf32>
    %29 = arith.mulf %24, %28 : vector<8x32xf32>
    %30 = vector.broadcast %10 : vector<1x32xf32> to vector<8x32xf32>
    %31 = arith.mulf %29, %30 : vector<8x32xf32>
    %32 = vector.broadcast %11 : vector<1x32xf32> to vector<8x32xf32>
    %33 = arith.addf %31, %32 : vector<8x32xf32>
    %c0_14 = arith.constant 0 : index
    %c0_15 = arith.constant 0 : index
    %c0_16 = arith.constant 0 : index
    %34 = vector.load %arg4[%c0_14, %c0_15, %c0_16] : memref<4x32x8xf32, #tpu.memory_space<vmem>>, vector<4x32x8xf32>
    %c0_17 = arith.constant 0 : index
    %c0_18 = arith.constant 0 : index
    %c0_19 = arith.constant 0 : index
    %35 = vector.load %arg7[%c0_17, %c0_18, %c0_19] : memref<4x1x8xf32, #tpu.memory_space<vmem>>, vector<4x1x8xf32>
    %36 = vector.shape_cast %33 : vector<8x32xf32> to vector<1x8x32xf32>
    %37 = vector.shape_cast %36 : vector<1x8x32xf32> to vector<1x8x32xf32>
    %38 = vector.broadcast %37 : vector<1x8x32xf32> to vector<4x8x32xf32>
    "tpu.trace_start"() <{level = 10 : i32, message = "hsd,hdf->hsf"}> : () -> ()
    %cst_20 = arith.constant dense<0.000000e+00> : vector<4x8x8xf32>
    %39 = tpu.matmul %38, %34, %cst_20 {dimension_numbers = #tpu.dot_dimension_numbers<[2], [1], [1], [2], [0, 0, 0, 1, 1, 2], [0], [0]>} : vector<4x8x32xf32>, vector<4x32x8xf32>, vector<4x8x8xf32> -> vector<4x8x8xf32>
    "tpu.trace_stop"() : () -> ()
    %40 = vector.broadcast %35 : vector<4x1x8xf32> to vector<4x8x8xf32>
    %41 = arith.addf %39, %40 : vector<4x8x8xf32>
    %c0_21 = arith.constant 0 : index
    %c0_22 = arith.constant 0 : index
    %c0_23 = arith.constant 0 : index
    %42 = vector.load %arg5[%c0_21, %c0_22, %c0_23] : memref<4x32x8xf32, #tpu.memory_space<vmem>>, vector<4x32x8xf32>
    %c0_24 = arith.constant 0 : index
    %c0_25 = arith.constant 0 : index
    %c0_26 = arith.constant 0 : index
    %43 = vector.load %arg8[%c0_24, %c0_25, %c0_26] : memref<4x1x8xf32, #tpu.memory_space<vmem>>, vector<4x1x8xf32>
    %44 = vector.shape_cast %33 : vector<8x32xf32> to vector<1x8x32xf32>
    %45 = vector.shape_cast %44 : vector<1x8x32xf32> to vector<1x8x32xf32>
    %46 = vector.broadcast %45 : vector<1x8x32xf32> to vector<4x8x32xf32>
    "tpu.trace_start"() <{level = 10 : i32, message = "hsd,hdf->hsf"}> : () -> ()
    %cst_27 = arith.constant dense<0.000000e+00> : vector<4x8x8xf32>
    %47 = tpu.matmul %46, %42, %cst_27 {dimension_numbers = #tpu.dot_dimension_numbers<[2], [1], [1], [2], [0, 0, 0, 1, 1, 2], [0], [0]>} : vector<4x8x32xf32>, vector<4x32x8xf32>, vector<4x8x8xf32> -> vector<4x8x8xf32>
    "tpu.trace_stop"() : () -> ()
    %48 = vector.broadcast %43 : vector<4x1x8xf32> to vector<4x8x8xf32>
    %49 = arith.addf %47, %48 : vector<4x8x8xf32>
    %c0_28 = arith.constant 0 : index
    %c0_29 = arith.constant 0 : index
    %c0_30 = arith.constant 0 : index
    %50 = vector.load %arg6[%c0_28, %c0_29, %c0_30] : memref<4x32x8xf32, #tpu.memory_space<vmem>>, vector<4x32x8xf32>
    %c0_31 = arith.constant 0 : index
    %c0_32 = arith.constant 0 : index
    %c0_33 = arith.constant 0 : index
    %51 = vector.load %arg9[%c0_31, %c0_32, %c0_33] : memref<4x1x8xf32, #tpu.memory_space<vmem>>, vector<4x1x8xf32>
    %52 = vector.shape_cast %33 : vector<8x32xf32> to vector<1x8x32xf32>
    %53 = vector.shape_cast %52 : vector<1x8x32xf32> to vector<1x8x32xf32>
    %54 = vector.broadcast %53 : vector<1x8x32xf32> to vector<4x8x32xf32>
    "tpu.trace_start"() <{level = 10 : i32, message = "hsd,hdf->hsf"}> : () -> ()
    %cst_34 = arith.constant dense<0.000000e+00> : vector<4x8x8xf32>
    %55 = tpu.matmul %54, %50, %cst_34 {dimension_numbers = #tpu.dot_dimension_numbers<[2], [1], [1], [2], [0, 0, 0, 1, 1, 2], [0], [0]>} : vector<4x8x32xf32>, vector<4x32x8xf32>, vector<4x8x8xf32> -> vector<4x8x8xf32>
    "tpu.trace_stop"() : () -> ()
    %56 = vector.broadcast %51 : vector<4x1x8xf32> to vector<4x8x8xf32>
    %57 = arith.addf %55, %56 : vector<4x8x8xf32>
    %c0_35 = arith.constant 0 : index
    %c0_36 = arith.constant 0 : index
    %c0_37 = arith.constant 0 : index
    %58 = vector.load %arg10[%c0_35, %c0_36, %c0_37] : memref<4x8x32xf32, #tpu.memory_space<vmem>>, vector<4x8x32xf32>
    %c0_38 = arith.constant 0 : index
    %c0_39 = arith.constant 0 : index
    %59 = vector.load %arg11[%c0_38, %c0_39] : memref<1x32xf32, #tpu.memory_space<vmem>>, vector<1x32xf32>
    "tpu.trace_start"() <{level = 10 : i32, message = "hqf,hkf->hqk"}> : () -> ()
    %cst_40 = arith.constant dense<0.000000e+00> : vector<4x8x8xf32>
    %60 = tpu.matmul %41, %49, %cst_40 {dimension_numbers = #tpu.dot_dimension_numbers<[2], [2], [1], [1], [0, 0, 0, 1, 1, 1], [0], [0]>} : vector<4x8x8xf32>, vector<4x8x8xf32>, vector<4x8x8xf32> -> vector<4x8x8xf32>
    "tpu.trace_stop"() : () -> ()
    %cst_41 = arith.constant 0.353553385 : f32
    %61 = vector.broadcast %cst_41 : f32 to vector<4x8x8xf32>
    %62 = arith.mulf %60, %61 : vector<4x8x8xf32>
    %63 = arith.addf %62, %9 : vector<4x8x8xf32>
    %cst_42 = arith.constant dense<0xFF800000> : vector<4x8xf32>
    %64 = vector.multi_reduction <maximumf>, %63, %cst_42 [2] : vector<4x8x8xf32> to vector<4x8xf32>
    %65 = vector.shape_cast %64 : vector<4x8xf32> to vector<4x8x1xf32>
    %66 = vector.broadcast %65 : vector<4x8x1xf32> to vector<4x8x8xf32>
    %67 = arith.subf %63, %66 : vector<4x8x8xf32>
    %68 = math.exp %67 : vector<4x8x8xf32>
    %cst_43 = arith.constant dense<0.000000e+00> : vector<4x8xf32>
    %69 = vector.multi_reduction <add>, %68, %cst_43 [2] : vector<4x8x8xf32> to vector<4x8xf32>
    %70 = vector.shape_cast %69 : vector<4x8xf32> to vector<4x8x1xf32>
    %71 = tpu.reciprocal %70 {approx = true} : vector<4x8x1xf32> -> vector<4x8x1xf32>
    %72 = vector.broadcast %71 : vector<4x8x1xf32> to vector<4x8x8xf32>
    %73 = arith.mulf %68, %72 : vector<4x8x8xf32>
    "tpu.trace_start"() <{level = 10 : i32, message = "hqk,hkf->hqf"}> : () -> ()
    %cst_44 = arith.constant dense<0.000000e+00> : vector<4x8x8xf32>
    %74 = tpu.matmul %73, %57, %cst_44 {dimension_numbers = #tpu.dot_dimension_numbers<[2], [1], [1], [2], [0, 0, 0, 1, 1, 2], [0], [0]>} : vector<4x8x8xf32>, vector<4x8x8xf32>, vector<4x8x8xf32> -> vector<4x8x8xf32>
    "tpu.trace_stop"() : () -> ()
    "tpu.trace_start"() <{level = 10 : i32, message = "hqf,hfd->hqd"}> : () -> ()
    %cst_45 = arith.constant dense<0.000000e+00> : vector<4x8x32xf32>
    %75 = tpu.matmul %74, %58, %cst_45 {dimension_numbers = #tpu.dot_dimension_numbers<[2], [1], [1], [2], [0, 0, 0, 1, 1, 2], [0], [0]>} : vector<4x8x8xf32>, vector<4x8x32xf32>, vector<4x8x32xf32> -> vector<4x8x32xf32>
    "tpu.trace_stop"() : () -> ()
    %cst_46 = arith.constant dense<0.000000e+00> : vector<8x32xf32>
    %76 = vector.multi_reduction <add>, %75, %cst_46 [0] : vector<4x8x32xf32> to vector<8x32xf32>
    %77 = vector.broadcast %59 : vector<1x32xf32> to vector<8x32xf32>
    %78 = arith.addf %76, %77 : vector<8x32xf32>
    %79 = arith.addf %0, %78 : vector<8x32xf32>
    %c0_47 = arith.constant 0 : index
    %c0_48 = arith.constant 0 : index
    %80 = vector.load %arg12[%c0_47, %c0_48] : memref<1x32xf32, #tpu.memory_space<vmem>>, vector<1x32xf32>
    %c0_49 = arith.constant 0 : index
    %c0_50 = arith.constant 0 : index
    %81 = vector.load %arg13[%c0_49, %c0_50] : memref<1x32xf32, #tpu.memory_space<vmem>>, vector<1x32xf32>
    %c0_51 = arith.constant 0 : index
    %c0_52 = arith.constant 0 : index
    %82 = vector.load %arg14[%c0_51, %c0_52] : memref<32x64xf32, #tpu.memory_space<vmem>>, vector<32x64xf32>
    %c0_53 = arith.constant 0 : index
    %c0_54 = arith.constant 0 : index
    %83 = vector.load %arg15[%c0_53, %c0_54] : memref<1x64xf32, #tpu.memory_space<vmem>>, vector<1x64xf32>
    %c0_55 = arith.constant 0 : index
    %c0_56 = arith.constant 0 : index
    %84 = vector.load %arg16[%c0_55, %c0_56] : memref<64x32xf32, #tpu.memory_space<vmem>>, vector<64x32xf32>
    %c0_57 = arith.constant 0 : index
    %c0_58 = arith.constant 0 : index
    %85 = vector.load %arg17[%c0_57, %c0_58] : memref<1x32xf32, #tpu.memory_space<vmem>>, vector<1x32xf32>
    %cst_59 = arith.constant dense<0.000000e+00> : vector<8xf32>
    %86 = vector.multi_reduction <add>, %79, %cst_59 [1] : vector<8x32xf32> to vector<8xf32>
    %87 = vector.shape_cast %86 : vector<8xf32> to vector<8x1xf32>
    %cst_60 = arith.constant 3.200000e+01 : f32
    %88 = vector.broadcast %cst_60 : f32 to vector<8x1xf32>
    %89 = arith.divf %87, %88 : vector<8x1xf32>
    %90 = vector.broadcast %89 : vector<8x1xf32> to vector<8x32xf32>
    %91 = arith.subf %79, %90 : vector<8x32xf32>
    %92 = arith.mulf %91, %91 : vector<8x32xf32>
    %cst_61 = arith.constant dense<0.000000e+00> : vector<8xf32>
    %93 = vector.multi_reduction <add>, %92, %cst_61 [1] : vector<8x32xf32> to vector<8xf32>
    %94 = vector.shape_cast %93 : vector<8xf32> to vector<8x1xf32>
    %cst_62 = arith.constant 3.200000e+01 : f32
    %95 = vector.broadcast %cst_62 : f32 to vector<8x1xf32>
    %96 = arith.divf %94, %95 : vector<8x1xf32>
    %97 = vector.broadcast %89 : vector<8x1xf32> to vector<8x32xf32>
    %98 = arith.subf %79, %97 : vector<8x32xf32>
    %cst_63 = arith.constant 9.99999974E-6 : f32
    %99 = vector.broadcast %cst_63 : f32 to vector<8x1xf32>
    %100 = arith.addf %96, %99 : vector<8x1xf32>
    %101 = math.rsqrt %100 : vector<8x1xf32>
    %102 = vector.broadcast %101 : vector<8x1xf32> to vector<8x32xf32>
    %103 = arith.mulf %98, %102 : vector<8x32xf32>
    %104 = vector.broadcast %80 : vector<1x32xf32> to vector<8x32xf32>
    %105 = arith.mulf %103, %104 : vector<8x32xf32>
    %106 = vector.broadcast %81 : vector<1x32xf32> to vector<8x32xf32>
    %107 = arith.addf %105, %106 : vector<8x32xf32>
    %cst_64 = arith.constant dense<0.000000e+00> : vector<8x64xf32>
    %108 = tpu.matmul %107, %82, %cst_64 {dimension_numbers = #tpu.dot_dimension_numbers<[1], [0], [0], [1], [0, 0, 1, 1], [], []>} : vector<8x32xf32>, vector<32x64xf32>, vector<8x64xf32> -> vector<8x64xf32>
    %109 = vector.broadcast %83 : vector<1x64xf32> to vector<8x64xf32>
    %110 = arith.addf %108, %109 : vector<8x64xf32>
    %111 = arith.mulf %110, %110 : vector<8x64xf32>
    %112 = arith.mulf %110, %111 : vector<8x64xf32>
    %cst_65 = arith.constant 4.471500e-02 : f32
    %113 = vector.broadcast %cst_65 : f32 to vector<8x64xf32>
    %114 = arith.mulf %113, %112 : vector<8x64xf32>
    %115 = arith.addf %110, %114 : vector<8x64xf32>
    %cst_66 = arith.constant 0.797884583 : f32
    %116 = vector.broadcast %cst_66 : f32 to vector<8x64xf32>
    %117 = arith.mulf %116, %115 : vector<8x64xf32>
    %118 = math.tanh %117 : vector<8x64xf32>
    %cst_67 = arith.constant 1.000000e+00 : f32
    %119 = vector.broadcast %cst_67 : f32 to vector<8x64xf32>
    %120 = arith.addf %119, %118 : vector<8x64xf32>
    %cst_68 = arith.constant 5.000000e-01 : f32
    %121 = vector.broadcast %cst_68 : f32 to vector<8x64xf32>
    %122 = arith.mulf %121, %120 : vector<8x64xf32>
    %123 = arith.mulf %110, %122 : vector<8x64xf32>
    %cst_69 = arith.constant dense<0.000000e+00> : vector<8x32xf32>
    %124 = tpu.matmul %123, %84, %cst_69 {dimension_numbers = #tpu.dot_dimension_numbers<[1], [0], [0], [1], [0, 0, 1, 1], [], []>} : vector<8x64xf32>, vector<64x32xf32>, vector<8x32xf32> -> vector<8x32xf32>
    %125 = vector.broadcast %85 : vector<1x32xf32> to vector<8x32xf32>
    %126 = arith.addf %124, %125 : vector<8x32xf32>
    %127 = arith.addf %79, %126 : vector<8x32xf32>
    %c0_70 = arith.constant 0 : index
    %c0_71 = arith.constant 0 : index
    %128 = vector.load %arg18[%c0_70, %c0_71] : memref<1x32xf32, #tpu.memory_space<vmem>>, vector<1x32xf32>
    %c0_72 = arith.constant 0 : index
    %c0_73 = arith.constant 0 : index
    %129 = vector.load %arg19[%c0_72, %c0_73] : memref<1x32xf32, #tpu.memory_space<vmem>>, vector<1x32xf32>
    %cst_74 = arith.constant dense<0.000000e+00> : vector<8xf32>
    %130 = vector.multi_reduction <add>, %127, %cst_74 [1] : vector<8x32xf32> to vector<8xf32>
    %131 = vector.shape_cast %130 : vector<8xf32> to vector<8x1xf32>
    %cst_75 = arith.constant 3.200000e+01 : f32
    %132 = vector.broadcast %cst_75 : f32 to vector<8x1xf32>
    %133 = arith.divf %131, %132 : vector<8x1xf32>
    %134 = vector.broadcast %133 : vector<8x1xf32> to vector<8x32xf32>
    %135 = arith.subf %127, %134 : vector<8x32xf32>
    %136 = arith.mulf %135, %135 : vector<8x32xf32>
    %cst_76 = arith.constant dense<0.000000e+00> : vector<8xf32>
    %137 = vector.multi_reduction <add>, %136, %cst_76 [1] : vector<8x32xf32> to vector<8xf32>
    %138 = vector.shape_cast %137 : vector<8xf32> to vector<8x1xf32>
    %cst_77 = arith.constant 3.200000e+01 : f32
    %139 = vector.broadcast %cst_77 : f32 to vector<8x1xf32>
    %140 = arith.divf %138, %139 : vector<8x1xf32>
    %141 = vector.broadcast %133 : vector<8x1xf32> to vector<8x32xf32>
    %142 = arith.subf %127, %141 : vector<8x32xf32>
    %cst_78 = arith.constant 9.99999974E-6 : f32
    %143 = vector.broadcast %cst_78 : f32 to vector<8x1xf32>
    %144 = arith.addf %140, %143 : vector<8x1xf32>
    %145 = math.rsqrt %144 : vector<8x1xf32>
    %146 = vector.broadcast %145 : vector<8x1xf32> to vector<8x32xf32>
    %147 = arith.mulf %142, %146 : vector<8x32xf32>
    %148 = vector.broadcast %128 : vector<1x32xf32> to vector<8x32xf32>
    %149 = arith.mulf %147, %148 : vector<8x32xf32>
    %150 = vector.broadcast %129 : vector<1x32xf32> to vector<8x32xf32>
    %151 = arith.addf %149, %150 : vector<8x32xf32>
    %c0_79 = arith.constant 0 : index
    %c0_80 = arith.constant 0 : index
    %c0_81 = arith.constant 0 : index
    %152 = vector.load %arg20[%c0_79, %c0_80, %c0_81] : memref<4x32x8xf32, #tpu.memory_space<vmem>>, vector<4x32x8xf32>
    %c0_82 = arith.constant 0 : index
    %c0_83 = arith.constant 0 : index
    %c0_84 = arith.constant 0 : index
    %153 = vector.load %arg21[%c0_82, %c0_83, %c0_84] : memref<4x1x8xf32, #tpu.memory_space<vmem>>, vector<4x1x8xf32>
    %154 = vector.shape_cast %151 : vector<8x32xf32> to vector<1x8x32xf32>
    %155 = vector.shape_cast %154 : vector<1x8x32xf32> to vector<1x8x32xf32>
    %156 = vector.broadcast %155 : vector<1x8x32xf32> to vector<4x8x32xf32>
    "tpu.trace_start"() <{level = 10 : i32, message = "hsd,hdf->hsf"}> : () -> ()
    %cst_85 = arith.constant dense<0.000000e+00> : vector<4x8x8xf32>
    %157 = tpu.matmul %156, %152, %cst_85 {dimension_numbers = #tpu.dot_dimension_numbers<[2], [1], [1], [2], [0, 0, 0, 1, 1, 2], [0], [0]>} : vector<4x8x32xf32>, vector<4x32x8xf32>, vector<4x8x8xf32> -> vector<4x8x8xf32>
    "tpu.trace_stop"() : () -> ()
    %158 = vector.broadcast %153 : vector<4x1x8xf32> to vector<4x8x8xf32>
    %159 = arith.addf %157, %158 : vector<4x8x8xf32>
    %c0_86 = arith.constant 0 : index
    %c0_87 = arith.constant 0 : index
    %c0_88 = arith.constant 0 : index
    %160 = vector.load %arg24[%c0_86, %c0_87, %c0_88] : memref<4x8x8xf32, #tpu.memory_space<vmem>>, vector<4x8x8xf32>
    tpu.vector_store %arg24[%c0_86, %c0_87, %c0_88], %159 {strides = array<i32>} : memref<4x8x8xf32, #tpu.memory_space<vmem>>, vector<4x8x8xf32>,
    %c0_89 = arith.constant 0 : index
    %c0_90 = arith.constant 0 : index
    %c0_91 = arith.constant 0 : index
    %161 = vector.load %arg22[%c0_89, %c0_90, %c0_91] : memref<4x32x8xf32, #tpu.memory_space<vmem>>, vector<4x32x8xf32>
    %c0_92 = arith.constant 0 : index
    %c0_93 = arith.constant 0 : index
    %c0_94 = arith.constant 0 : index
    %162 = vector.load %arg23[%c0_92, %c0_93, %c0_94] : memref<4x1x8xf32, #tpu.memory_space<vmem>>, vector<4x1x8xf32>
    %163 = vector.shape_cast %151 : vector<8x32xf32> to vector<1x8x32xf32>
    %164 = vector.shape_cast %163 : vector<1x8x32xf32> to vector<1x8x32xf32>
    %165 = vector.broadcast %164 : vector<1x8x32xf32> to vector<4x8x32xf32>
    "tpu.trace_start"() <{level = 10 : i32, message = "hsd,hdf->hsf"}> : () -> ()
    %cst_95 = arith.constant dense<0.000000e+00> : vector<4x8x8xf32>
    %166 = tpu.matmul %165, %161, %cst_95 {dimension_numbers = #tpu.dot_dimension_numbers<[2], [1], [1], [2], [0, 0, 0, 1, 1, 2], [0], [0]>} : vector<4x8x32xf32>, vector<4x32x8xf32>, vector<4x8x8xf32> -> vector<4x8x8xf32>
    "tpu.trace_stop"() : () -> ()
    %167 = vector.broadcast %162 : vector<4x1x8xf32> to vector<4x8x8xf32>
    %168 = arith.addf %166, %167 : vector<4x8x8xf32>
    %c0_96 = arith.constant 0 : index
    %c0_97 = arith.constant 0 : index
    %c0_98 = arith.constant 0 : index
    %169 = vector.load %arg25[%c0_96, %c0_97, %c0_98] : memref<4x8x8xf32, #tpu.memory_space<vmem>>, vector<4x8x8xf32>
    tpu.vector_store %arg25[%c0_96, %c0_97, %c0_98], %168 {strides = array<i32>} : memref<4x8x8xf32, #tpu.memory_space<vmem>>, vector<4x8x8xf32>,
    return
  }
}

</mosaic_0001>

<bundles_post_ra>
// kernel: generate.2
= control target key start
LH: loop header
LB: loop body
LE: loop exit
PB: predicated region body
PF: predicated region fallthrough
CT: control target
= control target key end

     0   :  { %vm91_vm0 = vcmask 261120   ;;  %v3506_v7 = vmov 0.0   ;;  %vm3507_vm1 = vmmov 0   ;;  %vm1100_vm2 = vcmask 64512   ;;  %s4319_s0 = inlined_call_operand.vmem [shape: f32[8,32], index: 0, kind: input, shape index: {}]   ;;  %s4320_s4 = inlined_call_operand.vmem [shape: f32[4,32,8], index: 4, kind: input, shape index: {}]   ;;  %s4321_s2 = inlined_call_operand.vmem [shape: f32[1,32], index: 2, kind: input, shape index: {}]   ;;  %s4322_s3 = inlined_call_operand.vmem [shape: f32[1,32], index: 3, kind: input, shape index: {}]   ;;  %s4323_s5 = inlined_call_operand.vmem [shape: f32[4,32,8], index: 5, kind: input, shape index: {}]   ;;  %s4324_s6 = inlined_call_operand.vmem [shape: f32[4,32,8], index: 6, kind: input, shape index: {}]   ;;  %s4325_s8 = inlined_call_operand.vmem [shape: f32[4,1,8], index: 8, kind: input, shape index: {}]   ;;  %s4326_s7 = inlined_call_operand.vmem [shape: f32[4,1,8], index: 7, kind: input, shape index: {}]   ;;  %s4327_s9 = inlined_call_operand.vmem [shape: f32[4,1,8], index: 9, kind: input, shape index: {}]   ;;  %s4328_s1 = inlined_call_operand.vmem [shape: f32[1,8], index: 1, kind: input, shape index: {}]   ;;  %s4329_s10 = inlined_call_operand.vmem [shape: f32[4,8,32], index: 10, kind: input, shape index: {}]   ;;  %s4330_s11 = inlined_call_operand.vmem [shape: f32[1,32], index: 11, kind: input, shape index: {}]   ;;  %s4331_s14 = inlined_call_operand.vmem [shape: f32[32,64], index: 14, kind: input, shape index: {}]   ;;  %s4332_s12 = inlined_call_operand.vmem [shape: f32[1,32], index: 12, kind: input, shape index: {}]   ;;  %s4333_s13 = inlined_call_operand.vmem [shape: f32[1,32], index: 13, kind: input, shape index: {}]   ;;  %s4334_s16 = inlined_call_operand.vmem [shape: f32[64,32], index: 16, kind: input, shape index: {}]   ;;  %s4335_s15 = inlined_call_operand.vmem [shape: f32[1,64], index: 15, kind: input, shape index: {}]   ;;  %s4336_s17 = inlined_call_operand.vmem [shape: f32[1,32], index: 17, kind: input, shape index: {}]   ;;  %s4337_s20 = inlined_call_operand.vmem [shape: f32[4,32,8], index: 20, kind: input, shape index: {}]   ;;  %s4338_s18 = inlined_call_operand.vmem [shape: f32[1,32], index: 18, kind: input, shape index: {}]   ;;  %s4339_s19 = inlined_call_operand.vmem [shape: f32[1,32], index: 19, kind: input, shape index: {}]   ;;  %s4340_s22 = inlined_call_operand.vmem [shape: f32[4,32,8], index: 22, kind: input, shape index: {}]   ;;  %s4341_s21 = inlined_call_operand.vmem [shape: f32[4,1,8], index: 21, kind: input, shape index: {}]   ;;  %s4342_s24 = inlined_call_operand.vmem [shape: f32[4,8,8], index: 24, kind: output, shape index: {0}]   ;;  %s4343_s23 = inlined_call_operand.vmem [shape: f32[4,1,8], index: 23, kind: input, shape index: {}]   ;;  %s4344_s25 = inlined_call_operand.vmem [shape: f32[4,8,8], index: 25, kind: output, shape index: {1}]  }
   0x1   :  { %4351 = sst [smem:[#allocation2_spill]] %s4319_s0  ;;  %3169 = vmatprep.subr.mxu0 %v3506_v7  ;;  %3180 = vmatprep.subr.mxu1 %v3506_v7  ;;  %vm2193_vm4 = vcmask 523264  }
   0x2   :  { %4352 = sst [smem:[#allocation3_spill]] %s4320_s4  ;;  %3177 = vmatprep.mubr.msk.f32.mxu0 %vm3507_vm1, %v3506_v7  ;;  %3188 = vmatprep.mubr.msk.f32.mxu1 %vm3507_vm1, %v3506_v7 }
   0x3   :  { %4353 = sst [smem:[#allocation4_spill]] %s4321_s2 }
   0x4   :  { %4354 = sst [smem:[#allocation5_spill]] %s4322_s3 }
   0x5   :  { %4355 = sst [smem:[#allocation6_spill]] %s4323_s5 }
   0x6   :  { %4356 = sst [smem:[#allocation7_spill]] %s4324_s6 }
   0x7   :  { %4357 = sst [smem:[#allocation8_spill]] %s4325_s8 }
   0x8   :  { %4358 = sst [smem:[#allocation9_spill]] %s4326_s7 }
   0x9   :  { %4359 = sst [smem:[#allocation10_spill]] %s4327_s9 }
   0xa   :  { %4360 = sst [smem:[#allocation11_spill]] %s4328_s1 }
   0xb   :  { %s4361_s8 = sld [smem:[#allocation2_spill]] }
   0xc   :  { %s4362_s3 = sld [smem:[#allocation3_spill]] }
   0xd   :  { %s4363_s9 = sld [smem:[#allocation4_spill]] }
   0xe   :  { %s4364_s5 = sld [smem:[#allocation5_spill]] }
   0xf   :  { %s4365_s2 = sld [smem:[#allocation6_spill]] }
  0x10   :  { %s4366_s26 = sld [smem:[#allocation7_spill]] }
  0x11   :  { %v3642_v0 = vld [vmem:[%s4361_s8] sm:$0xff]  ;;  %s4367_s27 = sld [smem:[#allocation8_spill]] }
  0x12   :  { %v92_v1 = vsel %vm91_vm0, %v3642_v0, 0.0  ;;  %v123_v8 = vld [vmem:[%s4362_s3 + $0x18] sm:$0xff]  ;;  %v122_v10 = vld [vmem:[%s4362_s3 + $0x10] sm:$0xff]  ;;  %v121_v12 = vld [vmem:[%s4362_s3 + $0x8] sm:$0xff]  ;;  %s4368_s28 = sld [smem:[#allocation9_spill]] }
  0x13   :  { %93 = vadd.xlane.f32.xlu0 %v92_v1  ;;  %v127_v9 = vld [vmem:[%s4362_s3 + $0x38] sm:$0xff]  ;;  %3170 = vmatpush3.msra.mxu0 %v123_v8  ;;  %v126_v11 = vld [vmem:[%s4362_s3 + $0x30] sm:$0xff]  ;;  %v125_v13 = vld [vmem:[%s4362_s3 + $0x28] sm:$0xff] }
  0x14   :  { %3181 = vmatpush3.msra.mxu1 %v127_v9  ;;  %3171 = vmatprep.subr.mxu0 %v3506_v7  ;;  %v120_v14 = vld [vmem:[%s4362_s3] sm:$0xff]  ;;  %v131_v25 = vld [vmem:[%s4362_s3 + $0x58] sm:$0xff]  ;;  %v130_v27 = vld [vmem:[%s4362_s3 + $0x50] sm:$0xff] }
  0x15   :  { %3182 = vmatprep.subr.mxu1 %v3506_v7  ;;  %3172 = vmatpush3.msra.mxu0 %v122_v10  ;;  %v124_v15 = vld [vmem:[%s4362_s3 + $0x20] sm:$0xff]  ;;  %v135_v26 = vld [vmem:[%s4362_s3 + $0x78] sm:$0xff]  ;;  %v134_v28 = vld [vmem:[%s4362_s3 + $0x70] sm:$0xff] }
  0x16   :  { %3183 = vmatpush3.msra.mxu1 %v126_v11  ;;  %3173 = vmatprep.subr.mxu0 %v3506_v7  ;;  %v2964_v20 = vld [vmem:[%s4363_s9] ss:$0 sm:$0xff]  ;;  %v129_v29 = vld [vmem:[%s4362_s3 + $0x48] sm:$0xff]  ;;  %v450_v33 = vld [vmem:[%s4365_s2 + $0x18] sm:$0xff]  ;;  %s4370_s9 = sld [smem:[#allocation11_spill]] }
  0x17   :  { %3184 = vmatprep.subr.mxu1 %v3506_v7  ;;  %3174 = vmatpush3.msra.mxu0 %v121_v12  ;;  %v2965_v22 = vld [vmem:[%s4364_s5] ss:$0 sm:$0xff]  ;;  %v133_v30 = vld [vmem:[%s4362_s3 + $0x68] sm:$0xff]  ;;  %v454_v34 = vld [vmem:[%s4365_s2 + $0x38] sm:$0xff] }
  0x18   :  { %3185 = vmatpush3.msra.mxu1 %v125_v13  ;;  %3175 = vmatprep.subr.mxu0 %v3506_v7  ;;  %v128_v31 = vld [vmem:[%s4362_s3 + $0x40] sm:$0xff]  ;;  %v449_v35 = vld [vmem:[%s4365_s2 + $0x10] sm:$0xff]  ;;  %v448_v37 = vld [vmem:[%s4365_s2 + $0x8] sm:$0xff] }
  0x19   :  { %3186 = vmatprep.subr.mxu1 %v3506_v7  ;;  %3176 = vmatpush3.msra.mxu0 %v120_v14  ;;  %v132_v32 = vld [vmem:[%s4362_s3 + $0x60] sm:$0xff]  ;;  %v453_v36 = vld [vmem:[%s4365_s2 + $0x30] sm:$0xff]  ;;  %v452_v38 = vld [vmem:[%s4365_s2 + $0x28] sm:$0xff] }
  0x1a   :  { %3187 = vmatpush3.msra.mxu1 %v124_v15  ;;  %3191 = vmatprep.subr.mxu0 %v3506_v7  ;;  %v447_v39 = vld [vmem:[%s4365_s2] sm:$0xff]  ;;  %v458_v41 = vld [vmem:[%s4365_s2 + $0x58] sm:$0xff]  ;;  %v457_v43 = vld [vmem:[%s4365_s2 + $0x50] sm:$0xff] }
  0x1b   :  { %3202 = vmatprep.subr.mxu1 %v3506_v7  ;;  %v451_v40 = vld [vmem:[%s4365_s2 + $0x20] sm:$0xff]  ;;  %v462_v42 = vld [vmem:[%s4365_s2 + $0x78] sm:$0xff]  ;;  %v461_v44 = vld [vmem:[%s4365_s2 + $0x70] sm:$0xff] }
  0x1c   :  { %v456_v45 = vld [vmem:[%s4365_s2 + $0x48] sm:$0xff]  ;;  %v455_v47 = vld [vmem:[%s4365_s2 + $0x40] sm:$0xff]  ;;  %v774_v49 = vld [vmem:[%s4366_s26 + $0x18] sm:$0xff] }
  0x1d   :  { %v460_v46 = vld [vmem:[%s4365_s2 + $0x68] sm:$0xff]  ;;  %v459_v48 = vld [vmem:[%s4365_s2 + $0x60] sm:$0xff]  ;;  %v778_v50 = vld [vmem:[%s4366_s26 + $0x38] sm:$0xff] }
  0x1e   :  { %v773_v51 = vld [vmem:[%s4366_s26 + $0x10] sm:$0xff]  ;;  %v772_v53 = vld [vmem:[%s4366_s26 + $0x8] sm:$0xff]  ;;  %v771_v55 = vld [vmem:[%s4366_s26] sm:$0xff] }
  0x1f   :  { %v777_v52 = vld [vmem:[%s4366_s26 + $0x30] sm:$0xff]  ;;  %v776_v54 = vld [vmem:[%s4366_s26 + $0x28] sm:$0xff]  ;;  %v775_v56 = vld [vmem:[%s4366_s26 + $0x20] sm:$0xff] }
  0x20   :  { %v782_v57 = vld [vmem:[%s4366_s26 + $0x58] sm:$0xff]  ;;  %v781_v59 = vld [vmem:[%s4366_s26 + $0x50] sm:$0xff]  ;;  %v780_v61 = vld [vmem:[%s4366_s26 + $0x48] sm:$0xff] }
  0x21   :  { %v786_v58 = vld [vmem:[%s4366_s26 + $0x78] sm:$0xff]  ;;  %v785_v60 = vld [vmem:[%s4366_s26 + $0x70] sm:$0xff]  ;;  %v784_v62 = vld [vmem:[%s4366_s26 + $0x68] sm:$0xff] }
  0x22   :  { %v779_v63 = vld [vmem:[%s4366_s26 + $0x40] sm:$0xff] }
  0x23   :  { %v783_v1 = vld [vmem:[%s4366_s26 + $0x60] sm:$0xff] }
  0x24   :  { %v2974_v11 = vld [vmem:[%s4367_s27] ss:$0 sm:$0xff] }
  0x25   :  { %v2966_v14 = vld [vmem:[%s4368_s28] ss:$0 sm:$0xff] }
  0x9c   :  { %v94_v2 = vpop.xlane.xlu0 %93 }
  0x9d   :  { %v96_v3 = vmul.f32 0.03125, %v94_v2 }
  0x9f   :  { %v97_v4 = vsub.f32 %v3642_v0, %v96_v3 }
  0xa1   :  { %v98_v5 = vmul.f32 %v97_v4, %v97_v4 }
  0xa3   :  { %v99_v6 = vsel %vm91_vm0, %v98_v5, 0.0 }
  0xa4   :  { %100 = vadd.xlane.f32.xlu0 %v99_v6 }
 0x12d   :  { %v101_v16 = vpop.xlane.xlu0 %100 }
 0x12e   :  { %v102_v17 = vmul.f32 0.03125, %v101_v16  ;;  %v2975_v16 = vld [vmem:[%s4367_s27 + $0x1] ss:$0 sm:$0xff] }
 0x130   :  { %v103_v18 = vadd.f32 1e-05, %v102_v17 }
 0x132   :  { %3482 = vrsqrt.f32 %v103_v18 }
 0x13f   :  { %v3483_v19 = vpop.eup %3482 }
 0x140   :  { %v105_v21 = vmul.f32 %v3483_v19, %v97_v4 }
 0x142   :  { %v112_v23 = vmul.f32 %v2964_v20, %v105_v21  ;;  %v2967_v20 = vld [vmem:[%s4368_s28 + $0x1] ss:$0 sm:$0xff] }
 0x144   :  { %v3692_v24 = vadd.f32 %v2965_v22, %v112_v23  ;;  %v2976_v23 = vld [vmem:[%s4367_s27 + $0x2] ss:$0 sm:$0xff] }
 0x146   :  { %3178 = vmatmul.mubr.msk.f32.vlgmr.msra.gmra.mxu0 %vm91_vm0, %v3692_v24  ;;  %3189 = vmatmul.mubr.msk.f32.vlgmr.msra.gmra.mxu1 %vm91_vm0, %v3692_v24 }
 0x147   :  { %3192 = vmatpush3.msra.mxu0 %v131_v25  ;;  %3203 = vmatpush3.msra.mxu1 %v135_v26 }
 0x148   :  { %3193 = vmatprep.subr.mxu0 %v3506_v7  ;;  %3204 = vmatprep.subr.mxu1 %v3506_v7 }
 0x149   :  { %3194 = vmatpush3.msra.mxu0 %v130_v27  ;;  %3205 = vmatpush3.msra.mxu1 %v134_v28  ;;  %v2968_v27 = vld [vmem:[%s4368_s28 + $0x2] ss:$0 sm:$0xff]  ;;  %v2969_v28 = vld [vmem:[%s4368_s28 + $0x3] ss:$0 sm:$0xff]  ;;  %s4369_s28 = sld [smem:[#allocation10_spill]] }
 0x14a   :  { %3195 = vmatprep.subr.mxu0 %v3506_v7  ;;  %3206 = vmatprep.subr.mxu1 %v3506_v7 }
 0x14b   :  { %3196 = vmatpush3.msra.mxu0 %v129_v29  ;;  %3207 = vmatpush3.msra.mxu1 %v133_v30 }
 0x14c   :  { %3197 = vmatprep.subr.mxu0 %v3506_v7  ;;  %3208 = vmatprep.subr.mxu1 %v3506_v7 }
 0x14d   :  { %3198 = vmatpush3.msra.mxu0 %v128_v31  ;;  %3199 = vmatprep.mubr.msk.f32.mxu0 %vm3507_vm1, %v3506_v7 }
 0x14e   :  { %3209 = vmatpush3.msra.mxu1 %v132_v32  ;;  %3210 = vmatprep.mubr.msk.f32.mxu1 %vm3507_vm1, %v3506_v7 }
 0x14f   :  { %3200 = vmatmul.mubr.msk.f32.vlgmr.msra.gmra.mxu0 %vm91_vm0, %v3692_v24  ;;  %3211 = vmatmul.mubr.msk.f32.vlgmr.msra.gmra.mxu1 %vm91_vm0, %v3692_v24 }
 0x150   :  { %3213 = vmatprep.subr.mxu0 %v3506_v7  ;;  %3224 = vmatprep.subr.mxu1 %v3506_v7 }
 0x151   :  { %3214 = vmatpush3.msra.mxu0 %v450_v33  ;;  %3225 = vmatpush3.msra.mxu1 %v454_v34 }
 0x152   :  { %3215 = vmatprep.subr.mxu0 %v3506_v7  ;;  %3226 = vmatprep.subr.mxu1 %v3506_v7 }
 0x153   :  { %3216 = vmatpush3.msra.mxu0 %v449_v35  ;;  %3227 = vmatpush3.msra.mxu1 %v453_v36  ;;  %v2982_v35 = vld [vmem:[%s4369_s28] ss:$0 sm:$0xff]  ;;  %v2983_v36 = vld [vmem:[%s4369_s28 + $0x1] ss:$0 sm:$0xff] }
 0x154   :  { %3217 = vmatprep.subr.mxu0 %v3506_v7  ;;  %3228 = vmatprep.subr.mxu1 %v3506_v7 }
 0x155   :  { %3218 = vmatpush3.msra.mxu0 %v448_v37  ;;  %3229 = vmatpush3.msra.mxu1 %v452_v38 }
 0x156   :  { %3219 = vmatprep.subr.mxu0 %v3506_v7  ;;  %3230 = vmatprep.subr.mxu1 %v3506_v7 }
 0x157   :  { %3220 = vmatpush3.msra.mxu0 %v447_v39  ;;  %3221 = vmatprep.mubr.msk.f32.mxu0 %vm3507_vm1, %v3506_v7 }
 0x158   :  { %3231 = vmatpush3.msra.mxu1 %v451_v40  ;;  %3232 = vmatprep.mubr.msk.f32.mxu1 %vm3507_vm1, %v3506_v7 }
 0x159   :  { %3222 = vmatmul.mubr.msk.f32.vlgmr.msra.gmra.mxu0 %vm91_vm0, %v3692_v24  ;;  %3233 = vmatmul.mubr.msk.f32.vlgmr.msra.gmra.mxu1 %vm91_vm0, %v3692_v24 }
 0x15a   :  { %3235 = vmatprep.subr.mxu0 %v3506_v7  ;;  %3246 = vmatprep.subr.mxu1 %v3506_v7 }
 0x15b   :  { %3236 = vmatpush3.msra.mxu0 %v458_v41  ;;  %3247 = vmatpush3.msra.mxu1 %v462_v42 }
 0x15c   :  { %3237 = vmatprep.subr.mxu0 %v3506_v7  ;;  %3248 = vmatprep.subr.mxu1 %v3506_v7 }
 0x15d   :  { %3238 = vmatpush3.msra.mxu0 %v457_v43  ;;  %3249 = vmatpush3.msra.mxu1 %v461_v44  ;;  %v2984_v43 = vld [vmem:[%s4369_s28 + $0x2] ss:$0 sm:$0xff]  ;;  %v2985_v44 = vld [vmem:[%s4369_s28 + $0x3] ss:$0 sm:$0xff] }
 0x15e   :  { %3239 = vmatprep.subr.mxu0 %v3506_v7  ;;  %3250 = vmatprep.subr.mxu1 %v3506_v7 }
 0x15f   :  { %3240 = vmatpush3.msra.mxu0 %v456_v45  ;;  %3251 = vmatpush3.msra.mxu1 %v460_v46 }
 0x160   :  { %3241 = vmatprep.subr.mxu0 %v3506_v7  ;;  %3252 = vmatprep.subr.mxu1 %v3506_v7 }
 0x161   :  { %3242 = vmatpush3.msra.mxu0 %v455_v47  ;;  %3243 = vmatprep.mubr.msk.f32.mxu0 %vm3507_vm1, %v3506_v7 }
 0x162   :  { %3253 = vmatpush3.msra.mxu1 %v459_v48  ;;  %3254 = vmatprep.mubr.msk.f32.mxu1 %vm3507_vm1, %v3506_v7 }
 0x163   :  { %3244 = vmatmul.mubr.msk.f32.vlgmr.msra.gmra.mxu0 %vm91_vm0, %v3692_v24  ;;  %3255 = vmatmul.mubr.msk.f32.vlgmr.msra.gmra.mxu1 %vm91_vm0, %v3692_v24 }
 0x164   :  { %3257 = vmatprep.subr.mxu0 %v3506_v7  ;;  %3268 = vmatprep.subr.mxu1 %v3506_v7 }
 0x165   :  { %3258 = vmatpush3.msra.mxu0 %v774_v49  ;;  %3269 = vmatpush3.msra.mxu1 %v778_v50 }
 0x166   :  { %3259 = vmatprep.subr.mxu0 %v3506_v7  ;;  %3270 = vmatprep.subr.mxu1 %v3506_v7 }
 0x167   :  { %3260 = vmatpush3.msra.mxu0 %v773_v51  ;;  %3271 = vmatpush3.msra.mxu1 %v777_v52  ;;  %v84_v51 = vlaneseq  ;;  %v80_v52 = vld [vmem:[%s4370_s9] sm:$0x1] }
 0x168   :  { %3261 = vmatprep.subr.mxu0 %v3506_v7  ;;  %3272 = vmatprep.subr.mxu1 %v3506_v7  ;;  %vm81_vm3 = vcmp.gt.f32.partialorder %v80_v52, 0.0 }
 0x169   :  { %3262 = vmatpush3.msra.mxu0 %v772_v53  ;;  %3273 = vmatpush3.msra.mxu1 %v776_v54  ;;  %v85_v53 = vshrl.u32 %v84_v51, 7 }
 0x16a   :  { %3263 = vmatprep.subr.mxu0 %v3506_v7  ;;  %3274 = vmatprep.subr.mxu1 %v3506_v7 }
 0x16b   :  { %3264 = vmatpush3.msra.mxu0 %v771_v55  ;;  %3265 = vmatprep.mubr.msk.f32.mxu0 %vm3507_vm1, %v3506_v7  ;;  %v86_v54 = vsub.s32 0, %v85_v53  ;;  %v3508_v55 = vmov -1e+30   ;;  %v1098_v53 = vld [vmem:[%s4329_s10 + $0x18] sm:$0xff] }
 0x16c   :  { %3275 = vmatpush3.msra.mxu1 %v775_v56  ;;  %3276 = vmatprep.mubr.msk.f32.mxu1 %vm3507_vm1, %v3506_v7  ;;  %v82_v56 = vsel %vm81_vm3, 0.0, %v3508_v55 }
 0x16d   :  { %3266 = vmatmul.mubr.msk.f32.vlgmr.msra.gmra.mxu0 %vm91_vm0, %v3692_v24  ;;  %3277 = vmatmul.mubr.msk.f32.vlgmr.msra.gmra.mxu1 %vm91_vm0, %v3692_v24 }
 0x16e   :  { %3279 = vmatprep.subr.mxu0 %v3506_v7  ;;  %3290 = vmatprep.subr.mxu1 %v3506_v7 }
 0x16f   :  { %3280 = vmatpush3.msra.mxu0 %v782_v57  ;;  %3291 = vmatpush3.msra.mxu1 %v786_v58  ;;  %v87_v57 = vrot.slane %v82_v56, %v86_v54 }
 0x170   :  { %3281 = vmatprep.subr.mxu0 %v3506_v7  ;;  %3292 = vmatprep.subr.mxu1 %v3506_v7 }
 0x171   :  { %3282 = vmatpush3.msra.mxu0 %v781_v59  ;;  %3293 = vmatpush3.msra.mxu1 %v785_v60 }
 0x172   :  { %3283 = vmatprep.subr.mxu0 %v3506_v7  ;;  %3294 = vmatprep.subr.mxu1 %v3506_v7 }
 0x173   :  { %3284 = vmatpush3.msra.mxu0 %v780_v61  ;;  %3295 = vmatpush3.msra.mxu1 %v784_v62 }
 0x174   :  { %3285 = vmatprep.subr.mxu0 %v3506_v7  ;;  %3296 = vmatprep.subr.mxu1 %v3506_v7 }
 0x175   :  { %3286 = vmatpush3.msra.mxu0 %v779_v63  ;;  %3287 = vmatprep.mubr.msk.f32.mxu0 %vm3507_vm1, %v3506_v7 }
 0x176   :  { %3297 = vmatpush3.msra.mxu1 %v783_v1  ;;  %3298 = vmatprep.mubr.msk.f32.mxu1 %vm3507_vm1, %v3506_v7 }
 0x177   :  { %3288 = vmatmul.mubr.msk.f32.vlgmr.msra.gmra.mxu0 %vm91_vm0, %v3692_v24  ;;  %3299 = vmatmul.mubr.msk.f32.vlgmr.msra.gmra.mxu1 %vm91_vm0, %v3692_v24  ;;  %v2977_v24 = vld [vmem:[%s4367_s27 + $0x3] ss:$0 sm:$0xff] }
 0x178   :  { %3301 = vmatprep.subr.mxu1 %v3506_v7  ;;  %3303 = vmatprep.mubr.msk.f32.mxu1 %vm3507_vm1, %v3506_v7 }
 0x179   :  { %3311 = vmatprep.subr.mxu0 %v3506_v7  ;;  %3313 = vmatprep.mubr.msk.f32.mxu0 %vm3507_vm1, %v3506_v7 }
 0x206   :  { %v233_v2 = vpop.f32.mrf.mxu0  ;;  %v303_v3 = vpop.f32.mrf.mxu1 }
 0x207   :  { %v234_v19 = vadd.f32 %v2966_v14, %v233_v2  ;;  %v304_v22 = vadd.f32 %v2967_v20, %v303_v3 }
 0x208   :  { %v3179_v4 = vpop.f32.mrf.mxu0  ;;  %v3190_v5 = vpop.f32.mrf.mxu1 }
 0x20f   :  { %v373_v6 = vpop.f32.mrf.mxu0  ;;  %v443_v8 = vpop.f32.mrf.mxu1 }
 0x210   :  { %v374_v33 = vadd.f32 %v2968_v27, %v373_v6  ;;  %v444_v34 = vadd.f32 %v2969_v28, %v443_v8 }
 0x211   :  { %v3201_v9 = vpop.f32.mrf.mxu0  ;;  %v3212_v10 = vpop.f32.mrf.mxu1 }
 0x219   :  { %v557_v12 = vpop.f32.mrf.mxu0  ;;  %v627_v13 = vpop.f32.mrf.mxu1 }
 0x21a   :  { %v558_v15 = vadd.f32 %v2974_v11, %v557_v12  ;;  %v628_v21 = vadd.f32 %v2975_v16, %v627_v13 }
 0x21b   :  { %v3223_v17 = vpop.f32.mrf.mxu0  ;;  %v3234_v18 = vpop.f32.mrf.mxu1 }
 0x21c   :  { %3302 = vmatpush3.xpose.msk.msra.mxu1 %vm1100_vm2, %v558_v15 }
 0x21d   :  { %3306 = vmatprep.subr.mxu1 %v3506_v7 }
 0x21f   :  { %3304 = vmatmul.mubr.msk.f32.vlgmr.msra.gmra.mxu1 %vm1100_vm2, %v234_v19 }
 0x220   :  { %3307 = vmatpush3.xpose.msk.msra.mxu1 %vm1100_vm2, %v628_v21  ;;  %3308 = vmatprep.mubr.msk.f32.mxu1 %vm3507_vm1, %v3506_v7 }
 0x221   :  { %3316 = vmatprep.subr.mxu1 %v3506_v7 }
 0x223   :  { %v697_v25 = vpop.f32.mrf.mxu0  ;;  %v767_v26 = vpop.f32.mrf.mxu1  ;;  %3309 = vmatmul.mubr.msk.f32.vlgmr.msra.gmra.mxu1 %vm1100_vm2, %v304_v22 }
 0x224   :  { %v698_v29 = vadd.f32 %v2976_v23, %v697_v25  ;;  %v768_v30 = vadd.f32 %v2977_v24, %v767_v26  ;;  %3318 = vmatprep.mubr.msk.f32.mxu1 %vm3507_vm1, %v3506_v7 }
 0x225   :  { %v3245_v31 = vpop.f32.mrf.mxu0  ;;  %v3256_v32 = vpop.f32.mrf.mxu1 }
 0x226   :  { %3312 = vmatpush3.xpose.msk.msra.mxu0 %vm1100_vm2, %v698_v29  ;;  %3317 = vmatpush3.xpose.msk.msra.mxu1 %vm1100_vm2, %v768_v30 }
 0x227   :  { %3321 = vmatprep.subr.mxu0 %v3506_v7  ;;  %3326 = vmatprep.subr.mxu1 %v3506_v7 }
 0x229   :  { %3314 = vmatmul.mubr.msk.f32.vlgmr.msra.gmra.mxu0 %vm1100_vm2, %v374_v33  ;;  %3319 = vmatmul.mubr.msk.f32.vlgmr.msra.gmra.mxu1 %vm1100_vm2, %v444_v34 }
 0x22a   :  { %3323 = vmatprep.mubr.msk.f32.mxu0 %vm3507_vm1, %v3506_v7  ;;  %3328 = vmatprep.mubr.msk.f32.mxu1 %vm3507_vm1, %v3506_v7 }
 0x22d   :  { %v881_v37 = vpop.f32.mrf.mxu0  ;;  %v951_v38 = vpop.f32.mrf.mxu1 }
 0x22e   :  { %v882_v39 = vadd.f32 %v2982_v35, %v881_v37  ;;  %v952_v40 = vadd.f32 %v2983_v36, %v951_v38 }
 0x22f   :  { %v3267_v41 = vpop.f32.mrf.mxu0  ;;  %v3278_v42 = vpop.f32.mrf.mxu1 }
 0x230   :  { %3322 = vmatpush3.msra.mxu0 %v882_v39  ;;  %3327 = vmatpush3.msra.mxu1 %v952_v40 }
 0x231   :  { %3331 = vmatprep.subr.mxu0 %v3506_v7  ;;  %3336 = vmatprep.subr.mxu1 %v3506_v7 }
 0x237   :  { %v1021_v45 = vpop.f32.mrf.mxu0  ;;  %v1091_v46 = vpop.f32.mrf.mxu1 }
 0x238   :  { %v3960_v47 = vadd.f32 %v2984_v43, %v1021_v45  ;;  %v3962_v48 = vadd.f32 %v2985_v44, %v1091_v46 }
 0x239   :  { %v3289_v49 = vpop.f32.mrf.mxu0  ;;  %v3300_v50 = vpop.f32.mrf.mxu1 }
 0x23a   :  { %v1097_v50 = vld [vmem:[%s4329_s10 + $0x10] sm:$0xff] }
 0x2df   :  { %v1173_v58 = vpop.f32.mrf.mxu1 }
 0x2e0   :  { %v1405_v59 = vmul.f32 0.35355338, %v1173_v58 }
 0x2e1   :  { %v3305_v60 = vpop.f32.mrf.mxu1 }
 0x2e2   :  { %v1409_v61 = vadd.f32 %v1405_v59, %v87_v57 }
 0x2e3   :  { %v1249_v62 = vpop.f32.mrf.mxu1 }
 0x2e4   :  { %v1406_v63 = vmul.f32 0.35355338, %v1249_v62  ;;  %v1413_v1 = vsel %vm1100_vm2, %v1409_v61, -inf }
 0x2e5   :  { %1414 = vmax.xlane.f32.xlu1 %v1413_v1  ;;  %v3310_v2 = vpop.f32.mrf.mxu1 }
 0x2e6   :  { %v1410_v3 = vadd.f32 %v1406_v63, %v87_v57 }
 0x2e8   :  { %v1416_v4 = vsel %vm1100_vm2, %v1410_v3, -inf }
 0x2e9   :  { %v1325_v5 = vpop.f32.mrf.mxu0  ;;  %v1401_v6 = vpop.f32.mrf.mxu1  ;;  %1417 = vmax.xlane.f32.xlu1 %v1416_v4 }
 0x2ea   :  { %v1407_v8 = vmul.f32 0.35355338, %v1325_v5  ;;  %v1408_v9 = vmul.f32 0.35355338, %v1401_v6 }
 0x2eb   :  { %v3315_v10 = vpop.f32.mrf.mxu0  ;;  %v3320_v11 = vpop.f32.mrf.mxu1 }
 0x2ec   :  { %v1412_v12 = vadd.f32 %v1408_v9, %v87_v57  ;;  %v1411_v13 = vadd.f32 %v1407_v8, %v87_v57  ;;  %v3006_v11 = vld [vmem:[%s4330_s11] ss:$0 sm:$0xff] }
 0x2ee   :  { %v1422_v14 = vsel %vm1100_vm2, %v1412_v12, -inf  ;;  %v1419_v15 = vsel %vm1100_vm2, %v1411_v13, -inf }
 0x2ef   :  { %1423 = vmax.xlane.f32.xlu1 %v1422_v14  ;;  %1420 = vmax.xlane.f32.xlu0 %v1419_v15 }
 0x36e   :  { %v1415_v16 = vpop.xlane.xlu1 %1414 }
 0x36f   :  { %v1425_v17 = vsub.f32 %v1409_v61, %v1415_v16 }
 0x371   :  { %v1429_v18 = vmul.f32 1.442695, %v1425_v17 }
 0x372   :  { %v1418_v19 = vpop.xlane.xlu1 %1417 }
 0x373   :  { %3484 = vpow2.f32 %v1429_v18  ;;  %v1426_v20 = vsub.f32 %v1410_v3, %v1418_v19 }
 0x375   :  { %v1431_v21 = vmul.f32 1.442695, %v1426_v20 }
 0x377   :  { %3486 = vpow2.f32 %v1431_v21 }
 0x378   :  { %v1424_v22 = vpop.xlane.xlu1 %1423  ;;  %v1421_v23 = vpop.xlane.xlu0 %1420 }
 0x379   :  { %v1428_v24 = vsub.f32 %v1412_v12, %v1424_v22  ;;  %v1427_v25 = vsub.f32 %v1411_v13, %v1421_v23  ;;  %v2061_v22 = vld [vmem:[%s4331_s14 + $0x18] sm:$0xff]  ;;  %v2059_v23 = vld [vmem:[%s4331_s14 + $0x8] sm:$0xff] }
 0x37b   :  { %v1435_v26 = vmul.f32 1.442695, %v1428_v24  ;;  %v1433_v27 = vmul.f32 1.442695, %v1427_v25  ;;  %v2058_v24 = vld [vmem:[%s4331_s14] sm:$0xff] }
 0x37d   :  { %3488 = vpow2.f32 %v1435_v26 }
 0x37e   :  { %3490 = vpow2.f32 %v1433_v27 }
 0x380   :  { %v3485_v28 = vpop.eup %3484 }
 0x381   :  { %v1437_v29 = vsel %vm1100_vm2, %v3485_v28, 0.0 }
 0x382   :  { %1438 = vadd.xlane.f32.xlu0 %v1437_v29  ;;  %v3007_v29 = vld [vmem:[%s4332_s12] ss:$0 sm:$0xff] }
 0x384   :  { %v3487_v30 = vpop.eup %3486 }
 0x385   :  { %v1440_v31 = vsel %vm1100_vm2, %v3487_v30, 0.0 }
 0x386   :  { %1441 = vadd.xlane.f32.xlu1 %v1440_v31  ;;  %v3008_v31 = vld [vmem:[%s4333_s13] ss:$0 sm:$0xff] }
 0x38a   :  { %v3489_v32 = vpop.eup %3488 }
 0x38b   :  { %v3491_v33 = vpop.eup %3490  ;;  %v1446_v34 = vsel %vm1100_vm2, %v3489_v32, 0.0 }
 0x38c   :  { %1447 = vadd.xlane.f32.xlu1 %v1446_v34  ;;  %v1443_v35 = vsel %vm1100_vm2, %v3491_v33, 0.0  ;;  %v2070_v34 = vld [vmem:[%s4334_s16 + $0x38] sm:$0xff] }
 0x38d   :  { %1444 = vadd.xlane.f32.xlu0 %v1443_v35  ;;  %v2069_v35 = vld [vmem:[%s4334_s16 + $0x30] sm:$0xff] }
 0x40b   :  { %v1439_v36 = vpop.xlane.xlu0 %1438 }
 0x40c   :  { %3492 = vrcp.f32 %v1439_v36  ;;  %v2068_v36 = vld [vmem:[%s4334_s16 + $0x28] sm:$0xff] }
 0x40f   :  { %v1442_v37 = vpop.xlane.xlu1 %1441 }
 0x410   :  { %3494 = vrcp.f32 %v1442_v37  ;;  %v2067_v37 = vld [vmem:[%s4334_s16 + $0x20] sm:$0xff] }
 0x415   :  { %v1448_v38 = vpop.xlane.xlu1 %1447 }
 0x416   :  { %3496 = vrcp.f32 %v1448_v38  ;;  %v1445_v39 = vpop.xlane.xlu0 %1444  ;;  %v2066_v38 = vld [vmem:[%s4334_s16 + $0x18] sm:$0xff] }
 0x417   :  { %3498 = vrcp.f32 %v1445_v39  ;;  %v2065_v39 = vld [vmem:[%s4334_s16 + $0x10] sm:$0xff] }
 0x419   :  { %v3493_v40 = vpop.eup %3492 }
 0x41a   :  { %v1453_v41 = vmul.f32 %v3493_v40, %v3485_v28  ;;  %v2064_v40 = vld [vmem:[%s4334_s16 + $0x8] sm:$0xff] }
 0x41c   :  { %3324 = vmatmul.mubr.msk.f32.vlgmr.msra.gmra.mxu0 %vm1100_vm2, %v1453_v41  ;;  %v2063_v41 = vld [vmem:[%s4334_s16] sm:$0xff] }
 0x41d   :  { %v3495_v42 = vpop.eup %3494  ;;  %3332 = vmatpush3.msra.mxu0 %v3960_v47  ;;  %3333 = vmatprep.mubr.msk.f32.mxu0 %vm3507_vm1, %v3506_v7  ;;  %v1095_v47 = vld [vmem:[%s4329_s10] sm:$0xff] }
 0x41e   :  { %v1454_v43 = vmul.f32 %v3495_v42, %v3487_v30  ;;  %3341 = vmatprep.subr.mxu0 %v3506_v7  ;;  %v3009_v42 = vld [vmem:[%s4335_s15] ss:$0 sm:$0xff] }
 0x420   :  { %3329 = vmatmul.mubr.msk.f32.vlgmr.msra.gmra.mxu1 %vm1100_vm2, %v1454_v43 }
 0x421   :  { %3337 = vmatpush3.msra.mxu1 %v3962_v48  ;;  %3338 = vmatprep.mubr.msk.f32.mxu1 %vm3507_vm1, %v3506_v7  ;;  %v1096_v48 = vld [vmem:[%s4329_s10 + $0x8] sm:$0xff] }
 0x422   :  { %3346 = vmatprep.subr.mxu1 %v3506_v7 }
 0x423   :  { %v3497_v44 = vpop.eup %3496 }
 0x424   :  { %v3499_v45 = vpop.eup %3498  ;;  %v1456_v46 = vmul.f32 %v3497_v44, %v3489_v32 }
 0x425   :  { %v1455_v49 = vmul.f32 %v3499_v45, %v3491_v33 }
 0x426   :  { %3339 = vmatmul.mubr.msk.f32.vlgmr.msra.gmra.mxu1 %vm1100_vm2, %v1456_v46 }
 0x427   :  { %3334 = vmatmul.mubr.msk.f32.vlgmr.msra.gmra.mxu0 %vm1100_vm2, %v1455_v49  ;;  %3348 = vmatprep.mubr.msk.f32.mxu1 %vm3507_vm1, %v3506_v7 }
 0x428   :  { %3343 = vmatprep.mubr.msk.f32.mxu0 %vm3507_vm1, %v3506_v7  ;;  %3342 = vmatpush3.msra.mxu0 %v1095_v47 }
 0x429   :  { %3351 = vmatprep.subr.mxu0 %v3506_v7  ;;  %3347 = vmatpush3.msra.mxu1 %v1096_v48 }
 0x42a   :  { %3356 = vmatprep.subr.mxu1 %v3506_v7 }
 0x4dc   :  { %v1526_v51 = vpop.f32.mrf.mxu0 }
 0x4dd   :  { %3344 = vmatmul.mubr.msk.f32.vlgmr.msra.gmra.mxu0 %vm1100_vm2, %v1526_v51 }
 0x4de   :  { %v3325_v52 = vpop.f32.mrf.mxu0  ;;  %3352 = vmatpush3.msra.mxu0 %v1097_v50  ;;  %3353 = vmatprep.mubr.msk.f32.mxu0 %vm3507_vm1, %v3506_v7 }
 0x4df   :  { %3361 = vmatprep.subr.mxu0 %v3506_v7 }
 0x4e0   :  { %v1599_v54 = vpop.f32.mrf.mxu1 }
 0x4e1   :  { %3349 = vmatmul.mubr.msk.f32.vlgmr.msra.gmra.mxu1 %vm1100_vm2, %v1599_v54 }
 0x4e2   :  { %v3330_v55 = vpop.f32.mrf.mxu1  ;;  %3357 = vmatpush3.msra.mxu1 %v1098_v53  ;;  %3358 = vmatprep.mubr.msk.f32.mxu1 %vm3507_vm1, %v3506_v7 }
 0x4e3   :  { %3372 = vmatprep.subr.mxu1 %v3506_v7  ;;  %v3011_v55 = vld [vmem:[%s4336_s17] ss:$0 sm:$0xff] }
 0x4e6   :  { %v1745_v56 = vpop.f32.mrf.mxu1 }
 0x4e7   :  { %v1672_v57 = vpop.f32.mrf.mxu0  ;;  %3359 = vmatmul.mubr.msk.f32.vlgmr.msra.gmra.mxu1 %vm1100_vm2, %v1745_v56 }
 0x4e8   :  { %3354 = vmatmul.mubr.msk.f32.vlgmr.msra.gmra.mxu0 %vm1100_vm2, %v1672_v57  ;;  %v3340_v58 = vpop.f32.mrf.mxu1  ;;  %3388 = vmatprep.mubr.msk.f32.mxu1 %vm3507_vm1, %v3506_v7 }
 0x4e9   :  { %v3335_v59 = vpop.f32.mrf.mxu0  ;;  %3369 = vmatprep.mubr.msk.f32.mxu0 %vm3507_vm1, %v3506_v7  ;;  %3362 = vmatpush3.msra.mxu0 %v2061_v22  ;;  %v2631_v22 = vld [vmem:[%s4340_s22 + $0x18] sm:$0xff] }
 0x4ea   :  { %3363 = vmatprep.subr.mxu0 %v3506_v7  ;;  %3373 = vmatpush3.msra.mxu1 %v2070_v34  ;;  %v2309_v34 = vld [vmem:[%s4337_s20 + $0x60] sm:$0xff] }
 0x4eb   :  { %3374 = vmatprep.subr.mxu1 %v3506_v7 }
 0x4ec   :  { %3375 = vmatpush3.msra.mxu1 %v2069_v35  ;;  %v2636_v35 = vld [vmem:[%s4340_s22 + $0x40] sm:$0xff] }
 0x4ed   :  { %3376 = vmatprep.subr.mxu1 %v3506_v7 }
 0x4ee   :  { %3377 = vmatpush3.msra.mxu1 %v2068_v36  ;;  %v2635_v36 = vld [vmem:[%s4340_s22 + $0x38] sm:$0xff] }
 0x4ef   :  { %3378 = vmatprep.subr.mxu1 %v3506_v7 }
 0x4f0   :  { %3379 = vmatpush3.msra.mxu1 %v2067_v37  ;;  %v2634_v37 = vld [vmem:[%s4340_s22 + $0x30] sm:$0xff] }
 0x4f1   :  { %3380 = vmatprep.subr.mxu1 %v3506_v7 }
 0x4f2   :  { %3381 = vmatpush3.msra.mxu1 %v2066_v38  ;;  %v2633_v38 = vld [vmem:[%s4340_s22 + $0x28] sm:$0xff] }
 0x4f3   :  { %3382 = vmatprep.subr.mxu1 %v3506_v7 }
 0x4f4   :  { %3383 = vmatpush3.msra.mxu1 %v2065_v39  ;;  %v2632_v39 = vld [vmem:[%s4340_s22 + $0x20] sm:$0xff] }
 0x4f5   :  { %3384 = vmatprep.subr.mxu1 %v3506_v7 }
 0x4f6   :  { %3385 = vmatpush3.msra.mxu1 %v2064_v40  ;;  %v2643_v40 = vld [vmem:[%s4340_s22 + $0x78] sm:$0xff] }
 0x4f7   :  { %3386 = vmatprep.subr.mxu1 %v3506_v7 }
 0x4f8   :  { %3387 = vmatpush3.msra.mxu1 %v2063_v41  ;;  %v2642_v41 = vld [vmem:[%s4340_s22 + $0x70] sm:$0xff] }
 0x4f9   :  { %3413 = vmatprep.subr.mxu1 %v3506_v7 }
 0x59d   :  { %v1818_v60 = vpop.f32.mrf.mxu0 }
 0x59e   :  { %v2041_v2 = vsel %vm91_vm0, %v1818_v60, 0.0 }
 0x59f   :  { %v3345_v61 = vpop.f32.mrf.mxu0 }
 0x5a1   :  { %v1891_v62 = vpop.f32.mrf.mxu1 }
 0x5a2   :  { %v2042_v1 = vsel %vm91_vm0, %v1891_v62, 0.0 }
 0x5a3   :  { %v3350_v63 = vpop.f32.mrf.mxu1  ;;  %v2043_v4 = vadd.f32 %v2042_v1, %v2041_v2 }
 0x5a7   :  { %v2037_v3 = vpop.f32.mrf.mxu1 }
 0x5a8   :  { %v1964_v5 = vpop.f32.mrf.mxu0  ;;  %v2046_v12 = vsel %vm91_vm0, %v2037_v3, 0.0  ;;  %v2300_v3 = vld [vmem:[%s4337_s20 + $0x18] sm:$0xff] }
 0x5a9   :  { %v2044_v6 = vsel %vm91_vm0, %v1964_v5, 0.0  ;;  %v3360_v8 = vpop.f32.mrf.mxu1  ;;  %v2299_v5 = vld [vmem:[%s4337_s20 + $0x10] sm:$0xff] }
 0x5aa   :  { %v2045_v9 = vadd.f32 %v2044_v6, %v2043_v4  ;;  %v3355_v10 = vpop.f32.mrf.mxu0  ;;  %v2308_v4 = vld [vmem:[%s4337_s20 + $0x58] sm:$0xff]  ;;  %v2307_v6 = vld [vmem:[%s4337_s20 + $0x50] sm:$0xff]  ;;  %v2298_v8 = vld [vmem:[%s4337_s20 + $0x8] sm:$0xff] }
 0x5ab   :  { %v2297_v10 = vld [vmem:[%s4337_s20] sm:$0xff] }
 0x5ac   :  { %v2047_v13 = vadd.f32 %v2046_v12, %v2045_v9  ;;  %v2306_v9 = vld [vmem:[%s4337_s20 + $0x48] sm:$0xff] }
 0x5ae   :  { %v2054_v14 = vadd.f32 %v3006_v11, %v2047_v13  ;;  %v2305_v11 = vld [vmem:[%s4337_s20 + $0x40] sm:$0xff] }
 0x5b0   :  { %v4027_v15 = vadd.f32 %v2054_v14, %v3642_v0  ;;  %v2060_v0 = vld [vmem:[%s4331_s14 + $0x10] sm:$0xff] }
 0x5b1   :  { %3364 = vmatpush3.msra.mxu0 %v2060_v0  ;;  %v2303_v0 = vld [vmem:[%s4337_s20 + $0x30] sm:$0xff] }
 0x5b2   :  { %v2072_v16 = vsel %vm91_vm0, %v4027_v15, 0.0  ;;  %3365 = vmatprep.subr.mxu0 %v3506_v7 }
 0x5b3   :  { %2073 = vadd.xlane.f32.xlu0 %v2072_v16  ;;  %3366 = vmatpush3.msra.mxu0 %v2059_v23  ;;  %v3013_v16 = vld [vmem:[%s4338_s18] ss:$0 sm:$0xff]  ;;  %v2630_v23 = vld [vmem:[%s4340_s22 + $0x10] sm:$0xff] }
 0x5b4   :  { %3367 = vmatprep.subr.mxu0 %v3506_v7 }
 0x5b5   :  { %3368 = vmatpush3.msra.mxu0 %v2058_v24  ;;  %v2302_v24 = vld [vmem:[%s4337_s20 + $0x28] sm:$0xff] }
 0x5b6   :  { %3391 = vmatprep.subr.mxu0 %v3506_v7 }
 0x63c   :  { %v2074_v17 = vpop.xlane.xlu0 %2073 }
 0x63d   :  { %v2075_v18 = vmul.f32 0.03125, %v2074_v17 }
 0x63f   :  { %v2076_v19 = vsub.f32 %v4027_v15, %v2075_v18  ;;  %v3014_v18 = vld [vmem:[%s4339_s19] ss:$0 sm:$0xff] }
 0x641   :  { %v2077_v20 = vmul.f32 %v2076_v19, %v2076_v19 }
 0x643   :  { %v2078_v21 = vsel %vm91_vm0, %v2077_v20, 0.0 }
 0x644   :  { %2079 = vadd.xlane.f32.xlu1 %v2078_v21  ;;  %v2304_v21 = vld [vmem:[%s4337_s20 + $0x38] sm:$0xff] }
 0x6cd   :  { %v2080_v25 = vpop.xlane.xlu1 %2079 }
 0x6ce   :  { %v2081_v26 = vmul.f32 0.03125, %v2080_v25  ;;  %v2629_v25 = vld [vmem:[%s4340_s22 + $0x8] sm:$0xff] }
 0x6d0   :  { %v2082_v27 = vadd.f32 1e-05, %v2081_v26  ;;  %v2301_v26 = vld [vmem:[%s4337_s20 + $0x20] sm:$0xff] }
 0x6d2   :  { %3500 = vrsqrt.f32 %v2082_v27  ;;  %v2628_v27 = vld [vmem:[%s4340_s22] sm:$0xff] }
 0x6df   :  { %v3501_v28 = vpop.eup %3500 }
 0x6e0   :  { %v2084_v30 = vmul.f32 %v3501_v28, %v2076_v19  ;;  %v2312_v28 = vld [vmem:[%s4337_s20 + $0x78] sm:$0xff] }
 0x6e2   :  { %v2091_v32 = vmul.f32 %v3007_v29, %v2084_v30  ;;  %v2639_v29 = vld [vmem:[%s4340_s22 + $0x58] sm:$0xff]  ;;  %v2311_v30 = vld [vmem:[%s4337_s20 + $0x70] sm:$0xff] }
 0x6e4   :  { %v2098_v33 = vadd.f32 %v3008_v31, %v2091_v32  ;;  %v2638_v31 = vld [vmem:[%s4340_s22 + $0x50] sm:$0xff]  ;;  %v2310_v32 = vld [vmem:[%s4337_s20 + $0x68] sm:$0xff] }
 0x6e6   :  { %3370 = vmatmul.mubr.msk.f32.vlgmr.msra.gmra.mxu0 %vm91_vm0, %v2098_v33  ;;  %v2637_v33 = vld [vmem:[%s4340_s22 + $0x48] sm:$0xff] }
 0x6e7   :  { %3399 = vmatprep.mubr.msk.f32.mxu0 %vm3507_vm1, %v3506_v7  ;;  %3392 = vmatpush3.msra.mxu0 %v2300_v3 }
 0x6e8   :  { %3393 = vmatprep.subr.mxu0 %v3506_v7 }
 0x6e9   :  { %3394 = vmatpush3.msra.mxu0 %v2299_v5 }
 0x6ea   :  { %3395 = vmatprep.subr.mxu0 %v3506_v7 }
 0x6eb   :  { %3396 = vmatpush3.msra.mxu0 %v2298_v8 }
 0x6ec   :  { %3397 = vmatprep.subr.mxu0 %v3506_v7 }
 0x6ed   :  { %3398 = vmatpush3.msra.mxu0 %v2297_v10 }
 0x6ee   :  { %3402 = vmatprep.subr.mxu0 %v3506_v7 }
 0x7a6   :  { %v2174_v43 = vpop.f32.mrf.mxu0 }
 0x7a7   :  { %v2175_v44 = vadd.f32 %v3009_v42, %v2174_v43  ;;  %v2641_v42 = vld [vmem:[%s4340_s22 + $0x68] sm:$0xff]  ;;  %v2640_v43 = vld [vmem:[%s4340_s22 + $0x60] sm:$0xff] }
 0x7a8   :  { %v3371_v45 = vpop.f32.mrf.mxu0 }
 0x7a9   :  { %v2178_v46 = vmul.f32 %v2175_v44, %v2175_v44  ;;  %v3017_v45 = vld [vmem:[%s4341_s21 + $0x2] ss:$0 sm:$0xff] }
 0x7ab   :  { %v2179_v49 = vmul.f32 %v2178_v46, %v2175_v44 }
 0x7ad   :  { %v2180_v47 = vmul.f32 0.044715, %v2179_v49 }
 0x7af   :  { %v2181_v48 = vadd.f32 %v2180_v47, %v2175_v44 }
 0x7b1   :  { %v2182_v50 = vmul.f32 0.7978846, %v2181_v48 }
 0x7b3   :  { %3502 = vtanh.f32 %v2182_v50 }
 0x7c0   :  { %v3503_v51 = vpop.eup %3502 }
 0x7c1   :  { %v2184_v52 = vadd.f32 1.0, %v3503_v51 }
 0x7c3   :  { %v2185_v53 = vmul.f32 0.5, %v2184_v52  ;;  %v3023_v52 = vld [vmem:[%s4343_s23] ss:$0 sm:$0xff] }
 0x7c5   :  { %v2186_v54 = vmul.f32 %v2185_v53, %v2175_v44  ;;  %v3015_v44 = vld [vmem:[%s4341_s21] ss:$0 sm:$0xff] }
 0x7c7   :  { %3389 = vmatmul.mubr.msk.f32.vlgmr.msra.gmra.mxu1 %vm2193_vm4, %v2186_v54 }
 0x7c8   :  { %3421 = vmatprep.mubr.msk.f32.mxu1 %vm3507_vm1, %v3506_v7  ;;  %3414 = vmatpush3.msra.mxu1 %v2308_v4  ;;  %v3024_v4 = vld [vmem:[%s4343_s23 + $0x1] ss:$0 sm:$0xff] }
 0x7c9   :  { %3415 = vmatprep.subr.mxu1 %v3506_v7 }
 0x7ca   :  { %3416 = vmatpush3.msra.mxu1 %v2307_v6 }
 0x7cb   :  { %3417 = vmatprep.subr.mxu1 %v3506_v7 }
 0x7cc   :  { %3418 = vmatpush3.msra.mxu1 %v2306_v9  ;;  %v3026_v9 = vld [vmem:[%s4343_s23 + $0x3] ss:$0 sm:$0xff] }
 0x7cd   :  { %3419 = vmatprep.subr.mxu1 %v3506_v7 }
 0x7ce   :  { %3420 = vmatpush3.msra.mxu1 %v2305_v11 }
 0x7cf   :  { %3435 = vmatprep.subr.mxu1 %v3506_v7 }
 0x887   :  { %v2263_v56 = vpop.f32.mrf.mxu1 }
 0x888   :  { %v2264_v57 = vadd.f32 %v3011_v55, %v2263_v56 }
 0x889   :  { %v3390_v58 = vpop.f32.mrf.mxu1 }
 0x88a   :  { %v2267_v59 = vadd.f32 %v2264_v57, %v4027_v15 }
 0x88c   :  { %v2270_v60 = vsel %vm91_vm0, %v2267_v59, 0.0 }
 0x88d   :  { %2271 = vadd.xlane.f32.xlu0 %v2270_v60  ;;  %v3025_v60 = vld [vmem:[%s4343_s23 + $0x2] ss:$0 sm:$0xff] }
 0x916   :  { %v2272_v61 = vpop.xlane.xlu0 %2271 }
 0x917   :  { %v2273_v62 = vmul.f32 0.03125, %v2272_v61 }
 0x919   :  { %v2274_v63 = vsub.f32 %v2267_v59, %v2273_v62  ;;  %v3018_v59 = vld [vmem:[%s4341_s21 + $0x3] ss:$0 sm:$0xff] }
 0x91b   :  { %v2275_v1 = vmul.f32 %v2274_v63, %v2274_v63 }
 0x91d   :  { %v2276_v2 = vsel %vm91_vm0, %v2275_v1, 0.0 }
 0x91e   :  { %2277 = vadd.xlane.f32.xlu1 %v2276_v2 }
 0x9a7   :  { %v2278_v12 = vpop.xlane.xlu1 %2277 }
 0x9a8   :  { %v2279_v13 = vmul.f32 0.03125, %v2278_v12 }
 0x9aa   :  { %v2280_v14 = vadd.f32 1e-05, %v2279_v13 }
 0x9ac   :  { %3504 = vrsqrt.f32 %v2280_v14 }
 0x9b9   :  { %v3505_v15 = vpop.eup %3504 }
 0x9ba   :  { %v2282_v17 = vmul.f32 %v3505_v15, %v2274_v63 }
 0x9bc   :  { %v2289_v19 = vmul.f32 %v3013_v16, %v2282_v17 }
 0x9be   :  { %v4139_v20 = vadd.f32 %v3014_v18, %v2289_v19 }
 0x9c0   :  { %3400 = vmatmul.mubr.msk.f32.vlgmr.msra.gmra.mxu0 %vm91_vm0, %v4139_v20  ;;  %3422 = vmatmul.mubr.msk.f32.vlgmr.msra.gmra.mxu1 %vm91_vm0, %v4139_v20 }
 0x9c1   :  { %3403 = vmatpush3.msra.mxu0 %v2304_v21  ;;  %3436 = vmatpush3.msra.mxu1 %v2631_v22 }
 0x9c2   :  { %3404 = vmatprep.subr.mxu0 %v3506_v7  ;;  %3437 = vmatprep.subr.mxu1 %v3506_v7 }
 0x9c3   :  { %3405 = vmatpush3.msra.mxu0 %v2303_v0  ;;  %3438 = vmatpush3.msra.mxu1 %v2630_v23 }
 0x9c4   :  { %3406 = vmatprep.subr.mxu0 %v3506_v7  ;;  %3439 = vmatprep.subr.mxu1 %v3506_v7 }
 0x9c5   :  { %3407 = vmatpush3.msra.mxu0 %v2302_v24  ;;  %3440 = vmatpush3.msra.mxu1 %v2629_v25 }
 0x9c6   :  { %3408 = vmatprep.subr.mxu0 %v3506_v7  ;;  %3441 = vmatprep.subr.mxu1 %v3506_v7 }
 0x9c7   :  { %3409 = vmatpush3.msra.mxu0 %v2301_v26  ;;  %3410 = vmatprep.mubr.msk.f32.mxu0 %vm3507_vm1, %v3506_v7 }
 0x9c8   :  { %3442 = vmatpush3.msra.mxu1 %v2628_v27  ;;  %3443 = vmatprep.mubr.msk.f32.mxu1 %vm3507_vm1, %v3506_v7 }
 0x9c9   :  { %3411 = vmatmul.mubr.msk.f32.vlgmr.msra.gmra.mxu0 %vm91_vm0, %v4139_v20  ;;  %3424 = vmatprep.subr.mxu0 %v3506_v7 }
 0x9ca   :  { %3444 = vmatmul.mubr.msk.f32.vlgmr.msra.gmra.mxu1 %vm91_vm0, %v4139_v20  ;;  %3457 = vmatprep.subr.mxu1 %v3506_v7 }
 0x9cb   :  { %3425 = vmatpush3.msra.mxu0 %v2312_v28  ;;  %3458 = vmatpush3.msra.mxu1 %v2639_v29 }
 0x9cc   :  { %3426 = vmatprep.subr.mxu0 %v3506_v7  ;;  %3459 = vmatprep.subr.mxu1 %v3506_v7 }
 0x9cd   :  { %3427 = vmatpush3.msra.mxu0 %v2311_v30  ;;  %3460 = vmatpush3.msra.mxu1 %v2638_v31 }
 0x9ce   :  { %3428 = vmatprep.subr.mxu0 %v3506_v7  ;;  %3461 = vmatprep.subr.mxu1 %v3506_v7 }
 0x9cf   :  { %3429 = vmatpush3.msra.mxu0 %v2310_v32  ;;  %3462 = vmatpush3.msra.mxu1 %v2637_v33 }
 0x9d0   :  { %3430 = vmatprep.subr.mxu0 %v3506_v7  ;;  %3463 = vmatprep.subr.mxu1 %v3506_v7 }
 0x9d1   :  { %3431 = vmatpush3.msra.mxu0 %v2309_v34  ;;  %3432 = vmatprep.mubr.msk.f32.mxu0 %vm3507_vm1, %v3506_v7 }
 0x9d2   :  { %3464 = vmatpush3.msra.mxu1 %v2636_v35  ;;  %3465 = vmatprep.mubr.msk.f32.mxu1 %vm3507_vm1, %v3506_v7 }
 0x9d3   :  { %3433 = vmatmul.mubr.msk.f32.vlgmr.msra.gmra.mxu0 %vm91_vm0, %v4139_v20  ;;  %3446 = vmatprep.subr.mxu0 %v3506_v7 }
 0x9d4   :  { %3466 = vmatmul.mubr.msk.f32.vlgmr.msra.gmra.mxu1 %vm91_vm0, %v4139_v20  ;;  %3447 = vmatpush3.msra.mxu0 %v2635_v36 }
 0x9d5   :  { %3448 = vmatprep.subr.mxu0 %v3506_v7  ;;  %3454 = vmatprep.mubr.msk.f32.mxu0 %vm3507_vm1, %v3506_v7 }
 0x9d6   :  { %3449 = vmatpush3.msra.mxu0 %v2634_v37 }
 0x9d7   :  { %3450 = vmatprep.subr.mxu0 %v3506_v7 }
 0x9d8   :  { %3451 = vmatpush3.msra.mxu0 %v2633_v38 }
 0x9d9   :  { %3452 = vmatprep.subr.mxu0 %v3506_v7 }
 0x9da   :  { %3453 = vmatpush3.msra.mxu0 %v2632_v39 }
 0x9db   :  { %3455 = vmatmul.mubr.msk.f32.vlgmr.msra.gmra.mxu0 %vm91_vm0, %v4139_v20  ;;  %3468 = vmatprep.subr.mxu0 %v3506_v7 }
 0x9dc   :  { %3469 = vmatpush3.msra.mxu0 %v2643_v40  ;;  %3476 = vmatprep.mubr.msk.f32.mxu0 %vm3507_vm1, %v3506_v7 }
 0x9dd   :  { %3470 = vmatprep.subr.mxu0 %v3506_v7 }
 0x9de   :  { %3471 = vmatpush3.msra.mxu0 %v2642_v41 }
 0x9df   :  { %3472 = vmatprep.subr.mxu0 %v3506_v7 }
 0x9e0   :  { %3473 = vmatpush3.msra.mxu0 %v2641_v42 }
 0x9e1   :  { %3474 = vmatprep.subr.mxu0 %v3506_v7  ;;  %v3016_v7 = vld [vmem:[%s4341_s21 + $0x1] ss:$0 sm:$0xff] }
 0x9e2   :  { %3475 = vmatpush3.msra.mxu0 %v2640_v43 }
 0x9e3   :  { %3477 = vmatmul.mubr.msk.f32.vlgmr.msra.gmra.mxu0 %vm91_vm0, %v4139_v20 }
 0xa80   :  { %v2410_v46 = vpop.f32.mrf.mxu0  ;;  %v2550_v49 = vpop.f32.mrf.mxu1 }
 0xa81   :  { %v2411_v47 = vadd.f32 %v3015_v44, %v2410_v46  ;;  %v2551_v48 = vadd.f32 %v3017_v45, %v2550_v49 }
 0xa82   :  { %v3401_v50 = vpop.f32.mrf.mxu0  ;;  %v3423_v51 = vpop.f32.mrf.mxu1 }
 0xa83   :  { %2624 = vst.msk [vmem:[%s4342_s24] sm:$0xff] %vm1100_vm2, %v2411_v47  ;;  %2626 = vst.msk [vmem:[%s4342_s24 + $0x10] sm:$0xff] %vm1100_vm2, %v2551_v48 }
 0xa89   :  { %v2480_v53 = vpop.f32.mrf.mxu0 }
 0xa8a   :  { %v2481_v54 = vadd.f32 %v3016_v7, %v2480_v53  ;;  %v2738_v55 = vpop.f32.mrf.mxu1 }
 0xa8b   :  { %v2739_v56 = vadd.f32 %v3023_v52, %v2738_v55  ;;  %v3412_v57 = vpop.f32.mrf.mxu0 }
 0xa8c   :  { %2625 = vst.msk [vmem:[%s4342_s24 + $0x8] sm:$0xff] %vm1100_vm2, %v2481_v54  ;;  %v3445_v58 = vpop.f32.mrf.mxu1 }
 0xa8d   :  { %2952 = vst.msk [vmem:[%s4344_s25] sm:$0xff] %vm1100_vm2, %v2739_v56 }
 0xa93   :  { %v2620_v61 = vpop.f32.mrf.mxu0 }
 0xa94   :  { %v2621_v62 = vadd.f32 %v3018_v59, %v2620_v61  ;;  %v2878_v63 = vpop.f32.mrf.mxu1 }
 0xa95   :  { %v2879_v1 = vadd.f32 %v3025_v60, %v2878_v63  ;;  %v3434_v2 = vpop.f32.mrf.mxu0 }
 0xa96   :  { %2627 = vst.msk [vmem:[%s4342_s24 + $0x18] sm:$0xff] %vm1100_vm2, %v2621_v62  ;;  %v3467_v3 = vpop.f32.mrf.mxu1 }
 0xa97   :  { %2954 = vst.msk [vmem:[%s4344_s25 + $0x10] sm:$0xff] %vm1100_vm2, %v2879_v1 }
 0xa9b   :  { %v2808_v5 = vpop.f32.mrf.mxu0 }
 0xa9c   :  { %v2809_v6 = vadd.f32 %v3024_v4, %v2808_v5 }
 0xa9d   :  { %v3456_v8 = vpop.f32.mrf.mxu0 }
 0xa9e   :  { %2953 = vst.msk [vmem:[%s4344_s25 + $0x8] sm:$0xff] %vm1100_vm2, %v2809_v6 }
 0xaa3   :  { %v2948_v10 = vpop.f32.mrf.mxu0 }
 0xaa4   :  { %v2949_v11 = vadd.f32 %v3026_v9, %v2948_v10 }
 0xaa5   :  { %v3478_v12 = vpop.f32.mrf.mxu0 }
 0xaa6   :  { %2955 = vst.msk [vmem:[%s4344_s25 + $0x18] sm:$0xff] %vm1100_vm2, %v2949_v11 }

// kernel: generate.3
= control target key start
LH: loop header
LB: loop body
LE: loop exit
PB: predicated region body
PF: predicated region fallthrough
CT: control target
= control target key end

     0   :  { %s4711_s6 = smov 1   ;;  %s4712_s10 = smov 2   ;;  %s5475_s0 = inlined_call_operand.smem [shape: u32[30], index: -1, kind: input, shape index: {}] }
   0x1   :  { %s4753_s5 = sld [smem:[%s5475_s0]]   ;;  %s4713_s14 = smov 3  }
   0x2   :  { %s4758_s9 = sld [smem:[%s5475_s0 + %s4711_s6]]   ;;  %s4714_s18 = smov 4  }
   0x3   :  { %s4763_s13 = sld [smem:[%s5475_s0 + %s4712_s10]]   ;;  %s4715_s22 = smov 5  }
   0x4   :  { %s4768_s17 = sld [smem:[%s5475_s0 + %s4713_s14]]   ;;  %s4716_s26 = smov 6  }
   0x5   :  { %s4773_s21 = sld [smem:[%s5475_s0 + %s4714_s18]]   ;;  %s4717_s30 = smov 7  }
   0x6   :  { %s4778_s25 = sld [smem:[%s5475_s0 + %s4715_s22]]   ;;  %s4718_s4 = smov 8  }
   0x7   :  { %s4783_s29 = sld [smem:[%s5475_s0 + %s4716_s26]]   ;;  %s4719_s10 = smov 9  }
   0x8   :  { %s4788_s3 = sld [smem:[%s5475_s0 + %s4717_s30]]   ;;  %s4720_s15 = smov 10  }
   0x9   :  { %s4793_s8 = sld [smem:[%s5475_s0 + %s4718_s4]]   ;;  %s4721_s20 = smov 11  }
   0xa   :  { %s4798_s14 = sld [smem:[%s5475_s0 + %s4719_s10]]   ;;  %s4722_s26 = smov 12  }
   0xb   :  { %s4803_s19 = sld [smem:[%s5475_s0 + %s4720_s15]]   ;;  %s4723_s1 = smov 13  }
   0xc   :  { %s4808_s24 = sld [smem:[%s5475_s0 + %s4721_s20]]   ;;  %s4724_s7 = smov 14  }
   0xd   :  { %s4813_s30 = sld [smem:[%s5475_s0 + %s4722_s26]]   ;;  %s4725_s15 = smov 15  }
   0xe   :  { %s4818_s6 = sld [smem:[%s5475_s0 + %s4723_s1]]   ;;  %s4726_s22 = smov 16  }
   0xf   :  { %s4823_s12 = sld [smem:[%s5475_s0 + %s4724_s7]]   ;;  %s4727_s28 = smov 17  }
  0x10   :  { %s4828_s20 = sld [smem:[%s5475_s0 + %s4725_s15]]   ;;  %s4728_s7 = smov 18  }
  0x11   :  { %s4833_s27 = sld [smem:[%s5475_s0 + %s4726_s22]]   ;;  %s4729_s15 = smov 19  }
  0x12   :  { %s4838_s4 = sld [smem:[%s5475_s0 + %s4727_s28]]   ;;  %s4730_s22 = smov 20  }
  0x13   :  { %s4731_s28 = smov 21  }
  0x15   :  { %5481 = sst [smem:[#allocation5_spill]] %s4823_s12 }
  0x16   :  { %5482 = sst [smem:[#allocation6_spill]] %s4828_s20 }
  0x17   :  { %5483 = sst [smem:[#allocation7_spill]] %s4833_s27 }
  0x18   :  { %5484 = sst [smem:[#allocation8_spill]] %s4838_s4 }
  0x19   :  { %s4843_s12 = sld [smem:[%s5475_s0 + %s4728_s7]]   ;;  %s4732_s7 = smov 22  }
  0x1a   :  { %s4848_s20 = sld [smem:[%s5475_s0 + %s4729_s15]]   ;;  %s4733_s15 = smov 23  }
  0x1b   :  { %s4853_s27 = sld [smem:[%s5475_s0 + %s4730_s22]]   ;;  %s4734_s22 = smov 24  }
  0x1c   :  { %s4858_s4 = sld [smem:[%s5475_s0 + %s4731_s28]]   ;;  %s4735_s28 = smov 25  }
  0x1f   :  { %5485 = sst [smem:[#allocation9_spill]] %s4843_s12 }
  0x20   :  { %5486 = sst [smem:[#allocation10_spill]] %s4848_s20 }
  0x21   :  { %5487 = sst [smem:[#allocation11_spill]] %s4853_s27 }
  0x22   :  { %5488 = sst [smem:[#allocation12_spill]] %s4858_s4 }
  0x23   :  { %s4863_s12 = sld [smem:[%s5475_s0 + %s4732_s7]]   ;;  %s4736_s7 = smov 26  }
  0x24   :  { %s4868_s20 = sld [smem:[%s5475_s0 + %s4733_s15]]   ;;  %s4737_s15 = smov 27  }
  0x25   :  { %s4873_s27 = sld [smem:[%s5475_s0 + %s4734_s22]]   ;;  %s4738_s22 = smov 28  }
  0x26   :  { %s4878_s4 = sld [smem:[%s5475_s0 + %s4735_s28]]   ;;  %s4739_s28 = smov 29  }
  0x29   :  { %5489 = sst [smem:[#allocation13_spill]] %s4863_s12 }
  0x2a   :  { %5490 = sst [smem:[#allocation14_spill]] %s4868_s20 }
  0x2b   :  { %5491 = sst [smem:[#allocation15_spill]] %s4873_s27 }
  0x2c   :  { %5492 = sst [smem:[#allocation16_spill]] %s4878_s4 }
  0x2d   :  { %s4883_s12 = sld [smem:[%s5475_s0 + %s4736_s7]]  }
  0x2e   :  { %s4888_s20 = sld [smem:[%s5475_s0 + %s4737_s15]]  }
  0x2f   :  { %s4893_s27 = sld [smem:[%s5475_s0 + %s4738_s22]]  }
  0x30   :  { %s4898_s4 = sld [smem:[%s5475_s0 + %s4739_s28]]  }
  0x31   :  { %64 = vsyncpa [#allocation3], 0  ;;  %v4901_v0 = vld [vmem:[%s4753_s5] sm:$0xff]  ;;  %v4904_v1 = vld [vmem:[%s4753_s5 + $0x8] sm:$0xff]  ;;  %v131_v2 = vlaneseq  ;;  %v4740_v18 = vmov -1e+30  }
  0x32   :  { %v4907_v3 = vld [vmem:[%s4753_s5 + $0x10] sm:$0xff]  ;;  %v4910_v4 = vld [vmem:[%s4753_s5 + $0x18] sm:$0xff]  ;;  %v4913_v5 = vld [vmem:[%s4758_s9] sm:$0xff]  ;;  %v4741_v24 = vmov 0   ;;  %s4968_s0 = smov 1  }
  0x33   :  { %v4916_v6 = vld [vmem:[%s4758_s9 + $0x8] sm:$0xff]  ;;  %v4919_v7 = vld [vmem:[%s4758_s9 + $0x10] sm:$0xff]  ;;  %v4922_v8 = vld [vmem:[%s4758_s9 + $0x18] sm:$0xff]  ;;  %v4924_v9 = vshrl.u32 %v131_v2, 7  ;;  %v4926_v10 = vand.u32 127, %v131_v2 }
  0x34   :  { %v137_v11 = vld [vmem:[%s4763_s13] sm:$0x1]  ;;  %v4933_v13 = vld [vmem:[%s4773_s21 + $0x8] sm:$0xff]  ;;  %v4939_v15 = vld [vmem:[%s4773_s21 + $0x10] sm:$0xff] }
  0x35   :  { %v4930_v12 = vld [vmem:[%s4773_s21] sm:$0xff]  ;;  %vm135_vm0 = vcmp.ge.s32.totalorder %v4924_v9, %v4926_v10  ;;  %vm138_vm1 = vcmp.gt.f32.partialorder %v137_v11, 0.0  ;;  %v143_v14 = vsub.s32 0, %v4924_v9  ;;  %v4942_v16 = vld [vmem:[%s4773_s21 + $0x18] sm:$0xff]  ;;  %vm154_vm2 = vcmp.eq.s32.totalorder %v4926_v10, 0  ;;  %v4951_v21 = vld [vmem:[%s4773_s21 + $0x28] sm:$0xff] }
  0x36   :  { %v4945_v17 = vld [vmem:[%s4773_s21 + $0x20] sm:$0xff]  ;;  %v4948_v19 = vsel %vm135_vm0, 0.0, %v4740_v18  ;;  %v139_v20 = vsel %vm138_vm1, 0.0, %v4740_v18  ;;  %v4954_v22 = vld [vmem:[%s4773_s21 + $0x30] sm:$0xff]  ;;  %v4957_v23 = vld [vmem:[%s4773_s21 + $0x38] sm:$0xff]  ;;  %v155_v25 = vsel %vm154_vm2, 1, %v4741_v24  }
  0x37   :  { %v4961_v26 = vrot.slane %v139_v20, %v143_v14  ;;  %v156_v27 = vld [vmem:[%s4768_s17] sm:$0xff]  }
  0x38 LB: > { %vm167_vm3 = vcmask 261120   ;;  %v4742_v34 = vmov 0.0   ;;  %v199_v35 = vld [vmem:[%s4788_s3 + $0x18] sm:$0xff]  ;;  %v198_v37 = vld [vmem:[%s4788_s3 + $0x10] sm:$0xff]  ;;  %v197_v39 = vld [vmem:[%s4788_s3 + $0x8] sm:$0xff]  ;;  %vm4743_vm4 = vmmov 0   ;;  %s4709_s0 = sphi %s4968_s0, %s162_s0   ;;  %v4705_v27 = vphi %v156_v27, %v3895_v27   ;;  %v4701_v25 = vphi %v155_v25, %v5505_v25  }
  0x39   : > { %v168_v28 = vsel %vm167_vm3, %v4705_v27, 0.0  ;;  %4201 = vmatprep.subr.mxu0 %v4742_v34  ;;  %4212 = vmatprep.subr.mxu1 %v4742_v34  ;;  %v203_v36 = vld [vmem:[%s4788_s3 + $0x38] sm:$0xff]  ;;  %v202_v38 = vld [vmem:[%s4788_s3 + $0x30] sm:$0xff]  ;;  %v201_v40 = vld [vmem:[%s4788_s3 + $0x28] sm:$0xff]  ;;  %vm1176_vm5 = vcmask 64512   ;;  %s5493_s5 = sld [smem:[#allocation5_spill]] }
  0x3a   : > { %169 = vadd.xlane.f32.xlu0 %v168_v28  ;;  %4202 = vmatpush3.msra.mxu0 %v199_v35  ;;  %v196_v41 = vld [vmem:[%s4788_s3] sm:$0xff]  ;;  %v207_v52 = vld [vmem:[%s4788_s3 + $0x58] sm:$0xff]  ;;  %v206_v54 = vld [vmem:[%s4788_s3 + $0x50] sm:$0xff]  ;;  %s5494_s9 = sld [smem:[#allocation8_spill]]  ;;  %vm3585_vm6 = vcmask 523264   ;;  %s4028_s23 = sadd.s32 4294967295, %s4709_s0 }
  0x3b   : > { %4213 = vmatpush3.msra.mxu1 %v203_v36  ;;  %4203 = vmatprep.subr.mxu0 %v4742_v34  ;;  %v200_v42 = vld [vmem:[%s4788_s3 + $0x20] sm:$0xff]  ;;  %v211_v53 = vld [vmem:[%s4788_s3 + $0x78] sm:$0xff]  ;;  %v210_v55 = vld [vmem:[%s4788_s3 + $0x70] sm:$0xff]  ;;  %s5495_s13 = sld [smem:[#allocation6_spill]]  ;;  %vm3787_vm8 = vcmask 516096  }
  0x3c   : > { %4214 = vmatprep.subr.mxu1 %v4742_v34  ;;  %4204 = vmatpush3.msra.mxu0 %v198_v37  ;;  %v3952_v47 = vld [vmem:[%s4778_s25] ss:$0 sm:$0xff]  ;;  %v205_v56 = vld [vmem:[%s4788_s3 + $0x48] sm:$0xff]  ;;  %v526_v60 = vld [vmem:[%s4793_s8 + $0x18] sm:$0xff]  ;;  %s5496_s17 = sld [smem:[#allocation7_spill]] }
  0x3d   : > { %4215 = vmatpush3.msra.mxu1 %v202_v38  ;;  %4205 = vmatprep.subr.mxu0 %v4742_v34  ;;  %v3953_v49 = vld [vmem:[%s4783_s29] ss:$0 sm:$0xff]  ;;  %v209_v57 = vld [vmem:[%s4788_s3 + $0x68] sm:$0xff]  ;;  %v530_v61 = vld [vmem:[%s4793_s8 + $0x38] sm:$0xff]  ;;  %s5497_s21 = sld [smem:[#allocation9_spill]] }
  0x3e   : > { %4216 = vmatprep.subr.mxu1 %v4742_v34  ;;  %4206 = vmatpush3.msra.mxu0 %v197_v39  ;;  %v204_v58 = vld [vmem:[%s4788_s3 + $0x40] sm:$0xff]  ;;  %v525_v62 = vld [vmem:[%s4793_s8 + $0x10] sm:$0xff]  ;;  %v524_v2 = vld [vmem:[%s4793_s8 + $0x8] sm:$0xff]  ;;  %s5498_s7 = sld [smem:[#allocation10_spill]] }
  0x3f   : > { %4217 = vmatpush3.msra.mxu1 %v201_v40  ;;  %4207 = vmatprep.subr.mxu0 %v4742_v34  ;;  %v208_v59 = vld [vmem:[%s4788_s3 + $0x60] sm:$0xff]  ;;  %v529_v63 = vld [vmem:[%s4793_s8 + $0x30] sm:$0xff]  ;;  %v528_v11 = vld [vmem:[%s4793_s8 + $0x28] sm:$0xff]  ;;  %s5499_s10 = sld [smem:[#allocation11_spill]] }
  0x40   : > { %4218 = vmatprep.subr.mxu1 %v4742_v34  ;;  %4208 = vmatpush3.msra.mxu0 %v196_v41  ;;  %v523_v18 = vld [vmem:[%s4793_s8] sm:$0xff]  ;;  %v534_v24 = vld [vmem:[%s4793_s8 + $0x58] sm:$0xff]  ;;  %v849_v38 = vld [vmem:[%s4798_s14 + $0x10] sm:$0xff]  ;;  %s5500_s11 = sld [smem:[#allocation14_spill]] }
  0x41   : > { %4219 = vmatpush3.msra.mxu1 %v200_v42  ;;  %4209 = vmatprep.mubr.msk.f32.mxu0 %vm4743_vm4, %v4742_v34  ;;  %v527_v20 = vld [vmem:[%s4793_s8 + $0x20] sm:$0xff]  ;;  %v538_v28 = vld [vmem:[%s4793_s8 + $0x78] sm:$0xff]  ;;  %v853_v39 = vld [vmem:[%s4798_s14 + $0x30] sm:$0xff]  ;;  %s5501_s15 = sld [smem:[#allocation12_spill]] }
  0x42   : > { %4220 = vmatprep.mubr.msk.f32.mxu1 %vm4743_vm4, %v4742_v34  ;;  %4223 = vmatprep.subr.mxu0 %v4742_v34  ;;  %v535_v35 = vld [vmem:[%s4793_s8 + $0x60] sm:$0xff]  ;;  %v850_v36 = vld [vmem:[%s4798_s14 + $0x18] sm:$0xff]  ;;  %v848_v40 = vld [vmem:[%s4798_s14 + $0x8] sm:$0xff]  ;;  %s5502_s16 = sld [smem:[#allocation13_spill]] }
  0x43   : > { %4234 = vmatprep.subr.mxu1 %v4742_v34  ;;  %v854_v37 = vld [vmem:[%s4798_s14 + $0x38] sm:$0xff]  ;;  %v852_v41 = vld [vmem:[%s4798_s14 + $0x28] sm:$0xff]  ;;  %v847_v42 = vld [vmem:[%s4798_s14] sm:$0xff]  ;;  %s5503_s18 = sld [smem:[#allocation16_spill]] }
  0x44   : > { %s5504_s22 = sld [smem:[#allocation15_spill]] }
  0xc3   : > { %v170_v29 = vpop.xlane.xlu0 %169 }
  0xc4   : > { %v172_v30 = vmul.f32 0.03125, %v170_v29  ;;  %v533_v29 = vld [vmem:[%s4793_s8 + $0x50] sm:$0xff] }
  0xc6   : > { %v173_v31 = vsub.f32 %v4705_v27, %v172_v30  ;;  %v537_v30 = vld [vmem:[%s4793_s8 + $0x70] sm:$0xff] }
  0xc8   : > { %v174_v32 = vmul.f32 %v173_v31, %v173_v31 }
  0xca   : > { %v175_v33 = vsel %vm167_vm3, %v174_v32, 0.0  ;;  %v536_v32 = vld [vmem:[%s4793_s8 + $0x68] sm:$0xff] }
  0xcb   : > { %176 = vadd.xlane.f32.xlu0 %v175_v33  ;;  %v531_v33 = vld [vmem:[%s4793_s8 + $0x40] sm:$0xff] }
 0x154   : > { %v177_v43 = vpop.xlane.xlu0 %176 }
 0x155   : > { %v178_v44 = vmul.f32 0.03125, %v177_v43  ;;  %v851_v43 = vld [vmem:[%s4798_s14 + $0x20] sm:$0xff] }
 0x157   : > { %v179_v45 = vadd.f32 1e-05, %v178_v44  ;;  %v858_v44 = vld [vmem:[%s4798_s14 + $0x58] sm:$0xff] }
 0x159   : > { %4623 = vrsqrt.f32 %v179_v45  ;;  %v862_v45 = vld [vmem:[%s4798_s14 + $0x78] sm:$0xff] }
 0x166   : > { %v4624_v46 = vpop.eup %4623 }
 0x167   : > { %v181_v48 = vmul.f32 %v4624_v46, %v173_v31  ;;  %v532_v31 = vld [vmem:[%s4793_s8 + $0x48] sm:$0xff]  ;;  %v857_v46 = vld [vmem:[%s4798_s14 + $0x50] sm:$0xff] }
 0x169   : > { %v188_v50 = vmul.f32 %v3952_v47, %v181_v48  ;;  %v861_v47 = vld [vmem:[%s4798_s14 + $0x70] sm:$0xff]  ;;  %v856_v48 = vld [vmem:[%s4798_s14 + $0x48] sm:$0xff] }
 0x16b   : > { %v5007_v51 = vadd.f32 %v3953_v49, %v188_v50  ;;  %v860_v49 = vld [vmem:[%s4798_s14 + $0x68] sm:$0xff]  ;;  %v855_v50 = vld [vmem:[%s4798_s14 + $0x40] sm:$0xff] }
 0x16d   : > { %4210 = vmatmul.mubr.msk.f32.vlgmr.msra.gmra.mxu0 %vm167_vm3, %v5007_v51  ;;  %4221 = vmatmul.mubr.msk.f32.vlgmr.msra.gmra.mxu1 %vm167_vm3, %v5007_v51 }
 0x16e   : > { %4224 = vmatpush3.msra.mxu0 %v207_v52  ;;  %4235 = vmatpush3.msra.mxu1 %v211_v53  ;;  %v859_v52 = vld [vmem:[%s4798_s14 + $0x60] sm:$0xff] }
 0x16f   : > { %4225 = vmatprep.subr.mxu0 %v4742_v34  ;;  %4236 = vmatprep.subr.mxu1 %v4742_v34 }
 0x170   : > { %4226 = vmatpush3.msra.mxu0 %v206_v54  ;;  %4237 = vmatpush3.msra.mxu1 %v210_v55 }
 0x171   : > { %4227 = vmatprep.subr.mxu0 %v4742_v34  ;;  %4238 = vmatprep.subr.mxu1 %v4742_v34 }
 0x172   : > { %4228 = vmatpush3.msra.mxu0 %v205_v56  ;;  %4239 = vmatpush3.msra.mxu1 %v209_v57 }
 0x173   : > { %4229 = vmatprep.subr.mxu0 %v4742_v34  ;;  %4240 = vmatprep.subr.mxu1 %v4742_v34 }
 0x174   : > { %4230 = vmatpush3.msra.mxu0 %v204_v58  ;;  %4231 = vmatprep.mubr.msk.f32.mxu0 %vm4743_vm4, %v4742_v34 }
 0x175   : > { %4241 = vmatpush3.msra.mxu1 %v208_v59  ;;  %4242 = vmatprep.mubr.msk.f32.mxu1 %vm4743_vm4, %v4742_v34 }
 0x176   : > { %4232 = vmatmul.mubr.msk.f32.vlgmr.msra.gmra.mxu0 %vm167_vm3, %v5007_v51  ;;  %4243 = vmatmul.mubr.msk.f32.vlgmr.msra.gmra.mxu1 %vm167_vm3, %v5007_v51 }
 0x177   : > { %4245 = vmatprep.subr.mxu0 %v4742_v34  ;;  %4256 = vmatprep.subr.mxu1 %v4742_v34 }
 0x178   : > { %4246 = vmatpush3.msra.mxu0 %v526_v60  ;;  %4257 = vmatpush3.msra.mxu1 %v530_v61  ;;  %v3962_v60 = vld [vmem:[%s4808_s24] ss:$0 sm:$0xff] }
 0x179   : > { %4247 = vmatprep.subr.mxu0 %v4742_v34  ;;  %4258 = vmatprep.subr.mxu1 %v4742_v34 }
 0x17a   : > { %4248 = vmatpush3.msra.mxu0 %v525_v62  ;;  %4259 = vmatpush3.msra.mxu1 %v529_v63  ;;  %v3954_v63 = vld [vmem:[%s4803_s19] ss:$0 sm:$0xff] }
 0x17b   : > { %4249 = vmatprep.subr.mxu0 %v4742_v34  ;;  %4260 = vmatprep.subr.mxu1 %v4742_v34 }
 0x17c   : > { %4250 = vmatpush3.msra.mxu0 %v524_v2  ;;  %4261 = vmatpush3.msra.mxu1 %v528_v11  ;;  %v3963_v11 = vld [vmem:[%s4808_s24 + $0x1] ss:$0 sm:$0xff] }
 0x17d   : > { %4251 = vmatprep.subr.mxu0 %v4742_v34  ;;  %4262 = vmatprep.subr.mxu1 %v4742_v34 }
 0x17e   : > { %4252 = vmatpush3.msra.mxu0 %v523_v18  ;;  %4253 = vmatprep.mubr.msk.f32.mxu0 %vm4743_vm4, %v4742_v34 }
 0x17f   : > { %4263 = vmatpush3.msra.mxu1 %v527_v20  ;;  %4264 = vmatprep.mubr.msk.f32.mxu1 %vm4743_vm4, %v4742_v34 }
 0x180   : > { %4254 = vmatmul.mubr.msk.f32.vlgmr.msra.gmra.mxu0 %vm167_vm3, %v5007_v51  ;;  %4265 = vmatmul.mubr.msk.f32.vlgmr.msra.gmra.mxu1 %vm167_vm3, %v5007_v51 }
 0x181   : > { %4267 = vmatprep.subr.mxu0 %v4742_v34  ;;  %4278 = vmatprep.subr.mxu1 %v4742_v34 }
 0x182   : > { %4268 = vmatpush3.msra.mxu0 %v534_v24  ;;  %4279 = vmatpush3.msra.mxu1 %v538_v28  ;;  %v3955_v28 = vld [vmem:[%s4803_s19 + $0x1] ss:$0 sm:$0xff] }
 0x183   : > { %4269 = vmatprep.subr.mxu0 %v4742_v34  ;;  %4280 = vmatprep.subr.mxu1 %v4742_v34 }
 0x184   : > { %4270 = vmatpush3.msra.mxu0 %v533_v29  ;;  %4281 = vmatpush3.msra.mxu1 %v537_v30 }
 0x185   : > { %4271 = vmatprep.subr.mxu0 %v4742_v34  ;;  %4282 = vmatprep.subr.mxu1 %v4742_v34 }
 0x186   : > { %4272 = vmatpush3.msra.mxu0 %v532_v31  ;;  %4283 = vmatpush3.msra.mxu1 %v536_v32  ;;  %v3964_v31 = vld [vmem:[%s4808_s24 + $0x2] ss:$0 sm:$0xff]  ;;  %v3965_v32 = vld [vmem:[%s4808_s24 + $0x3] ss:$0 sm:$0xff] }
 0x187   : > { %4273 = vmatprep.subr.mxu0 %v4742_v34  ;;  %4284 = vmatprep.subr.mxu1 %v4742_v34 }
 0x188   : > { %4274 = vmatpush3.msra.mxu0 %v531_v33  ;;  %4275 = vmatprep.mubr.msk.f32.mxu0 %vm4743_vm4, %v4742_v34 }
 0x189   : > { %4285 = vmatpush3.msra.mxu1 %v535_v35  ;;  %4286 = vmatprep.mubr.msk.f32.mxu1 %vm4743_vm4, %v4742_v34 }
 0x18a   : > { %4276 = vmatmul.mubr.msk.f32.vlgmr.msra.gmra.mxu0 %vm167_vm3, %v5007_v51  ;;  %4287 = vmatmul.mubr.msk.f32.vlgmr.msra.gmra.mxu1 %vm167_vm3, %v5007_v51 }
 0x18b   : > { %4289 = vmatprep.subr.mxu0 %v4742_v34  ;;  %4300 = vmatprep.subr.mxu1 %v4742_v34 }
 0x18c   : > { %4290 = vmatpush3.msra.mxu0 %v850_v36  ;;  %4301 = vmatpush3.msra.mxu1 %v854_v37  ;;  %v3956_v36 = vld [vmem:[%s4803_s19 + $0x2] ss:$0 sm:$0xff]  ;;  %v3957_v37 = vld [vmem:[%s4803_s19 + $0x3] ss:$0 sm:$0xff] }
 0x18d   : > { %4291 = vmatprep.subr.mxu0 %v4742_v34  ;;  %4302 = vmatprep.subr.mxu1 %v4742_v34 }
 0x18e   : > { %4292 = vmatpush3.msra.mxu0 %v849_v38  ;;  %4303 = vmatpush3.msra.mxu1 %v853_v39 }
 0x18f   : > { %4293 = vmatprep.subr.mxu0 %v4742_v34  ;;  %4304 = vmatprep.subr.mxu1 %v4742_v34 }
 0x190   : > { %4294 = vmatpush3.msra.mxu0 %v848_v40  ;;  %4305 = vmatpush3.msra.mxu1 %v852_v41 }
 0x191   : > { %4295 = vmatprep.subr.mxu0 %v4742_v34  ;;  %4306 = vmatprep.subr.mxu1 %v4742_v34 }
 0x192   : > { %4296 = vmatpush3.msra.mxu0 %v847_v42  ;;  %4297 = vmatprep.mubr.msk.f32.mxu0 %vm4743_vm4, %v4742_v34 }
 0x193   : > { %4307 = vmatpush3.msra.mxu1 %v851_v43  ;;  %4308 = vmatprep.mubr.msk.f32.mxu1 %vm4743_vm4, %v4742_v34 }
 0x194   : > { %4298 = vmatmul.mubr.msk.f32.vlgmr.msra.gmra.mxu0 %vm167_vm3, %v5007_v51  ;;  %4309 = vmatmul.mubr.msk.f32.vlgmr.msra.gmra.mxu1 %vm167_vm3, %v5007_v51 }
 0x195   : > { %4311 = vmatprep.subr.mxu0 %v4742_v34  ;;  %4322 = vmatprep.subr.mxu1 %v4742_v34 }
 0x196   : > { %4312 = vmatpush3.msra.mxu0 %v858_v44  ;;  %4323 = vmatpush3.msra.mxu1 %v862_v45  ;;  %v3970_v44 = vld [vmem:[%s4813_s30] ss:$0 sm:$0xff]  ;;  %v3971_v45 = vld [vmem:[%s4813_s30 + $0x1] ss:$0 sm:$0xff] }
 0x197   : > { %4313 = vmatprep.subr.mxu0 %v4742_v34  ;;  %4324 = vmatprep.subr.mxu1 %v4742_v34 }
 0x198   : > { %4314 = vmatpush3.msra.mxu0 %v857_v46  ;;  %4325 = vmatpush3.msra.mxu1 %v861_v47 }
 0x199   : > { %4315 = vmatprep.subr.mxu0 %v4742_v34  ;;  %4326 = vmatprep.subr.mxu1 %v4742_v34 }
 0x19a   : > { %4316 = vmatpush3.msra.mxu0 %v856_v48  ;;  %4327 = vmatpush3.msra.mxu1 %v860_v49 }
 0x19b   : > { %4317 = vmatprep.subr.mxu0 %v4742_v34  ;;  %4328 = vmatprep.subr.mxu1 %v4742_v34 }
 0x19c   : > { %4318 = vmatpush3.msra.mxu0 %v855_v50  ;;  %4319 = vmatprep.mubr.msk.f32.mxu0 %vm4743_vm4, %v4742_v34 }
 0x19d   : > { %4329 = vmatpush3.msra.mxu1 %v859_v52  ;;  %4330 = vmatprep.mubr.msk.f32.mxu1 %vm4743_vm4, %v4742_v34 }
 0x19e   : > { %4320 = vmatmul.mubr.msk.f32.vlgmr.msra.gmra.mxu0 %vm167_vm3, %v5007_v51  ;;  %4331 = vmatmul.mubr.msk.f32.vlgmr.msra.gmra.mxu1 %vm167_vm3, %v5007_v51 }
 0x19f   : > { %4333 = vmatprep.subr.mxu1 %v4742_v34  ;;  %4335 = vmatprep.mubr.msk.f32.mxu1 %vm4743_vm4, %v4742_v34 }
 0x1a0   : > { %4343 = vmatprep.subr.mxu0 %v4742_v34  ;;  %4345 = vmatprep.mubr.msk.f32.mxu0 %vm4743_vm4, %v4742_v34 }
 0x22d   : > { %v309_v53 = vpop.f32.mrf.mxu0  ;;  %v379_v54 = vpop.f32.mrf.mxu1 }
 0x22e   : > { %v310_v24 = vadd.f32 %v3954_v63, %v309_v53  ;;  %v380_v30 = vadd.f32 %v3955_v28, %v379_v54 }
 0x22f   : > { %v4211_v55 = vpop.f32.mrf.mxu0  ;;  %v4222_v56 = vpop.f32.mrf.mxu1 }
 0x236   : > { %v449_v57 = vpop.f32.mrf.mxu0  ;;  %v519_v58 = vpop.f32.mrf.mxu1 }
 0x237   : > { %v450_v42 = vadd.f32 %v3956_v36, %v449_v57  ;;  %v520_v43 = vadd.f32 %v3957_v37, %v519_v58 }
 0x238   : > { %v4233_v51 = vpop.f32.mrf.mxu0  ;;  %v4244_v59 = vpop.f32.mrf.mxu1 }
 0x240   : > { %v633_v61 = vpop.f32.mrf.mxu0  ;;  %v703_v62 = vpop.f32.mrf.mxu1 }
 0x241   : > { %v634_v2 = vadd.f32 %v3962_v60, %v633_v61  ;;  %v704_v29 = vadd.f32 %v3963_v11, %v703_v62 }
 0x242   : > { %v4255_v18 = vpop.f32.mrf.mxu0  ;;  %v4266_v20 = vpop.f32.mrf.mxu1 }
 0x243   : > { %4334 = vmatpush3.xpose.msk.msra.mxu1 %vm1176_vm5, %v634_v2 }
 0x244   : > { %4338 = vmatprep.subr.mxu1 %v4742_v34 }
 0x246   : > { %4336 = vmatmul.mubr.msk.f32.vlgmr.msra.gmra.mxu1 %vm1176_vm5, %v310_v24 }
 0x247   : > { %4339 = vmatpush3.xpose.msk.msra.mxu1 %vm1176_vm5, %v704_v29  ;;  %4340 = vmatprep.mubr.msk.f32.mxu1 %vm4743_vm4, %v4742_v34 }
 0x248   : > { %4348 = vmatprep.subr.mxu1 %v4742_v34 }
 0x24a   : > { %v773_v33 = vpop.f32.mrf.mxu0  ;;  %v843_v35 = vpop.f32.mrf.mxu1  ;;  %4341 = vmatmul.mubr.msk.f32.vlgmr.msra.gmra.mxu1 %vm1176_vm5, %v380_v30 }
 0x24b   : > { %v774_v38 = vadd.f32 %v3964_v31, %v773_v33  ;;  %v844_v39 = vadd.f32 %v3965_v32, %v843_v35  ;;  %4350 = vmatprep.mubr.msk.f32.mxu1 %vm4743_vm4, %v4742_v34 }
 0x24c   : > { %v4277_v40 = vpop.f32.mrf.mxu0  ;;  %v4288_v41 = vpop.f32.mrf.mxu1 }
 0x24d   : > { %4344 = vmatpush3.xpose.msk.msra.mxu0 %vm1176_vm5, %v774_v38  ;;  %4349 = vmatpush3.xpose.msk.msra.mxu1 %vm1176_vm5, %v844_v39 }
 0x24e   : > { %4353 = vmatprep.subr.mxu0 %v4742_v34  ;;  %4358 = vmatprep.subr.mxu1 %v4742_v34 }
 0x250   : > { %4346 = vmatmul.mubr.msk.f32.vlgmr.msra.gmra.mxu0 %vm1176_vm5, %v450_v42  ;;  %4351 = vmatmul.mubr.msk.f32.vlgmr.msra.gmra.mxu1 %vm1176_vm5, %v520_v43 }
 0x251   : > { %4355 = vmatprep.mubr.msk.f32.mxu0 %vm4743_vm4, %v4742_v34  ;;  %4360 = vmatprep.mubr.msk.f32.mxu1 %vm4743_vm4, %v4742_v34 }
 0x254   : > { %v957_v46 = vpop.f32.mrf.mxu0  ;;  %v1027_v47 = vpop.f32.mrf.mxu1 }
 0x255   : > { %v958_v48 = vadd.f32 %v3970_v44, %v957_v46  ;;  %v1028_v49 = vadd.f32 %v3971_v45, %v1027_v47 }
 0x256   : > { %v4299_v50 = vpop.f32.mrf.mxu0  ;;  %v4310_v52 = vpop.f32.mrf.mxu1 }
 0x257   : > { %4354 = vmatpush3.msra.mxu0 %v958_v48  ;;  %4359 = vmatpush3.msra.mxu1 %v1028_v49 }
 0x258   : > { %4363 = vmatprep.subr.mxu0 %v4742_v34  ;;  %4368 = vmatprep.subr.mxu1 %v4742_v34 }
 0x25e   : > { %v5169_v53 = vpop.f32.mrf.mxu0  ;;  %v5171_v54 = vpop.f32.mrf.mxu1 }
 0x260   : > { %v4321_v55 = vpop.f32.mrf.mxu0  ;;  %v4332_v56 = vpop.f32.mrf.mxu1 }
 0x306   : > { %v1249_v57 = vpop.f32.mrf.mxu1 }
 0x307   : > { %v1481_v58 = vmul.f32 0.35355338, %v1249_v57 }
 0x308   : > { %v4337_v51 = vpop.f32.mrf.mxu1 }
 0x309   : > { %v1485_v59 = vadd.f32 %v1481_v58, %v4948_v19 }
 0x30a   : > { %v1325_v60 = vpop.f32.mrf.mxu1 }
 0x30b   : > { %v1482_v61 = vmul.f32 0.35355338, %v1325_v60  ;;  %v1489_v62 = vsel %vm1176_vm5, %v1485_v59, -inf }
 0x30c   : > { %1490 = vmax.xlane.f32.xlu1 %v1489_v62  ;;  %v4342_v63 = vpop.f32.mrf.mxu1  ;;  %v3972_v62 = vld [vmem:[%s4813_s30 + $0x2] ss:$0 sm:$0xff] }
 0x30d   : > { %v1486_v2 = vadd.f32 %v1482_v61, %v4948_v19 }
 0x30f   : > { %v1492_v11 = vsel %vm1176_vm5, %v1486_v2, -inf }
 0x310   : > { %v1401_v18 = vpop.f32.mrf.mxu0  ;;  %v1477_v20 = vpop.f32.mrf.mxu1  ;;  %1493 = vmax.xlane.f32.xlu1 %v1492_v11  ;;  %v1098_v11 = vadd.f32 %v3972_v62, %v5169_v53 }
 0x311   : > { %v1483_v24 = vmul.f32 0.35355338, %v1401_v18  ;;  %v1484_v28 = vmul.f32 0.35355338, %v1477_v20  ;;  %v3973_v18 = vld [vmem:[%s4813_s30 + $0x3] ss:$0 sm:$0xff] }
 0x312   : > { %v4347_v29 = vpop.f32.mrf.mxu0  ;;  %v4352_v30 = vpop.f32.mrf.mxu1 }
 0x313   : > { %v1487_v31 = vadd.f32 %v1483_v24, %v4948_v19  ;;  %v1488_v32 = vadd.f32 %v1484_v28, %v4948_v19  ;;  %v1168_v28 = vadd.f32 %v3973_v18, %v5171_v54  ;;  %v1171_v54 = vld [vmem:[%s4818_s6] sm:$0xff] }
 0x315   : > { %v1498_v33 = vsel %vm1176_vm5, %v1488_v32, -inf  ;;  %v1495_v35 = vsel %vm1176_vm5, %v1487_v31, -inf }
 0x316   : > { %1499 = vmax.xlane.f32.xlu1 %v1498_v33  ;;  %1496 = vmax.xlane.f32.xlu0 %v1495_v35  ;;  %v1173_v33 = vld [vmem:[%s4818_s6 + $0x10] sm:$0xff] }
 0x395   : > { %v1491_v36 = vpop.xlane.xlu1 %1490 }
 0x396   : > { %v1501_v37 = vsub.f32 %v1485_v59, %v1491_v36 }
 0x398   : > { %v1505_v38 = vmul.f32 1.442695, %v1501_v37  ;;  %v1174_v37 = vld [vmem:[%s4818_s6 + $0x18] sm:$0xff] }
 0x399   : > { %v1494_v39 = vpop.xlane.xlu1 %1493 }
 0x39a   : > { %4625 = vpow2.f32 %v1505_v38  ;;  %v1502_v40 = vsub.f32 %v1486_v2, %v1494_v39 }
 0x39c   : > { %v1507_v41 = vmul.f32 1.442695, %v1502_v40 }
 0x39e   : > { %4627 = vpow2.f32 %v1507_v41 }
 0x39f   : > { %v1500_v42 = vpop.xlane.xlu1 %1499  ;;  %v1497_v43 = vpop.xlane.xlu0 %1496 }
 0x3a0   : > { %v1504_v44 = vsub.f32 %v1488_v32, %v1500_v42  ;;  %v1503_v45 = vsub.f32 %v1487_v31, %v1497_v43  ;;  %v1172_v32 = vld [vmem:[%s4818_s6 + $0x8] sm:$0xff] }
 0x3a2   : > { %v1511_v46 = vmul.f32 1.442695, %v1504_v44  ;;  %v1509_v47 = vmul.f32 1.442695, %v1503_v45 }
 0x3a4   : > { %4629 = vpow2.f32 %v1511_v46 }
 0x3a5   : > { %4631 = vpow2.f32 %v1509_v47 }
 0x3a7   : > { %v4626_v48 = vpop.eup %4625 }
 0x3a8   : > { %v1513_v49 = vsel %vm1176_vm5, %v4626_v48, 0.0 }
 0x3a9   : > { %1514 = vadd.xlane.f32.xlu0 %v1513_v49 }
 0x3ab   : > { %v4628_v50 = vpop.eup %4627 }
 0x3ac   : > { %v1516_v52 = vsel %vm1176_vm5, %v4628_v50, 0.0 }
 0x3ad   : > { %1517 = vadd.xlane.f32.xlu1 %v1516_v52 }
 0x3b1   : > { %v4630_v55 = vpop.eup %4629 }
 0x3b2   : > { %v4632_v56 = vpop.eup %4631  ;;  %v1522_v57 = vsel %vm1176_vm5, %v4630_v55, 0.0 }
 0x3b3   : > { %1523 = vadd.xlane.f32.xlu1 %v1522_v57  ;;  %v1519_v58 = vsel %vm1176_vm5, %v4632_v56, 0.0 }
 0x3b4   : > { %1520 = vadd.xlane.f32.xlu0 %v1519_v58 }
 0x432   : > { %v1515_v51 = vpop.xlane.xlu0 %1514 }
 0x433   : > { %4633 = vrcp.f32 %v1515_v51 }
 0x436   : > { %v1518_v59 = vpop.xlane.xlu1 %1517 }
 0x437   : > { %4635 = vrcp.f32 %v1518_v59  ;;  %v3994_v59 = vld [vmem:[%s5493_s5] ss:$0 sm:$0xff] }
 0x43c   : > { %v1524_v60 = vpop.xlane.xlu1 %1523 }
 0x43d   : > { %4637 = vrcp.f32 %v1524_v60  ;;  %v1521_v61 = vpop.xlane.xlu0 %1520 }
 0x43e   : > { %4639 = vrcp.f32 %v1521_v61 }
 0x440   : > { %v4634_v63 = vpop.eup %4633 }
 0x441   : > { %v1529_v2 = vmul.f32 %v4634_v63, %v4626_v48 }
 0x443   : > { %4356 = vmatmul.mubr.msk.f32.vlgmr.msra.gmra.mxu0 %vm1176_vm5, %v1529_v2 }
 0x444   : > { %v4636_v20 = vpop.eup %4635  ;;  %4364 = vmatpush3.msra.mxu0 %v1098_v11  ;;  %4365 = vmatprep.mubr.msk.f32.mxu0 %vm4743_vm4, %v4742_v34 }
 0x445   : > { %v1530_v24 = vmul.f32 %v4636_v20, %v4628_v50  ;;  %4373 = vmatprep.subr.mxu0 %v4742_v34 }
 0x447   : > { %4361 = vmatmul.mubr.msk.f32.vlgmr.msra.gmra.mxu1 %vm1176_vm5, %v1530_v24 }
 0x448   : > { %4369 = vmatpush3.msra.mxu1 %v1168_v28  ;;  %4370 = vmatprep.mubr.msk.f32.mxu1 %vm4743_vm4, %v4742_v34 }
 0x449   : > { %4378 = vmatprep.subr.mxu1 %v4742_v34 }
 0x44a   : > { %v4638_v53 = vpop.eup %4637 }
 0x44b   : > { %v4640_v29 = vpop.eup %4639  ;;  %v1532_v30 = vmul.f32 %v4638_v53, %v4630_v55  ;;  %v2164_v53 = vld [vmem:[%s5494_s9 + $0x18] sm:$0xff] }
 0x44c   : > { %v1531_v31 = vmul.f32 %v4640_v29, %v4632_v56  ;;  %v2168_v29 = vld [vmem:[%s5494_s9 + $0x38] sm:$0xff] }
 0x44d   : > { %4371 = vmatmul.mubr.msk.f32.vlgmr.msra.gmra.mxu1 %vm1176_vm5, %v1532_v30  ;;  %v2163_v30 = vld [vmem:[%s5494_s9 + $0x10] sm:$0xff] }
 0x44e   : > { %4366 = vmatmul.mubr.msk.f32.vlgmr.msra.gmra.mxu0 %vm1176_vm5, %v1531_v31  ;;  %4380 = vmatprep.mubr.msk.f32.mxu1 %vm4743_vm4, %v4742_v34  ;;  %v2167_v31 = vld [vmem:[%s5494_s9 + $0x30] sm:$0xff] }
 0x44f   : > { %4375 = vmatprep.mubr.msk.f32.mxu0 %vm4743_vm4, %v4742_v34  ;;  %4374 = vmatpush3.msra.mxu0 %v1171_v54  ;;  %v2162_v54 = vld [vmem:[%s5494_s9 + $0x8] sm:$0xff] }
 0x450   : > { %4383 = vmatprep.subr.mxu0 %v4742_v34  ;;  %4379 = vmatpush3.msra.mxu1 %v1172_v32  ;;  %v2166_v32 = vld [vmem:[%s5494_s9 + $0x28] sm:$0xff] }
 0x451   : > { %4388 = vmatprep.subr.mxu1 %v4742_v34 }
 0x503   : > { %v1602_v35 = vpop.f32.mrf.mxu0 }
 0x504   : > { %4376 = vmatmul.mubr.msk.f32.vlgmr.msra.gmra.mxu0 %vm1176_vm5, %v1602_v35  ;;  %v2165_v35 = vld [vmem:[%s5494_s9 + $0x20] sm:$0xff] }
 0x505   : > { %v4357_v36 = vpop.f32.mrf.mxu0  ;;  %4384 = vmatpush3.msra.mxu0 %v1173_v33  ;;  %4385 = vmatprep.mubr.msk.f32.mxu0 %vm4743_vm4, %v4742_v34  ;;  %v2161_v33 = vld [vmem:[%s5494_s9] sm:$0xff] }
 0x506   : > { %4393 = vmatprep.subr.mxu0 %v4742_v34 }
 0x507   : > { %v1675_v38 = vpop.f32.mrf.mxu1 }
 0x508   : > { %4381 = vmatmul.mubr.msk.f32.vlgmr.msra.gmra.mxu1 %vm1176_vm5, %v1675_v38 }
 0x509   : > { %v4362_v39 = vpop.f32.mrf.mxu1  ;;  %4389 = vmatpush3.msra.mxu1 %v1174_v37  ;;  %4390 = vmatprep.mubr.msk.f32.mxu1 %vm4743_vm4, %v4742_v34 }
 0x50a   : > { %4404 = vmatprep.subr.mxu1 %v4742_v34 }
 0x50d   : > { %v1821_v40 = vpop.f32.mrf.mxu1 }
 0x50e   : > { %v1748_v41 = vpop.f32.mrf.mxu0  ;;  %4391 = vmatmul.mubr.msk.f32.vlgmr.msra.gmra.mxu1 %vm1176_vm5, %v1821_v40  ;;  %v3995_v40 = vld [vmem:[%s5495_s13] ss:$0 sm:$0xff] }
 0x50f   : > { %4386 = vmatmul.mubr.msk.f32.vlgmr.msra.gmra.mxu0 %vm1176_vm5, %v1748_v41  ;;  %v4372_v42 = vpop.f32.mrf.mxu1  ;;  %4412 = vmatprep.mubr.msk.f32.mxu1 %vm4743_vm4, %v4742_v34 }
 0x510   : > { %v4367_v43 = vpop.f32.mrf.mxu0  ;;  %4401 = vmatprep.mubr.msk.f32.mxu0 %vm4743_vm4, %v4742_v34  ;;  %4394 = vmatpush3.msra.mxu0 %v2164_v53  ;;  %v3996_v42 = vld [vmem:[%s5496_s17] ss:$0 sm:$0xff] }
 0x511   : > { %4405 = vmatpush3.msra.mxu1 %v2168_v29  ;;  %4395 = vmatprep.subr.mxu0 %v4742_v34 }
 0x512   : > { %4406 = vmatprep.subr.mxu1 %v4742_v34  ;;  %4396 = vmatpush3.msra.mxu0 %v2163_v30 }
 0x513   : > { %4407 = vmatpush3.msra.mxu1 %v2167_v31  ;;  %4397 = vmatprep.subr.mxu0 %v4742_v34 }
 0x514   : > { %4408 = vmatprep.subr.mxu1 %v4742_v34  ;;  %4398 = vmatpush3.msra.mxu0 %v2162_v54 }
 0x515   : > { %4409 = vmatpush3.msra.mxu1 %v2166_v32  ;;  %4399 = vmatprep.subr.mxu0 %v4742_v34 }
 0x516   : > { %4410 = vmatprep.subr.mxu1 %v4742_v34  ;;  %4400 = vmatpush3.msra.mxu0 %v2161_v33 }
 0x517   : > { %4411 = vmatpush3.msra.mxu1 %v2165_v35  ;;  %4415 = vmatprep.subr.mxu0 %v4742_v34 }
 0x518   : > { %4426 = vmatprep.subr.mxu1 %v4742_v34 }
 0x5c4   : > { %v1894_v44 = vpop.f32.mrf.mxu0 }
 0x5c5   : > { %v2117_v49 = vsel %vm167_vm3, %v1894_v44, 0.0 }
 0x5c6   : > { %v4377_v45 = vpop.f32.mrf.mxu0 }
 0x5c7   : > { %v2172_v45 = vld [vmem:[%s5494_s9 + $0x58] sm:$0xff] }
 0x5c8   : > { %v1967_v46 = vpop.f32.mrf.mxu1 }
 0x5c9   : > { %v2118_v48 = vsel %vm167_vm3, %v1967_v46, 0.0  ;;  %v2176_v46 = vld [vmem:[%s5494_s9 + $0x78] sm:$0xff] }
 0x5ca   : > { %v4382_v47 = vpop.f32.mrf.mxu1  ;;  %v2119_v52 = vadd.f32 %v2118_v48, %v2117_v49  ;;  %v2175_v48 = vld [vmem:[%s5494_s9 + $0x70] sm:$0xff]  ;;  %v2170_v49 = vld [vmem:[%s5494_s9 + $0x48] sm:$0xff] }
 0x5cb   : > { %v2171_v47 = vld [vmem:[%s5494_s9 + $0x50] sm:$0xff] }
 0x5ce   : > { %v2113_v50 = vpop.f32.mrf.mxu1 }
 0x5cf   : > { %v2040_v55 = vpop.f32.mrf.mxu0  ;;  %v2122_v60 = vsel %vm167_vm3, %v2113_v50, 0.0  ;;  %v2174_v50 = vld [vmem:[%s5494_s9 + $0x68] sm:$0xff] }
 0x5d0   : > { %v2120_v56 = vsel %vm167_vm3, %v2040_v55, 0.0  ;;  %v4392_v57 = vpop.f32.mrf.mxu1  ;;  %v2173_v55 = vld [vmem:[%s5494_s9 + $0x60] sm:$0xff] }
 0x5d1   : > { %v2121_v58 = vadd.f32 %v2120_v56, %v2119_v52  ;;  %v4387_v51 = vpop.f32.mrf.mxu0  ;;  %v2169_v52 = vld [vmem:[%s5494_s9 + $0x40] sm:$0xff] }
 0x5d2   : > { %v3997_v56 = vld [vmem:[%s5497_s21] ss:$0 sm:$0xff]  ;;  %v3998_v57 = vld [vmem:[%s5497_s21 + $0x1] ss:$0 sm:$0xff] }
 0x5d3   : > { %v2123_v61 = vadd.f32 %v2122_v60, %v2121_v58 }
 0x5d5   : > { %v2130_v62 = vadd.f32 %v3994_v59, %v2123_v61 }
 0x5d7   : > { %v5229_v63 = vadd.f32 %v4705_v27, %v2130_v62 }
 0x5d9   : > { %v2134_v2 = vsel %vm167_vm3, %v5229_v63, 0.0 }
 0x5da   : > { %2135 = vadd.xlane.f32.xlu0 %v2134_v2  ;;  %v3999_v2 = vld [vmem:[%s5497_s21 + $0x2] ss:$0 sm:$0xff] }
 0x663   : > { %v2136_v11 = vpop.xlane.xlu0 %2135 }
 0x664   : > { %v2137_v18 = vmul.f32 0.03125, %v2136_v11  ;;  %v4000_v11 = vld [vmem:[%s5497_s21 + $0x3] ss:$0 sm:$0xff] }
 0x666   : > { %v2138_v20 = vsub.f32 %v5229_v63, %v2137_v18 }
 0x668   : > { %v2139_v24 = vmul.f32 %v2138_v20, %v2138_v20 }
 0x66a   : > { %v2140_v28 = vsel %vm167_vm3, %v2139_v24, 0.0 }
 0x66b   : > { %2141 = vadd.xlane.f32.xlu1 %v2140_v28 }
 0x6f4   : > { %v2142_v36 = vpop.xlane.xlu1 %2141 }
 0x6f5   : > { %v2143_v37 = vmul.f32 0.03125, %v2142_v36 }
 0x6f7   : > { %v2144_v38 = vadd.f32 1e-05, %v2143_v37 }
 0x6f9   : > { %4641 = vrsqrt.f32 %v2144_v38 }
 0x706   : > { %v4642_v39 = vpop.eup %4641 }
 0x707   : > { %v2146_v41 = vmul.f32 %v4642_v39, %v2138_v20 }
 0x709   : > { %v2153_v43 = vmul.f32 %v3995_v40, %v2146_v41 }
 0x70b   : > { %v2160_v44 = vadd.f32 %v3996_v42, %v2153_v43 }
 0x70d   : > { %4402 = vmatmul.mubr.msk.f32.vlgmr.msra.gmra.mxu0 %vm167_vm3, %v2160_v44  ;;  %4413 = vmatmul.mubr.msk.f32.vlgmr.msra.gmra.mxu1 %vm167_vm3, %v2160_v44 }
 0x70e   : > { %4416 = vmatpush3.msra.mxu0 %v2172_v45  ;;  %4427 = vmatpush3.msra.mxu1 %v2176_v46 }
 0x70f   : > { %4417 = vmatprep.subr.mxu0 %v4742_v34  ;;  %4428 = vmatprep.subr.mxu1 %v4742_v34 }
 0x710   : > { %4418 = vmatpush3.msra.mxu0 %v2171_v47  ;;  %4429 = vmatpush3.msra.mxu1 %v2175_v48 }
 0x711   : > { %4419 = vmatprep.subr.mxu0 %v4742_v34  ;;  %4430 = vmatprep.subr.mxu1 %v4742_v34 }
 0x712   : > { %4420 = vmatpush3.msra.mxu0 %v2170_v49  ;;  %4431 = vmatpush3.msra.mxu1 %v2174_v50 }
 0x713   : > { %4421 = vmatprep.subr.mxu0 %v4742_v34  ;;  %4432 = vmatprep.subr.mxu1 %v4742_v34 }
 0x714   : > { %4422 = vmatpush3.msra.mxu0 %v2169_v52  ;;  %4423 = vmatprep.mubr.msk.f32.mxu0 %vm4743_vm4, %v4742_v34 }
 0x715   : > { %4433 = vmatpush3.msra.mxu1 %v2173_v55  ;;  %4434 = vmatprep.mubr.msk.f32.mxu1 %vm4743_vm4, %v4742_v34 }
 0x716   : > { %4424 = vmatmul.mubr.msk.f32.vlgmr.msra.gmra.mxu0 %vm167_vm3, %v2160_v44  ;;  %4435 = vmatmul.mubr.msk.f32.vlgmr.msra.gmra.mxu1 %vm167_vm3, %v2160_v44 }
 0x717   : > { %4437 = vmatprep.subr.mxu0 %v4742_v34  ;;  %4442 = vmatprep.subr.mxu1 %v4742_v34 }
 0x718   : > { %4438 = vmatpush3.xpose.msk.msra.mxu0 %vm1176_vm5, %v4901_v0  ;;  %4443 = vmatpush3.xpose.msk.msra.mxu1 %vm1176_vm5, %v4904_v1 }
 0x719   : > { %4439 = vmatprep.mubr.msk.f32.mxu0 %vm4743_vm4, %v4742_v34  ;;  %4444 = vmatprep.mubr.msk.f32.mxu1 %vm4743_vm4, %v4742_v34 }
 0x71a   : > { %4447 = vmatprep.subr.mxu0 %v4742_v34  ;;  %4452 = vmatprep.subr.mxu1 %v4742_v34 }
 0x7cd   : > { %v2274_v58 = vpop.f32.mrf.mxu0  ;;  %v2344_v51 = vpop.f32.mrf.mxu1 }
 0x7ce   : > { %v2275_v59 = vadd.f32 %v3997_v56, %v2274_v58  ;;  %v2345_v60 = vadd.f32 %v3998_v57, %v2344_v51 }
 0x7cf   : > { %v4403_v61 = vpop.f32.mrf.mxu0  ;;  %v4414_v62 = vpop.f32.mrf.mxu1 }
 0x7d0   : > { %4440 = vmatmul.mubr.msk.f32.vlgmr.msra.gmra.mxu0 %vm1176_vm5, %v2275_v59  ;;  %4445 = vmatmul.mubr.msk.f32.vlgmr.msra.gmra.mxu1 %vm1176_vm5, %v2345_v60 }
 0x7d1   : > { %4448 = vmatpush3.xpose.msk.msra.mxu0 %vm1176_vm5, %v4907_v3  ;;  %4453 = vmatpush3.xpose.msk.msra.mxu1 %vm1176_vm5, %v4910_v4 }
 0x7d2   : > { %4449 = vmatprep.mubr.msk.f32.mxu0 %vm4743_vm4, %v4742_v34  ;;  %4454 = vmatprep.mubr.msk.f32.mxu1 %vm4743_vm4, %v4742_v34 }
 0x7d3   : > { %4457 = vmatprep.subr.mxu0 %v4742_v34  ;;  %4462 = vmatprep.subr.mxu1 %v4742_v34 }
 0x7d6   : > { %v2414_v18 = vpop.f32.mrf.mxu0  ;;  %v2484_v20 = vpop.f32.mrf.mxu1 }
 0x7d7   : > { %v2415_v24 = vadd.f32 %v3999_v2, %v2414_v18  ;;  %v2485_v28 = vadd.f32 %v4000_v11, %v2484_v20 }
 0x7d8   : > { %v4425_v53 = vpop.f32.mrf.mxu0  ;;  %v4436_v29 = vpop.f32.mrf.mxu1 }
 0x7d9   : > { %4450 = vmatmul.mubr.msk.f32.vlgmr.msra.gmra.mxu0 %vm1176_vm5, %v2415_v24  ;;  %4455 = vmatmul.mubr.msk.f32.vlgmr.msra.gmra.mxu1 %vm1176_vm5, %v2485_v28 }
 0x7da   : > { %4458 = vmatpush3.msra.mxu0 %v4913_v5  ;;  %4459 = vmatprep.mubr.msk.f32.mxu0 %vm4743_vm4, %v4742_v34 }
 0x7db   : > { %4463 = vmatpush3.msra.mxu1 %v4916_v6  ;;  %4464 = vmatprep.mubr.msk.f32.mxu1 %vm4743_vm4, %v4742_v34 }
 0x7dc   : > { %4467 = vmatprep.subr.mxu0 %v4742_v34  ;;  %4472 = vmatprep.subr.mxu1 %v4742_v34 }
 0x890   : > { %v2565_v30 = vpop.f32.mrf.mxu0  ;;  %v2641_v31 = vpop.f32.mrf.mxu1 }
 0x891   : > { %v2797_v54 = vmul.f32 0.35355338, %v2565_v30  ;;  %v2798_v32 = vmul.f32 0.35355338, %v2641_v31 }
 0x892   : > { %v4441_v33 = vpop.f32.mrf.mxu0  ;;  %v4446_v35 = vpop.f32.mrf.mxu1 }
 0x893   : > { %v2801_v36 = vadd.f32 %v2797_v54, %v4961_v26  ;;  %v2802_v37 = vadd.f32 %v2798_v32, %v4961_v26 }
 0x895   : > { %v2808_v38 = vsel %vm1176_vm5, %v2802_v37, -inf  ;;  %v2805_v39 = vsel %vm1176_vm5, %v2801_v36, -inf }
 0x896   : > { %2809 = vmax.xlane.f32.xlu1 %v2808_v38  ;;  %2806 = vmax.xlane.f32.xlu0 %v2805_v39 }
 0x899   : > { %v2717_v40 = vpop.f32.mrf.mxu0  ;;  %v2793_v41 = vpop.f32.mrf.mxu1 }
 0x89a   : > { %v2799_v42 = vmul.f32 0.35355338, %v2717_v40  ;;  %v2800_v43 = vmul.f32 0.35355338, %v2793_v41 }
 0x89b   : > { %v4451_v44 = vpop.f32.mrf.mxu0  ;;  %v4456_v45 = vpop.f32.mrf.mxu1 }
 0x89c   : > { %v2803_v46 = vadd.f32 %v2799_v42, %v4961_v26  ;;  %v2804_v47 = vadd.f32 %v2800_v43, %v4961_v26  ;;  %v2488_v43 = vld [vmem:[%s5498_s7] sm:$0xff]  ;;  %v2489_v44 = vld [vmem:[%s5498_s7 + $0x8] sm:$0xff]  ;;  %v2491_v45 = vld [vmem:[%s5498_s7 + $0x18] sm:$0xff] }
 0x89e   : > { %v2814_v48 = vsel %vm1176_vm5, %v2804_v47, -inf  ;;  %v2811_v49 = vsel %vm1176_vm5, %v2803_v46, -inf }
 0x89f   : > { %2815 = vmax.xlane.f32.xlu1 %v2814_v48  ;;  %2812 = vmax.xlane.f32.xlu0 %v2811_v49 }
 0x91f   : > { %v2810_v50 = vpop.xlane.xlu1 %2809  ;;  %v2807_v52 = vpop.xlane.xlu0 %2806 }
 0x920   : > { %v2818_v55 = vsub.f32 %v2802_v37, %v2810_v50  ;;  %v2817_v56 = vsub.f32 %v2801_v36, %v2807_v52 }
 0x922   : > { %v2823_v57 = vmul.f32 1.442695, %v2818_v55  ;;  %v2821_v58 = vmul.f32 1.442695, %v2817_v56 }
 0x924   : > { %4643 = vpow2.f32 %v2823_v57 }
 0x925   : > { %4645 = vpow2.f32 %v2821_v58 }
 0x928   : > { %v2816_v51 = vpop.xlane.xlu1 %2815  ;;  %v2813_v59 = vpop.xlane.xlu0 %2812 }
 0x929   : > { %v2820_v60 = vsub.f32 %v2804_v47, %v2816_v51  ;;  %v2819_v61 = vsub.f32 %v2803_v46, %v2813_v59  ;;  %v2490_v47 = vld [vmem:[%s5498_s7 + $0x10] sm:$0xff] }
 0x92b   : > { %v2827_v62 = vmul.f32 1.442695, %v2820_v60  ;;  %v2825_v2 = vmul.f32 1.442695, %v2819_v61 }
 0x92d   : > { %4647 = vpow2.f32 %v2827_v62 }
 0x92e   : > { %4649 = vpow2.f32 %v2825_v2 }
 0x931   : > { %v4644_v11 = vpop.eup %4643 }
 0x932   : > { %v4646_v18 = vpop.eup %4645  ;;  %v2832_v20 = vsel %vm1176_vm5, %v4644_v11, 0.0 }
 0x933   : > { %2833 = vadd.xlane.f32.xlu1 %v2832_v20  ;;  %v2829_v24 = vsel %vm1176_vm5, %v4646_v18, 0.0 }
 0x934   : > { %2830 = vadd.xlane.f32.xlu0 %v2829_v24 }
 0x93a   : > { %v4648_v28 = vpop.eup %4647 }
 0x93b   : > { %v4650_v53 = vpop.eup %4649  ;;  %v2838_v29 = vsel %vm1176_vm5, %v4648_v28, 0.0 }
 0x93c   : > { %2839 = vadd.xlane.f32.xlu1 %v2838_v29  ;;  %v2835_v30 = vsel %vm1176_vm5, %v4650_v53, 0.0  ;;  %v4021_v29 = vld [vmem:[%s5499_s10] ss:$0 sm:$0xff] }
 0x93d   : > { %2836 = vadd.xlane.f32.xlu0 %v2835_v30 }
 0x9bc   : > { %v2834_v31 = vpop.xlane.xlu1 %2833 }
 0x9bd   : > { %4651 = vrcp.f32 %v2834_v31  ;;  %v2831_v54 = vpop.xlane.xlu0 %2830 }
 0x9be   : > { %4653 = vrcp.f32 %v2831_v54 }
 0x9c5   : > { %v2840_v32 = vpop.xlane.xlu1 %2839 }
 0x9c6   : > { %4655 = vrcp.f32 %v2840_v32  ;;  %v2837_v33 = vpop.xlane.xlu0 %2836 }
 0x9c7   : > { %4657 = vrcp.f32 %v2837_v33 }
 0x9ca   : > { %v4652_v35 = vpop.eup %4651 }
 0x9cb   : > { %v4654_v36 = vpop.eup %4653  ;;  %v2846_v37 = vmul.f32 %v4652_v35, %v4644_v11 }
 0x9cc   : > { %v2845_v38 = vmul.f32 %v4654_v36, %v4646_v18 }
 0x9cd   : > { %4465 = vmatmul.mubr.msk.f32.vlgmr.msra.gmra.mxu1 %vm1176_vm5, %v2846_v37 }
 0x9ce   : > { %4460 = vmatmul.mubr.msk.f32.vlgmr.msra.gmra.mxu0 %vm1176_vm5, %v2845_v38  ;;  %4473 = vmatpush3.msra.mxu1 %v4922_v8 }
 0x9cf   : > { %4468 = vmatpush3.msra.mxu0 %v4919_v7  ;;  %4469 = vmatprep.mubr.msk.f32.mxu0 %vm4743_vm4, %v4742_v34 }
 0x9d0   : > { %4474 = vmatprep.mubr.msk.f32.mxu1 %vm4743_vm4, %v4742_v34  ;;  %4477 = vmatprep.subr.mxu0 %v4742_v34 }
 0x9d1   : > { %4482 = vmatprep.subr.mxu1 %v4742_v34 }
 0x9d3   : > { %v4656_v39 = vpop.eup %4655 }
 0x9d4   : > { %v4658_v40 = vpop.eup %4657  ;;  %v2848_v41 = vmul.f32 %v4656_v39, %v4648_v28 }
 0x9d5   : > { %v2847_v42 = vmul.f32 %v4658_v40, %v4650_v53  ;;  %v3453_v40 = vld [vmem:[%s5500_s11 + $0x18] sm:$0xff] }
 0x9d6   : > { %4475 = vmatmul.mubr.msk.f32.vlgmr.msra.gmra.mxu1 %vm1176_vm5, %v2848_v41  ;;  %v3451_v41 = vld [vmem:[%s5500_s11 + $0x8] sm:$0xff] }
 0x9d7   : > { %4470 = vmatmul.mubr.msk.f32.vlgmr.msra.gmra.mxu0 %vm1176_vm5, %v2847_v42  ;;  %4484 = vmatprep.mubr.msk.f32.mxu1 %vm4743_vm4, %v4742_v34  ;;  %v3450_v42 = vld [vmem:[%s5500_s11] sm:$0xff] }
 0x9d8   : > { %4479 = vmatprep.mubr.msk.f32.mxu0 %vm4743_vm4, %v4742_v34  ;;  %4478 = vmatpush3.msra.mxu0 %v2488_v43 }
 0x9d9   : > { %4483 = vmatpush3.msra.mxu1 %v2489_v44  ;;  %4487 = vmatprep.subr.mxu0 %v4742_v34 }
 0x9da   : > { %4492 = vmatprep.subr.mxu1 %v4742_v34 }
 0xa8d   : > { %v2991_v46 = vpop.f32.mrf.mxu1 }
 0xa8e   : > { %v2918_v48 = vpop.f32.mrf.mxu0  ;;  %4485 = vmatmul.mubr.msk.f32.vlgmr.msra.gmra.mxu1 %vm1176_vm5, %v2991_v46 }
 0xa8f   : > { %4480 = vmatmul.mubr.msk.f32.vlgmr.msra.gmra.mxu0 %vm1176_vm5, %v2918_v48  ;;  %v4466_v49 = vpop.f32.mrf.mxu1  ;;  %4493 = vmatpush3.msra.mxu1 %v2491_v45 }
 0xa90   : > { %v4461_v50 = vpop.f32.mrf.mxu0  ;;  %4488 = vmatpush3.msra.mxu0 %v2490_v47  ;;  %4489 = vmatprep.mubr.msk.f32.mxu0 %vm4743_vm4, %v4742_v34  ;;  %v4022_v47 = vld [vmem:[%s5501_s15] ss:$0 sm:$0xff] }
 0xa91   : > { %4494 = vmatprep.mubr.msk.f32.mxu1 %vm4743_vm4, %v4742_v34  ;;  %4497 = vmatprep.subr.mxu0 %v4742_v34  ;;  %v4023_v49 = vld [vmem:[%s5502_s16] ss:$0 sm:$0xff] }
 0xa92   : > { %4508 = vmatprep.subr.mxu1 %v4742_v34 }
 0xa96   : > { %v3137_v52 = vpop.f32.mrf.mxu1 }
 0xa97   : > { %v3064_v55 = vpop.f32.mrf.mxu0  ;;  %4495 = vmatmul.mubr.msk.f32.vlgmr.msra.gmra.mxu1 %vm1176_vm5, %v3137_v52 }
 0xa98   : > { %4490 = vmatmul.mubr.msk.f32.vlgmr.msra.gmra.mxu0 %vm1176_vm5, %v3064_v55  ;;  %v4476_v56 = vpop.f32.mrf.mxu1  ;;  %4524 = vmatprep.mubr.msk.f32.mxu1 %vm4743_vm4, %v4742_v34  ;;  %v3462_v55 = vld [vmem:[%s5503_s18 + $0x38] sm:$0xff] }
 0xa99   : > { %v4471_v57 = vpop.f32.mrf.mxu0  ;;  %4505 = vmatprep.mubr.msk.f32.mxu0 %vm4743_vm4, %v4742_v34  ;;  %4498 = vmatpush3.msra.mxu0 %v3453_v40  ;;  %v3461_v56 = vld [vmem:[%s5503_s18 + $0x30] sm:$0xff] }
 0xa9a   : > { %4499 = vmatprep.subr.mxu0 %v4742_v34  ;;  %4509 = vmatpush3.msra.mxu1 %v3462_v55  ;;  %v3460_v57 = vld [vmem:[%s5503_s18 + $0x28] sm:$0xff] }
 0xa9b   : > { %4510 = vmatprep.subr.mxu1 %v4742_v34 }
 0xa9c   : > { %4511 = vmatpush3.msra.mxu1 %v3461_v56 }
 0xa9d   : > { %4512 = vmatprep.subr.mxu1 %v4742_v34 }
 0xa9e   : > { %4513 = vmatpush3.msra.mxu1 %v3460_v57 }
 0xa9f   : > { %4514 = vmatprep.subr.mxu1 %v4742_v34 }
 0xb4e   : > { %v3283_v58 = vpop.f32.mrf.mxu1 }
 0xb4f   : > { %v3210_v51 = vpop.f32.mrf.mxu0  ;;  %v3434_v62 = vsel %vm167_vm3, %v3283_v58, 0.0  ;;  %v3459_v58 = vld [vmem:[%s5503_s18 + $0x20] sm:$0xff] }
 0xb50   : > { %v4486_v59 = vpop.f32.mrf.mxu1  ;;  %v3433_v61 = vsel %vm167_vm3, %v3210_v51, 0.0  ;;  %4515 = vmatpush3.msra.mxu1 %v3459_v58  ;;  %v3458_v51 = vld [vmem:[%s5503_s18 + $0x18] sm:$0xff] }
 0xb51   : > { %v4481_v60 = vpop.f32.mrf.mxu0  ;;  %v3435_v11 = vadd.f32 %v3434_v62, %v3433_v61  ;;  %4516 = vmatprep.subr.mxu1 %v4742_v34  ;;  %v3457_v59 = vld [vmem:[%s5503_s18 + $0x10] sm:$0xff]  ;;  %v3455_v61 = vld [vmem:[%s5503_s18] sm:$0xff] }
 0xb52   : > { %4517 = vmatpush3.msra.mxu1 %v3458_v51  ;;  %v3456_v60 = vld [vmem:[%s5503_s18 + $0x8] sm:$0xff]  ;;  %v4024_v62 = vld [vmem:[%s5504_s22] ss:$0 sm:$0xff] }
 0xb53   : > { %4518 = vmatprep.subr.mxu1 %v4742_v34 }
 0xb54   : > { %4519 = vmatpush3.msra.mxu1 %v3457_v59 }
 0xb55   : > { %4520 = vmatprep.subr.mxu1 %v4742_v34 }
 0xb56   : > { %4521 = vmatpush3.msra.mxu1 %v3456_v60  ;;  %v3673_v60 = vld [vmem:[%s4888_s20] sm:$0x1] }
 0xb57   : > { %v3429_v2 = vpop.f32.mrf.mxu1  ;;  %4522 = vmatprep.subr.mxu1 %v4742_v34 }
 0xb58   : > { %v3356_v18 = vpop.f32.mrf.mxu0  ;;  %v3438_v30 = vsel %vm167_vm3, %v3429_v2, 0.0  ;;  %4523 = vmatpush3.msra.mxu1 %v3455_v61 }
 0xb59   : > { %v3436_v20 = vsel %vm167_vm3, %v3356_v18, 0.0  ;;  %v4496_v24 = vpop.f32.mrf.mxu1  ;;  %4546 = vmatprep.subr.mxu1 %v4742_v34 }
 0xb5a   : > { %v3437_v28 = vadd.f32 %v3436_v20, %v3435_v11  ;;  %v4491_v53 = vpop.f32.mrf.mxu0 }
 0xb5c   : > { %v3439_v31 = vadd.f32 %v3438_v30, %v3437_v28 }
 0xb5e   : > { %v3446_v54 = vadd.f32 %v4021_v29, %v3439_v31 }
 0xb60   : > { %v5367_v32 = vadd.f32 %v3446_v54, %v5229_v63  ;;  %v3452_v63 = vld [vmem:[%s5500_s11 + $0x10] sm:$0xff] }
 0xb61   : > { %4500 = vmatpush3.msra.mxu0 %v3452_v63 }
 0xb62   : > { %v3464_v33 = vsel %vm167_vm3, %v5367_v32, 0.0  ;;  %4501 = vmatprep.subr.mxu0 %v4742_v34 }
 0xb63   : > { %3465 = vadd.xlane.f32.xlu0 %v3464_v33  ;;  %4502 = vmatpush3.msra.mxu0 %v3451_v41 }
 0xb64   : > { %4503 = vmatprep.subr.mxu0 %v4742_v34 }
 0xb65   : > { %4504 = vmatpush3.msra.mxu0 %v3450_v42 }
 0xb66   : > { %4527 = vmatprep.subr.mxu0 %v4742_v34 }
 0xbec   : > { %v3466_v35 = vpop.xlane.xlu0 %3465 }
 0xbed   : > { %v3467_v36 = vmul.f32 0.03125, %v3466_v35  ;;  %v3661_v35 = vstv %s4028_s23 }
 0xbee   : > { %vm3662_vm7 = vcmp.eq.s32.totalorder %v4924_v9, %v3661_v35 }
 0xbef   : > { %v3468_v37 = vsub.f32 %v5367_v32, %v3467_v36  ;;  %v4026_v36 = vld [vmem:[%s4883_s12] ss:$0 sm:$0xff] }
 0xbf1   : > { %v3469_v38 = vmul.f32 %v3468_v37, %v3468_v37 }
 0xbf3   : > { %v3470_v39 = vsel %vm167_vm3, %v3469_v38, 0.0 }
 0xbf4   : > { %3471 = vadd.xlane.f32.xlu1 %v3470_v39  ;;  %v4029_v39 = vsel %vm3662_vm7, 1.0, %v4742_v34 }
 0xc7d   : > { %v3472_v43 = vpop.xlane.xlu1 %3471 }
 0xc7e   : > { %v3473_v44 = vmul.f32 0.03125, %v3472_v43 }
 0xc80   : > { %v3474_v45 = vadd.f32 1e-05, %v3473_v44 }
 0xc82   : > { %4659 = vrsqrt.f32 %v3474_v45 }
 0xc8f   : > { %v4660_v46 = vpop.eup %4659 }
 0xc90   : > { %v3476_v48 = vmul.f32 %v4660_v46, %v3468_v37 }
 0xc92   : > { %v3483_v50 = vmul.f32 %v4022_v47, %v3476_v48 }
 0xc94   : > { %v3490_v52 = vadd.f32 %v4023_v49, %v3483_v50 }
 0xc96   : > { %4506 = vmatmul.mubr.msk.f32.vlgmr.msra.gmra.mxu0 %vm167_vm3, %v3490_v52 }
 0xc97   : > { %4528 = vmatpush3.xpose.msk.msra.mxu0 %vm167_vm3, %v4957_v23  ;;  %4543 = vmatprep.mubr.msk.f32.mxu0 %vm4743_vm4, %v4742_v34 }
 0xc98   : > { %4529 = vmatprep.subr.mxu0 %v4742_v34 }
 0xc9b   : > { %4530 = vmatpush3.xpose.msk.msra.mxu0 %vm167_vm3, %v4954_v22 }
 0xc9c   : > { %4531 = vmatprep.subr.mxu0 %v4742_v34 }
 0xc9f   : > { %4532 = vmatpush3.xpose.msk.msra.mxu0 %vm167_vm3, %v4951_v21 }
 0xca0   : > { %4533 = vmatprep.subr.mxu0 %v4742_v34 }
 0xca3   : > { %4534 = vmatpush3.xpose.msk.msra.mxu0 %vm167_vm3, %v4945_v17 }
 0xca4   : > { %4535 = vmatprep.subr.mxu0 %v4742_v34 }
 0xca7   : > { %4536 = vmatpush3.xpose.msk.msra.mxu0 %vm167_vm3, %v4942_v16 }
 0xca8   : > { %4537 = vmatprep.subr.mxu0 %v4742_v34 }
 0xcab   : > { %4538 = vmatpush3.xpose.msk.msra.mxu0 %vm167_vm3, %v4939_v15 }
 0xcac   : > { %4539 = vmatprep.subr.mxu0 %v4742_v34 }
 0xcaf   : > { %4540 = vmatpush3.xpose.msk.msra.mxu0 %vm167_vm3, %v4933_v13 }
 0xcb0   : > { %4541 = vmatprep.subr.mxu0 %v4742_v34 }
 0xcb3   : > { %4542 = vmatpush3.xpose.msk.msra.mxu0 %vm167_vm3, %v4930_v12 }
 0xd56   : > { %v3566_v2 = vpop.f32.mrf.mxu0 }
 0xd57   : > { %v3567_v11 = vadd.f32 %v4024_v62, %v3566_v2  ;;  %v3674_v62 = vld [vmem:[%s4893_s27] sm:$0x1] }
 0xd58   : > { %v4507_v18 = vpop.f32.mrf.mxu0 }
 0xd59   : > { %v3570_v20 = vmul.f32 %v3567_v11, %v3567_v11 }
 0xd5b   : > { %v3571_v24 = vmul.f32 %v3570_v20, %v3567_v11 }
 0xd5d   : > { %v3572_v28 = vmul.f32 0.044715, %v3571_v24 }
 0xd5f   : > { %v3573_v53 = vadd.f32 %v3572_v28, %v3567_v11 }
 0xd61   : > { %v3574_v29 = vmul.f32 0.7978846, %v3573_v53 }
 0xd63   : > { %4661 = vtanh.f32 %v3574_v29 }
 0xd70   : > { %v4662_v30 = vpop.eup %4661 }
 0xd71   : > { %v3576_v31 = vadd.f32 1.0, %v4662_v30 }
 0xd73   : > { %v3577_v54 = vmul.f32 0.5, %v3576_v31 }
 0xd75   : > { %v3578_v33 = vmul.f32 %v3577_v54, %v3567_v11 }
 0xd77   : > { %4525 = vmatmul.mubr.msk.f32.vlgmr.msra.gmra.mxu1 %vm3585_vm6, %v3578_v33 }
 0xd78   : > { %4547 = vmatpush3.msra.mxu1 %v4957_v23  ;;  %4562 = vmatprep.mubr.msk.f32.mxu1 %vm4743_vm4, %v4742_v34 }
 0xd79   : > { %4548 = vmatprep.subr.mxu1 %v4742_v34 }
 0xd7a   : > { %4549 = vmatpush3.msra.mxu1 %v4954_v22 }
 0xd7b   : > { %4550 = vmatprep.subr.mxu1 %v4742_v34 }
 0xd7c   : > { %4551 = vmatpush3.msra.mxu1 %v4951_v21 }
 0xd7d   : > { %4552 = vmatprep.subr.mxu1 %v4742_v34 }
 0xd7e   : > { %4553 = vmatpush3.msra.mxu1 %v4945_v17 }
 0xd7f   : > { %4554 = vmatprep.subr.mxu1 %v4742_v34 }
 0xd80   : > { %4555 = vmatpush3.msra.mxu1 %v4942_v16 }
 0xd81   : > { %4556 = vmatprep.subr.mxu1 %v4742_v34 }
 0xd82   : > { %4557 = vmatpush3.msra.mxu1 %v4939_v15 }
 0xd83   : > { %4558 = vmatprep.subr.mxu1 %v4742_v34 }
 0xd84   : > { %4559 = vmatpush3.msra.mxu1 %v4933_v13 }
 0xd85   : > { %4560 = vmatprep.subr.mxu1 %v4742_v34 }
 0xd86   : > { %4561 = vmatpush3.msra.mxu1 %v4930_v12 }
 0xe37   : > { %v3655_v37 = vpop.f32.mrf.mxu1 }
 0xe38   : > { %v3656_v38 = vadd.f32 %v4026_v36, %v3655_v37 }
 0xe39   : > { %v4526_v40 = vpop.f32.mrf.mxu1 }
 0xe3a   : > { %v3659_v63 = vadd.f32 %v3656_v38, %v5367_v32  ;;  %v3808_v38 = vstv %s4709_s0  ;;  %s162_s0 = sadd.s32 1, %s4709_s0  }
 0xe3b   : > { %vm3809_vm11 = vcmp.eq.s32.totalorder %v4926_v10, %v3808_v38  ;;  %vm3887_vm13 = vcmp.eq.s32.totalorder %v4924_v9, %v3808_v38  ;;  %p159_p0 = scmp.ge.s32.totalorder %s162_s0, 8  }
 0xe3c   : > { %v3665_v41 = vmul.f32 %v4029_v39, %v3659_v63  ;;  %vm3896_vm14 = vcmask (%p159_p0), 57344   ;;  %s4744_s26 = smov (%p159_p0), [#allocation2]  }
 0xe3d   :  { %s3904_s28 = sshll.u32 (%p159_p0), %s4744_s26, 4  ;;  %s3905_s28 = int_to_ptr.vmem [resolvable:$true] %s3904_s28 }
 0xe3e   : > { %v3666_v42 = vsel %vm167_vm3, %v3665_v41, 0.0  ;;  %s4665_s1 = scalar_lea.vmem (%p159_p0), %s3905_s28, 16  ;;  %s4669_s2 = scalar_lea.vmem (%p159_p0), %s3905_s28, 32 }
 0xe3f   : > { %v3667_v43 = vrot.slane %v3666_v42, 4  ;;  %p4666_p1 = scmp.ne.s32.totalorder (%p159_p0), %s3905_s28, %s4665_s1  ;;  %p4670_p2 = scmp.lt.s32.totalorder (%p159_p0), %s3905_s28, %s3905_s28 }
 0xe40   :  { %p4671_p3 = scmp.lt.s32.totalorder (%p159_p0), %s4669_s2, %s4665_s1 }
 0xe41   : > { %v3668_v44 = vadd.f32 %v3667_v43, %v3666_v42 }
 0xe42   :  { %p4672_p4 = por (%p159_p0), %p4671_p3, %p4670_p2 }
 0xe43   : > { %v3669_v45 = vrot.slane %v3668_v44, 2 }
 0xe44   :  { %p4673_p5 = pnand (%p159_p0), %p4672_p4, %p4666_p1 }
 0xe45   : > { %v3670_v46 = vadd.f32 %v3669_v45, %v3668_v44 }
 0xe47   : > { %v3671_v47 = vrot.slane %v3670_v46, 1 }
 0xe49   : > { %v3672_v48 = vadd.f32 %v3671_v47, %v3670_v46 }
 0xe4b   : > { %v3675_v49 = vsel %vm167_vm3, %v3672_v48, 0.0 }
 0xe4c   : > { %3676 = vadd.xlane.f32.xlu0 %v3675_v49 }
 0xed5   : > { %v3677_v50 = vpop.xlane.xlu0 %3676 }
 0xed6   : > { %v3678_v52 = vmul.f32 0.03125, %v3677_v50 }
 0xed8   : > { %v3679_v55 = vsub.f32 %v3672_v48, %v3678_v52 }
 0xeda   : > { %v3680_v56 = vmul.f32 %v3679_v55, %v3679_v55 }
 0xedc   : > { %v3681_v32 = vsel %vm167_vm3, %v3680_v56, 0.0 }
 0xedd   : > { %3682 = vadd.xlane.f32.xlu1 %v3681_v32 }
 0xf66   : > { %v3683_v57 = vpop.xlane.xlu1 %3682 }
 0xf67   : > { %v3684_v58 = vmul.f32 0.03125, %v3683_v57 }
 0xf69   : > { %v3685_v51 = vadd.f32 1e-05, %v3684_v58 }
 0xf6b   : > { %4663 = vrsqrt.f32 %v3685_v51 }
 0xf78   : > { %v4664_v59 = vpop.eup %4663 }
 0xf79   : > { %v3687_v61 = vmul.f32 %v4664_v59, %v3679_v55 }
 0xf7b   : > { %v3688_v2 = vmul.f32 %v3687_v61, %v3673_v60 }
 0xf7d   : > { %v3689_v11 = vadd.f32 %v3688_v2, %v3674_v62 }
 0xf7f   : > { %4544 = vmatmul.mubr.msk.f32.vlgmr.msra.gmra.mxu0 %vm167_vm3, %v3689_v11 }
0x103f   : > { %v3783_v18 = vpop.f32.mrf.mxu0 }
0x1040   : > { %v3788_v20 = vsel %vm3787_vm8, %v3783_v18, -inf }
0x1041   : > { %3789 = vmax.xlane.f32.xlu0 %v3788_v20  ;;  %v4545_v24 = vpop.f32.mrf.mxu0 }
0x10ca   : > { %v3790_v28 = vpop.xlane.xlu0 %3789 }
0x10cb   : > { %vm3791_vm9 = vcmp.ge.f32.partialorder %v3783_v18, %v3790_v28 }
0x10cc   : > { %v3792_v53 = vsel %vm3791_vm9, %v4926_v10, 64 }
0x10cd   : > { %v3793_v29 = vsel %vm3787_vm8, %v3792_v53, 2147483647 }
0x10ce   : > { %v3795_v30 = vshra.s32 %v3793_v29, 16  ;;  %v3794_v54 = vand.u32 65535, %v3793_v29 }
0x10d0   : > { %v3797_v31 = vcvt.s32.f32 %v3795_v30  ;;  %v3796_v35 = vcvt.s32.f32 %v3794_v54 }
0x10d2   : > { %3798 = vmin.xlane.f32.xlu1 %v3797_v31 }
0x115b   : > { %v3799_v33 = vpop.xlane.xlu1 %3798 }
0x115c   : > { %vm3800_vm10 = vcmp.eq.f32.partialorder %v3797_v31, %v3799_v33  ;;  %v3805_v37 = vcvt.f32.s32 %v3799_v33 }
0x115d   : > { %v3801_v36 = vsel %vm3800_vm10, %v3796_v35, inf }
0x115e   : > { %3802 = vmin.xlane.f32.xlu0 %v3801_v36  ;;  %v3806_v40 = vshll.u32 %v3805_v37, 16 }
0x11e7   : > { %v3803_v39 = vpop.xlane.xlu0 %3802 }
0x11e8   : > { %v3804_v63 = vcvt.f32.s32 %v3803_v39 }
0x11ea   : > { %v3807_v41 = vadd.s32 %v3806_v40, %v3804_v63 }
0x11ec   : > { %v3810_v42 = vsel %vm3809_vm11, %v3807_v41, %v4701_v25   ;;  %vm3811_vm12 = vcmp.eq.s32.totalorder %v4926_v10, %v3807_v41 }
0x11ed   : > { %v4039_v43 = vsel %vm3811_vm12, 1.0, %v4742_v34  ;;  %v5505_v25 = vmov %v3810_v42  ;;  %3897 = vst.msk [vmem:[#allocation2] sm:$0x1] (%p159_p0), %vm3896_vm14, %v3810_v42 }
0x11ee   : > { %4563 = vmatmul.mubr.msk.f32.vlgmr.msra.gmra.mxu1 %vm3585_vm6, %v4039_v43 }
0x12ae   : > { %v3883_v44 = vpop.f32.mrf.mxu1 }
0x12af   : > { %v3891_v45 = vrot.slane %v3883_v44, %v143_v14  ;;  %161 = sbr.rel (!%p159_p0) target bundleno = 56 (0x38), region = 172 }
0x12b0   : > { %v4564_v46 = vpop.f32.mrf.mxu1 }
0x12b1   : > { %v3892_v47 = vadd.f32 %v4705_v27, %v3891_v45 }
0x12b3   : > { %v3895_v27 = vsel %vm3887_vm13, %v3892_v47, %v4705_v27  }
0x12b4   :  { %4676 = shalt.err (!%p4673_p5)
}
0x12b5   :  { %3907 = dma.vmem_to_hbm [thread:$0]  %s3905_s28, 16, %s4898_s4, [#allocation3]  }
0x12b6   :  { %4697 = dma.done.wait [#allocation3], 16  }
0x12b7   :  { %4698 = vsyncadd [#allocation3], 4294967280 }
0x12b8   :  { %3911 = vsyncpa [#allocation3], 1 }

</bundles_post_ra>
